<compile_context>
chip_gen: v5e
topology: v5e:2x2
jax: 0.10.0
libtpu: 0.0.40
codegen_flags: <defaults>
</compile_context>

<pallas_src>
import jax
import jax.numpy as jnp
from jax.experimental import pallas as pl
from jax.experimental.pallas import tpu as pltpu

# ----------------------------- config ---------------------------------------
B, S, H = 2, 8, 32
NH = 4
DH = H // NH
FFN = 64
VOCAB = 64
NLAYERS = 2
EPS = 1e-5
POS_OFFSET = 2                       # BioGptLearnedPositionalEmbedding offset
NPOS = S + POS_OFFSET
BS = B * S
MASK_NEG = -1e30                     # clamped; finfo.min + score can overflow to -inf

_VMEM = pl.BlockSpec(memory_space=pltpu.MemorySpace.VMEM)


# ----------------------------- kernel helpers --------------------------------
def _layer_norm(x, g, b):
    mu = jnp.mean(x, axis=-1, keepdims=True)
    xc = x - mu
    var = jnp.mean(xc * xc, axis=-1, keepdims=True)
    return xc * jax.lax.rsqrt(var + EPS) * g + b


def _softmax(s):
    m = jnp.max(s, axis=-1, keepdims=True)
    p = jnp.exp(s - m)
    return p / jnp.sum(p, axis=-1, keepdims=True)     # exact (HF parity)


def _erf(x):
    # Abramowitz & Stegun 7.1.26, max abs error ~1.5e-7 (effectively exact for
    # this bf16-matmul pipeline); uses only exp/div/select -> safe Mosaic ops.
    p = 0.3275911
    a1, a2, a3, a4, a5 = (0.254829592, -0.284496736, 1.421413741,
                          -1.453152027, 1.061405429)
    ax = jnp.abs(x)
    t = 1.0 / (1.0 + p * ax)
    poly = ((((a5 * t + a4) * t + a3) * t + a2) * t + a1) * t
    y = 1.0 - poly * jnp.exp(-ax * ax)
    return jnp.where(x < 0.0, -y, y)


def _gelu_exact(x):
    # HF BioGPT uses exact (erf) gelu.
    return 0.5 * x * (1.0 + _erf(x * 0.7071067811865476))


def _bf16(x):
    return x.astype(jnp.bfloat16)


def _split_heads(x):
    # [BS, H] -> [NH, BS, DH]; static lane slices + leading-axis concat only
    # (no cross-tile reshapes/transposes, Mosaic-safe).
    return jnp.concatenate(
        [x[:, h * DH:(h + 1) * DH][None] for h in range(NH)], axis=0)


# ----------------------------- fused kernel ----------------------------------
def _biogpt_fused_kernel(
        x_ref, mask_ref, pos_ref, lbl_ref, pos_tab_ref, lm_w_ref,
        ln1_g_ref, ln1_b_ref,
        wq_ref, bq_ref, wk_ref, bk_ref, wv_ref, bv_ref, wo_ref, bo_ref,
        ln2_g_ref, ln2_b_ref, w1_ref, b1_ref, w2_ref, b2_ref,
        fln_g_ref, fln_b_ref,
        loss_ref, logits_ref, hs0_ref, hs1_ref, hsf_ref):
    f32 = jnp.float32
    scale = DH ** -0.5

    # ---- embedding: inputs_embeds + learned positional embeddings (one-hot gather)
    pos = pos_ref[...]                                         # [BS,1] i32 (offset incl.)
    pcol = jax.lax.broadcasted_iota(jnp.int32, (BS, NPOS), 1)
    pos_oh = (pcol == pos).astype(f32)
    pos_emb = jnp.dot(pos_oh, pos_tab_ref[...], preferred_element_type=f32)
    hidden = x_ref[...] + pos_emb                              # [BS,H] f32
    hs0_ref[...] = hidden                                      # embedding hidden state

    # additive mask over flattened tokens: block-diag(batch) + causal + key pad
    add_mask = mask_ref[...][None]                             # [1,BS,BS] f32

    mid_hs_refs = (hs1_ref,)          # NLAYERS-1 intermediate hidden-state outputs

    for li in range(NLAYERS):
        if li > 0:
            mid_hs_refs[li - 1][...] = hidden                  # HF: snapshot before layer

        # --- self attention (pre-LN), head-batched over all B*NH at once ---
        residual = hidden
        hs = _layer_norm(hidden, ln1_g_ref[li], ln1_b_ref[li])
        hs_b = _bf16(hs)
        q = jnp.dot(hs_b, wq_ref[li], preferred_element_type=f32) + bq_ref[li]
        k = jnp.dot(hs_b, wk_ref[li], preferred_element_type=f32) + bk_ref[li]
        v = jnp.dot(hs_b, wv_ref[li], preferred_element_type=f32) + bv_ref[li]
        q = q * scale

        qh = _split_heads(_bf16(q))                            # [NH,BS,DH] bf16
        kh = _split_heads(_bf16(k))
        vh = _split_heads(_bf16(v))

        s = jnp.einsum('nqd,nkd->nqk', qh, kh,
                       preferred_element_type=f32)             # [NH,BS,BS]
        p = _softmax(s + add_mask)
        o = jnp.einsum('nqk,nkd->nqd', _bf16(p), vh,
                       preferred_element_type=f32)             # [NH,BS,DH]
        attn = jnp.concatenate([o[h] for h in range(NH)], axis=-1)   # [BS,H]
        attn = jnp.dot(_bf16(attn), wo_ref[li],
                       preferred_element_type=f32) + bo_ref[li]
        hidden = residual + attn

        # --- feed forward (pre-LN) ---
        residual = hidden
        hs = _layer_norm(hidden, ln2_g_ref[li], ln2_b_ref[li])
        h1 = jnp.dot(_bf16(hs), w1_ref[li],
                     preferred_element_type=f32) + b1_ref[li]
        h1 = _gelu_exact(h1)                                   # HF BioGPT: exact gelu
        h2 = jnp.dot(_bf16(h1), w2_ref[li],
                     preferred_element_type=f32) + b2_ref[li]
        hidden = residual + h2

    # ---- final layer norm ----
    hidden = _layer_norm(hidden, fln_g_ref[...], fln_b_ref[...])
    hsf_ref[...] = hidden

    # ---- tied LM head (no bias) + fused shifted cross entropy ----
    # TODO(synk): at real BioGPT scale (H=1024, FFN=4096, V~42K) this must be
    # vocab-tiled with an online LSE (bf16 head alone exceeds v7x's 64 MiB VMEM)
    # and per-layer weights streamed via a layer grid axis / pl.Buffered on v6e.
    logits = jnp.dot(_bf16(hidden), lm_w_ref[...], preferred_element_type=f32)
    logits_ref[...] = logits

    labels = lbl_ref[...]                                      # [BS,1] i32, pre-shifted
    mx = jnp.max(logits, axis=-1, keepdims=True)
    lse = jnp.log(jnp.sum(jnp.exp(logits - mx), axis=-1, keepdims=True)) + mx
    col = jax.lax.broadcasted_iota(jnp.int32, (BS, VOCAB), 1)
    tgt = jnp.sum(jnp.where(col == labels, logits, 0.0), axis=-1, keepdims=True)
    valid = (labels != -100).astype(f32)
    num = jnp.sum((lse - tgt) * valid, axis=0, keepdims=True)  # [1,1]
    den = jnp.maximum(jnp.sum(valid, axis=0, keepdims=True), 1.0)
    # kept as a (1,1) VMEM vector store (pure 2D keepdims reduce, no scalar
    # extraction); an SMEM scalar output would save one padded tile writeback.
    loss_ref[...] = num / den


# ----------------------------- parameters ------------------------------------
def init_params(key):
    def nrm(k, shape, scale=0.02):
        return scale * jax.random.normal(k, shape, dtype=jnp.float32)

    ks = jax.random.split(key, 8)
    return {
        "embed_tokens": nrm(ks[0], (VOCAB, H)),                 # tied LM head
        "embed_positions": nrm(ks[1], (NPOS, H)),
        "final_ln_g": jnp.ones((1, H), jnp.float32),
        "final_ln_b": jnp.zeros((1, H), jnp.float32),
        "ln1_g": jnp.ones((NLAYERS, 1, H), jnp.float32),
        "ln1_b": jnp.zeros((NLAYERS, 1, H), jnp.float32),
        "wq": nrm(ks[2], (NLAYERS, H, H)),
        "bq": jnp.zeros((NLAYERS, 1, H), jnp.float32),
        "wk": nrm(ks[3], (NLAYERS, H, H)),
        "bk": jnp.zeros((NLAYERS, 1, H), jnp.float32),
        "wv": nrm(ks[4], (NLAYERS, H, H)),
        "bv": jnp.zeros((NLAYERS, 1, H), jnp.float32),
        "wo": nrm(ks[5], (NLAYERS, H, H)),
        "bo": jnp.zeros((NLAYERS, 1, H), jnp.float32),
        "ln2_g": jnp.ones((NLAYERS, 1, H), jnp.float32),
        "ln2_b": jnp.zeros((NLAYERS, 1, H), jnp.float32),
        "w1": nrm(ks[6], (NLAYERS, H, FFN)),
        "b1": jnp.zeros((NLAYERS, 1, FFN), jnp.float32),
        "w2": nrm(ks[7], (NLAYERS, FFN, H)),
        "b2": jnp.zeros((NLAYERS, 1, H), jnp.float32),
    }


# ----------------------------- forward ---------------------------------------
def biogpt_forward(params, input_embeds, attn_masks, full_labels):
    """Single fused pallas_call mirroring BioGptForCausalLM(inputs_embeds=...,
    attention_mask=..., labels=..., output_hidden_states=True)."""
    Bq, Sq, Hq = input_embeds.shape
    bf16 = jnp.bfloat16

    # Tiny integer glue kept in XLA: HF learned-position indices, label shift,
    # and the additive attention mask over the flattened [BS, BS] token grid.
    am_i = attn_masks.astype(jnp.int32)
    positions = jnp.cumsum(am_i, axis=1) * am_i - 1 + POS_OFFSET          # [B,S]
    pos_flat = positions.reshape(-1, 1).astype(jnp.int32)                 # [BS,1]
    shift_labels = jnp.concatenate(
        [full_labels[:, 1:], jnp.full((Bq, 1), -100, full_labels.dtype)], axis=1)
    lbl_flat = shift_labels.reshape(-1, 1).astype(jnp.int32)              # [BS,1]

    tok = jnp.arange(BS, dtype=jnp.int32)
    bt, st = tok // S, tok % S
    same_batch = bt[:, None] == bt[None, :]
    causal = st[None, :] <= st[:, None]
    key_ok = (am_i.reshape(-1) > 0)[None, :]                              # [1,BS]
    allow = same_batch & causal & key_ok
    add_mask = jnp.where(allow, 0.0, MASK_NEG).astype(jnp.float32)        # [BS,BS]

    out_shapes = (
        jax.ShapeDtypeStruct((1, 1), jnp.float32),               # loss
        jax.ShapeDtypeStruct((BS, VOCAB), jnp.float32),          # logits (flat)
        jax.ShapeDtypeStruct((BS, H), jnp.float32),              # hidden_states[0]
        jax.ShapeDtypeStruct((BS, H), jnp.float32),              # hidden_states[1]
        jax.ShapeDtypeStruct((BS, H), jnp.float32),              # hidden_states[-1]
    )
    # TODO(synk): on v7x (2 TensorCores) split the batch via grid=(B,) with
    # dimension_semantics=("parallel",) and per-batch partial loss/valid sums;
    # kept gridless here since v5e/v6e have one TC and a grid only adds per-step
    # overhead at this size.
    loss2d, logits, hs0, hs1, hsf = pl.pallas_call(
        _biogpt_fused_kernel,
        out_shape=out_shapes,
        in_specs=[_VMEM] * 24,
        out_specs=(_VMEM,) * 5,
    )(
        input_embeds.reshape(BS, Hq).astype(jnp.float32),
        add_mask,
        pos_flat,
        lbl_flat,
        params["embed_positions"],
        params["embed_tokens"].T.astype(bf16),                   # tied LM head, no bias
        params["ln1_g"], params["ln1_b"],
        params["wq"].astype(bf16), params["bq"],
        params["wk"].astype(bf16), params["bk"],
        params["wv"].astype(bf16), params["bv"],
        params["wo"].astype(bf16), params["bo"],
        params["ln2_g"], params["ln2_b"],
        params["w1"].astype(bf16), params["b1"],
        params["w2"].astype(bf16), params["b2"],
        params["final_ln_g"], params["final_ln_b"],
    )
    return {
        "loss": loss2d[0, 0],
        "logits": logits.reshape(Bq, Sq, VOCAB),
        # HF returns (embedding_out, layer_1_out, final_layernorm_out) for 2 layers.
        "hidden_states": (hs0.reshape(Bq, Sq, Hq),
                          hs1.reshape(Bq, Sq, Hq),
                          hsf.reshape(Bq, Sq, Hq)),
    }


# ----------------------------- main -------------------------------------------
if __name__ == "__main__":
    key = jax.random.PRNGKey(0)
    kp, ke, kl = jax.random.split(key, 3)

    params = init_params(kp)

    input_embeds = jax.random.normal(ke, (B, S, H), dtype=jnp.float32)
    # padding at the end of example 1 exercises the padding mask / ignore_index
    attn_masks = jnp.array([[1] * S, [1] * (S - 2) + [0] * 2], dtype=jnp.int32)
    full_labels = jax.random.randint(kl, (B, S), 0, VOCAB, dtype=jnp.int32)
    full_labels = jnp.where(attn_masks == 1, full_labels, -100)

    fwd = jax.jit(biogpt_forward)
    outputs = fwd(params, input_embeds, attn_masks, full_labels)
    jax.block_until_ready(outputs["loss"])
    jax.block_until_ready(outputs["logits"])

    assert outputs["logits"].shape == (B, S, VOCAB)
    assert outputs["loss"].shape == ()
    assert len(outputs["hidden_states"]) == NLAYERS + 1
    assert bool(jnp.isfinite(outputs["loss"]))
    assert bool(jnp.all(jnp.isfinite(outputs["logits"])))
    # TODO(synk): LoRA / adapter / prefix-tuning branches of the wrapper are
    # disabled in the reference (__init__ defaults / assert) and are not modeled.
    print("KERNEL_OK")
</pallas_src>

<mosaic_0001>
module attributes {stable_mosaic.version = 11 : i64} {
  func.func @_biogpt_fused_kernel(%arg0: memref<16x32xf32, #tpu.memory_space<vmem>>, %arg1: memref<16x16xf32, #tpu.memory_space<vmem>>, %arg2: memref<16x1xi32, #tpu.memory_space<vmem>>, %arg3: memref<16x1xi32, #tpu.memory_space<vmem>>, %arg4: memref<10x32xf32, #tpu.memory_space<vmem>>, %arg5: memref<32x64xbf16, #tpu.memory_space<vmem>>, %arg6: memref<2x1x32xf32, #tpu.memory_space<vmem>>, %arg7: memref<2x1x32xf32, #tpu.memory_space<vmem>>, %arg8: memref<2x32x32xbf16, #tpu.memory_space<vmem>>, %arg9: memref<2x1x32xf32, #tpu.memory_space<vmem>>, %arg10: memref<2x32x32xbf16, #tpu.memory_space<vmem>>, %arg11: memref<2x1x32xf32, #tpu.memory_space<vmem>>, %arg12: memref<2x32x32xbf16, #tpu.memory_space<vmem>>, %arg13: memref<2x1x32xf32, #tpu.memory_space<vmem>>, %arg14: memref<2x32x32xbf16, #tpu.memory_space<vmem>>, %arg15: memref<2x1x32xf32, #tpu.memory_space<vmem>>, %arg16: memref<2x1x32xf32, #tpu.memory_space<vmem>>, %arg17: memref<2x1x32xf32, #tpu.memory_space<vmem>>, %arg18: memref<2x32x64xbf16, #tpu.memory_space<vmem>>, %arg19: memref<2x1x64xf32, #tpu.memory_space<vmem>>, %arg20: memref<2x64x32xbf16, #tpu.memory_space<vmem>>, %arg21: memref<2x1x32xf32, #tpu.memory_space<vmem>>, %arg22: memref<1x32xf32, #tpu.memory_space<vmem>>, %arg23: memref<1x32xf32, #tpu.memory_space<vmem>>, %arg24: memref<1x1xf32, #tpu.memory_space<vmem>>, %arg25: memref<16x64xf32, #tpu.memory_space<vmem>>, %arg26: memref<16x32xf32, #tpu.memory_space<vmem>>, %arg27: memref<16x32xf32, #tpu.memory_space<vmem>>, %arg28: memref<16x32xf32, #tpu.memory_space<vmem>>) attributes {dimension_semantics = [], scalar_prefetch = 0 : i64, scratch_operands = 0 : i64, tpu.core_type = #tpu.core_type<tc>} {
    %c0 = arith.constant 0 : index
    %c0_0 = arith.constant 0 : index
    %0 = vector.load %arg2[%c0, %c0_0] : memref<16x1xi32, #tpu.memory_space<vmem>>, vector<16x1xi32>
    %1 = tpu.iota {dimensions = array<i32: 1>} : vector<16x10xi32>
    %2 = vector.broadcast %0 : vector<16x1xi32> to vector<16x10xi32>
    %3 = arith.cmpi eq, %1, %2 : vector<16x10xi32>
    %4 = arith.extui %3 : vector<16x10xi1> to vector<16x10xi32>
    %5 = arith.sitofp %4 : vector<16x10xi32> to vector<16x10xf32>
    %c0_1 = arith.constant 0 : index
    %c0_2 = arith.constant 0 : index
    %6 = vector.load %arg4[%c0_1, %c0_2] : memref<10x32xf32, #tpu.memory_space<vmem>>, vector<10x32xf32>
    %cst = arith.constant dense<0.000000e+00> : vector<16x32xf32>
    %7 = tpu.matmul %5, %6, %cst {dimension_numbers = #tpu.dot_dimension_numbers<[1], [0], [0], [1], [0, 0, 1, 1], [], []>} : vector<16x10xf32>, vector<10x32xf32>, vector<16x32xf32> -> vector<16x32xf32>
    %c0_3 = arith.constant 0 : index
    %c0_4 = arith.constant 0 : index
    %8 = vector.load %arg0[%c0_3, %c0_4] : memref<16x32xf32, #tpu.memory_space<vmem>>, vector<16x32xf32>
    %9 = arith.addf %8, %7 : vector<16x32xf32>
    %c0_5 = arith.constant 0 : index
    %c0_6 = arith.constant 0 : index
    %10 = vector.load %arg26[%c0_5, %c0_6] : memref<16x32xf32, #tpu.memory_space<vmem>>, vector<16x32xf32>
    tpu.vector_store %arg26[%c0_5, %c0_6], %9 {strides = array<i32>} : memref<16x32xf32, #tpu.memory_space<vmem>>, vector<16x32xf32>,
    %c0_7 = arith.constant 0 : index
    %c0_8 = arith.constant 0 : index
    %11 = vector.load %arg1[%c0_7, %c0_8] : memref<16x16xf32, #tpu.memory_space<vmem>>, vector<16x16xf32>
    %12 = vector.shape_cast %11 : vector<16x16xf32> to vector<1x16x16xf32>
    %c0_9 = arith.constant 0 : index
    %c0_10 = arith.constant 0 : index
    %c0_11 = arith.constant 0 : index
    %13 = vector.load %arg6[%c0_9, %c0_10, %c0_11] : memref<2x1x32xf32, #tpu.memory_space<vmem>>, vector<1x1x32xf32>
    %14 = vector.shape_cast %13 : vector<1x1x32xf32> to vector<1x32xf32>
    %c0_12 = arith.constant 0 : index
    %c0_13 = arith.constant 0 : index
    %c0_14 = arith.constant 0 : index
    %15 = vector.load %arg7[%c0_12, %c0_13, %c0_14] : memref<2x1x32xf32, #tpu.memory_space<vmem>>, vector<1x1x32xf32>
    %16 = vector.shape_cast %15 : vector<1x1x32xf32> to vector<1x32xf32>
    %cst_15 = arith.constant dense<0.000000e+00> : vector<16xf32>
    %17 = vector.multi_reduction <add>, %9, %cst_15 [1] : vector<16x32xf32> to vector<16xf32>
    %18 = vector.shape_cast %17 : vector<16xf32> to vector<16x1xf32>
    %cst_16 = arith.constant 3.200000e+01 : f32
    %19 = vector.broadcast %cst_16 : f32 to vector<16x1xf32>
    %20 = arith.divf %18, %19 : vector<16x1xf32>
    %21 = vector.broadcast %20 : vector<16x1xf32> to vector<16x32xf32>
    %22 = arith.subf %9, %21 : vector<16x32xf32>
    %23 = arith.mulf %22, %22 : vector<16x32xf32>
    %cst_17 = arith.constant dense<0.000000e+00> : vector<16xf32>
    %24 = vector.multi_reduction <add>, %23, %cst_17 [1] : vector<16x32xf32> to vector<16xf32>
    %25 = vector.shape_cast %24 : vector<16xf32> to vector<16x1xf32>
    %cst_18 = arith.constant 3.200000e+01 : f32
    %26 = vector.broadcast %cst_18 : f32 to vector<16x1xf32>
    %27 = arith.divf %25, %26 : vector<16x1xf32>
    %cst_19 = arith.constant 9.99999974E-6 : f32
    %28 = vector.broadcast %cst_19 : f32 to vector<16x1xf32>
    %29 = arith.addf %27, %28 : vector<16x1xf32>
    %30 = math.rsqrt %29 : vector<16x1xf32>
    %31 = vector.broadcast %30 : vector<16x1xf32> to vector<16x32xf32>
    %32 = arith.mulf %22, %31 : vector<16x32xf32>
    %33 = vector.broadcast %14 : vector<1x32xf32> to vector<16x32xf32>
    %34 = arith.mulf %32, %33 : vector<16x32xf32>
    %35 = vector.broadcast %16 : vector<1x32xf32> to vector<16x32xf32>
    %36 = arith.addf %34, %35 : vector<16x32xf32>
    %37 = arith.truncf %36 : vector<16x32xf32> to vector<16x32xbf16>
    %c0_20 = arith.constant 0 : index
    %c0_21 = arith.constant 0 : index
    %c0_22 = arith.constant 0 : index
    %38 = vector.load %arg8[%c0_20, %c0_21, %c0_22] : memref<2x32x32xbf16, #tpu.memory_space<vmem>>, vector<1x32x32xbf16>
    %39 = vector.shape_cast %38 : vector<1x32x32xbf16> to vector<32x32xbf16>
    %cst_23 = arith.constant dense<0.000000e+00> : vector<16x32xf32>
    %40 = tpu.matmul %37, %39, %cst_23 {dimension_numbers = #tpu.dot_dimension_numbers<[1], [0], [0], [1], [0, 0, 1, 1], [], []>} : vector<16x32xbf16>, vector<32x32xbf16>, vector<16x32xf32> -> vector<16x32xf32>
    %c0_24 = arith.constant 0 : index
    %c0_25 = arith.constant 0 : index
    %c0_26 = arith.constant 0 : index
    %41 = vector.load %arg9[%c0_24, %c0_25, %c0_26] : memref<2x1x32xf32, #tpu.memory_space<vmem>>, vector<1x1x32xf32>
    %42 = vector.shape_cast %41 : vector<1x1x32xf32> to vector<1x32xf32>
    %43 = vector.broadcast %42 : vector<1x32xf32> to vector<16x32xf32>
    %44 = arith.addf %40, %43 : vector<16x32xf32>
    %c0_27 = arith.constant 0 : index
    %c0_28 = arith.constant 0 : index
    %c0_29 = arith.constant 0 : index
    %45 = vector.load %arg10[%c0_27, %c0_28, %c0_29] : memref<2x32x32xbf16, #tpu.memory_space<vmem>>, vector<1x32x32xbf16>
    %46 = vector.shape_cast %45 : vector<1x32x32xbf16> to vector<32x32xbf16>
    %cst_30 = arith.constant dense<0.000000e+00> : vector<16x32xf32>
    %47 = tpu.matmul %37, %46, %cst_30 {dimension_numbers = #tpu.dot_dimension_numbers<[1], [0], [0], [1], [0, 0, 1, 1], [], []>} : vector<16x32xbf16>, vector<32x32xbf16>, vector<16x32xf32> -> vector<16x32xf32>
    %c0_31 = arith.constant 0 : index
    %c0_32 = arith.constant 0 : index
    %c0_33 = arith.constant 0 : index
    %48 = vector.load %arg11[%c0_31, %c0_32, %c0_33] : memref<2x1x32xf32, #tpu.memory_space<vmem>>, vector<1x1x32xf32>
    %49 = vector.shape_cast %48 : vector<1x1x32xf32> to vector<1x32xf32>
    %50 = vector.broadcast %49 : vector<1x32xf32> to vector<16x32xf32>
    %51 = arith.addf %47, %50 : vector<16x32xf32>
    %c0_34 = arith.constant 0 : index
    %c0_35 = arith.constant 0 : index
    %c0_36 = arith.constant 0 : index
    %52 = vector.load %arg12[%c0_34, %c0_35, %c0_36] : memref<2x32x32xbf16, #tpu.memory_space<vmem>>, vector<1x32x32xbf16>
    %53 = vector.shape_cast %52 : vector<1x32x32xbf16> to vector<32x32xbf16>
    %cst_37 = arith.constant dense<0.000000e+00> : vector<16x32xf32>
    %54 = tpu.matmul %37, %53, %cst_37 {dimension_numbers = #tpu.dot_dimension_numbers<[1], [0], [0], [1], [0, 0, 1, 1], [], []>} : vector<16x32xbf16>, vector<32x32xbf16>, vector<16x32xf32> -> vector<16x32xf32>
    %c0_38 = arith.constant 0 : index
    %c0_39 = arith.constant 0 : index
    %c0_40 = arith.constant 0 : index
    %55 = vector.load %arg13[%c0_38, %c0_39, %c0_40] : memref<2x1x32xf32, #tpu.memory_space<vmem>>, vector<1x1x32xf32>
    %56 = vector.shape_cast %55 : vector<1x1x32xf32> to vector<1x32xf32>
    %57 = vector.broadcast %56 : vector<1x32xf32> to vector<16x32xf32>
    %58 = arith.addf %54, %57 : vector<16x32xf32>
    %cst_41 = arith.constant 0.353553385 : f32
    %59 = vector.broadcast %cst_41 : f32 to vector<16x32xf32>
    %60 = arith.mulf %44, %59 : vector<16x32xf32>
    %61 = arith.truncf %60 : vector<16x32xf32> to vector<16x32xbf16>
    %62 = vector.extract_strided_slice %61 {offsets = [0, 0], sizes = [16, 8], strides = [1, 1]} : vector<16x32xbf16> to vector<16x8xbf16>
    %63 = vector.shape_cast %62 : vector<16x8xbf16> to vector<1x16x8xbf16>
    %64 = vector.extract_strided_slice %61 {offsets = [0, 8], sizes = [16, 8], strides = [1, 1]} : vector<16x32xbf16> to vector<16x8xbf16>
    %65 = vector.shape_cast %64 : vector<16x8xbf16> to vector<1x16x8xbf16>
    %66 = vector.extract_strided_slice %61 {offsets = [0, 16], sizes = [16, 8], strides = [1, 1]} : vector<16x32xbf16> to vector<16x8xbf16>
    %67 = vector.shape_cast %66 : vector<16x8xbf16> to vector<1x16x8xbf16>
    %68 = vector.extract_strided_slice %61 {offsets = [0, 24], sizes = [16, 8], strides = [1, 1]} : vector<16x32xbf16> to vector<16x8xbf16>
    %69 = vector.shape_cast %68 : vector<16x8xbf16> to vector<1x16x8xbf16>
    %70 = tpu.concatenate %63, %65, %67, %69 in 0 : vector<1x16x8xbf16>, vector<1x16x8xbf16>, vector<1x16x8xbf16>, vector<1x16x8xbf16> -> vector<4x16x8xbf16>
    %71 = arith.truncf %51 : vector<16x32xf32> to vector<16x32xbf16>
    %72 = vector.extract_strided_slice %71 {offsets = [0, 0], sizes = [16, 8], strides = [1, 1]} : vector<16x32xbf16> to vector<16x8xbf16>
    %73 = vector.shape_cast %72 : vector<16x8xbf16> to vector<1x16x8xbf16>
    %74 = vector.extract_strided_slice %71 {offsets = [0, 8], sizes = [16, 8], strides = [1, 1]} : vector<16x32xbf16> to vector<16x8xbf16>
    %75 = vector.shape_cast %74 : vector<16x8xbf16> to vector<1x16x8xbf16>
    %76 = vector.extract_strided_slice %71 {offsets = [0, 16], sizes = [16, 8], strides = [1, 1]} : vector<16x32xbf16> to vector<16x8xbf16>
    %77 = vector.shape_cast %76 : vector<16x8xbf16> to vector<1x16x8xbf16>
    %78 = vector.extract_strided_slice %71 {offsets = [0, 24], sizes = [16, 8], strides = [1, 1]} : vector<16x32xbf16> to vector<16x8xbf16>
    %79 = vector.shape_cast %78 : vector<16x8xbf16> to vector<1x16x8xbf16>
    %80 = tpu.concatenate %73, %75, %77, %79 in 0 : vector<1x16x8xbf16>, vector<1x16x8xbf16>, vector<1x16x8xbf16>, vector<1x16x8xbf16> -> vector<4x16x8xbf16>
    %81 = arith.truncf %58 : vector<16x32xf32> to vector<16x32xbf16>
    %82 = vector.extract_strided_slice %81 {offsets = [0, 0], sizes = [16, 8], strides = [1, 1]} : vector<16x32xbf16> to vector<16x8xbf16>
    %83 = vector.shape_cast %82 : vector<16x8xbf16> to vector<1x16x8xbf16>
    %84 = vector.extract_strided_slice %81 {offsets = [0, 8], sizes = [16, 8], strides = [1, 1]} : vector<16x32xbf16> to vector<16x8xbf16>
    %85 = vector.shape_cast %84 : vector<16x8xbf16> to vector<1x16x8xbf16>
    %86 = vector.extract_strided_slice %81 {offsets = [0, 16], sizes = [16, 8], strides = [1, 1]} : vector<16x32xbf16> to vector<16x8xbf16>
    %87 = vector.shape_cast %86 : vector<16x8xbf16> to vector<1x16x8xbf16>
    %88 = vector.extract_strided_slice %81 {offsets = [0, 24], sizes = [16, 8], strides = [1, 1]} : vector<16x32xbf16> to vector<16x8xbf16>
    %89 = vector.shape_cast %88 : vector<16x8xbf16> to vector<1x16x8xbf16>
    %90 = tpu.concatenate %83, %85, %87, %89 in 0 : vector<1x16x8xbf16>, vector<1x16x8xbf16>, vector<1x16x8xbf16>, vector<1x16x8xbf16> -> vector<4x16x8xbf16>
    "tpu.trace_start"() <{level = 10 : i32, message = "nqd,nkd->nqk"}> : () -> ()
    %cst_42 = arith.constant dense<0.000000e+00> : vector<4x16x16xf32>
    %91 = tpu.matmul %70, %80, %cst_42 {dimension_numbers = #tpu.dot_dimension_numbers<[2], [2], [1], [1], [0, 0, 0, 1, 1, 1], [0], [0]>} : vector<4x16x8xbf16>, vector<4x16x8xbf16>, vector<4x16x16xf32> -> vector<4x16x16xf32>
    "tpu.trace_stop"() : () -> ()
    %92 = vector.broadcast %12 : vector<1x16x16xf32> to vector<4x16x16xf32>
    %93 = arith.addf %91, %92 : vector<4x16x16xf32>
    %cst_43 = arith.constant dense<0xFF800000> : vector<4x16xf32>
    %94 = vector.multi_reduction <maximumf>, %93, %cst_43 [2] : vector<4x16x16xf32> to vector<4x16xf32>
    %95 = vector.shape_cast %94 : vector<4x16xf32> to vector<4x16x1xf32>
    %96 = vector.broadcast %95 : vector<4x16x1xf32> to vector<4x16x16xf32>
    %97 = arith.subf %93, %96 : vector<4x16x16xf32>
    %98 = math.exp %97 : vector<4x16x16xf32>
    %cst_44 = arith.constant dense<0.000000e+00> : vector<4x16xf32>
    %99 = vector.multi_reduction <add>, %98, %cst_44 [2] : vector<4x16x16xf32> to vector<4x16xf32>
    %100 = vector.shape_cast %99 : vector<4x16xf32> to vector<4x16x1xf32>
    %101 = vector.broadcast %100 : vector<4x16x1xf32> to vector<4x16x16xf32>
    %102 = arith.divf %98, %101 : vector<4x16x16xf32>
    %103 = arith.truncf %102 : vector<4x16x16xf32> to vector<4x16x16xbf16>
    "tpu.trace_start"() <{level = 10 : i32, message = "nqk,nkd->nqd"}> : () -> ()
    %cst_45 = arith.constant dense<0.000000e+00> : vector<4x16x8xf32>
    %104 = tpu.matmul %103, %90, %cst_45 {dimension_numbers = #tpu.dot_dimension_numbers<[2], [1], [1], [2], [0, 0, 0, 1, 1, 2], [0], [0]>} : vector<4x16x16xbf16>, vector<4x16x8xbf16>, vector<4x16x8xf32> -> vector<4x16x8xf32>
    "tpu.trace_stop"() : () -> ()
    %105 = vector.extract_strided_slice %104 {offsets = [0, 0, 0], sizes = [1, 16, 8], strides = [1, 1, 1]} : vector<4x16x8xf32> to vector<1x16x8xf32>
    %106 = vector.shape_cast %105 : vector<1x16x8xf32> to vector<16x8xf32>
    %107 = vector.extract_strided_slice %104 {offsets = [1, 0, 0], sizes = [1, 16, 8], strides = [1, 1, 1]} : vector<4x16x8xf32> to vector<1x16x8xf32>
    %108 = vector.shape_cast %107 : vector<1x16x8xf32> to vector<16x8xf32>
    %109 = vector.extract_strided_slice %104 {offsets = [2, 0, 0], sizes = [1, 16, 8], strides = [1, 1, 1]} : vector<4x16x8xf32> to vector<1x16x8xf32>
    %110 = vector.shape_cast %109 : vector<1x16x8xf32> to vector<16x8xf32>
    %111 = vector.extract_strided_slice %104 {offsets = [3, 0, 0], sizes = [1, 16, 8], strides = [1, 1, 1]} : vector<4x16x8xf32> to vector<1x16x8xf32>
    %112 = vector.shape_cast %111 : vector<1x16x8xf32> to vector<16x8xf32>
    %113 = tpu.concatenate %106, %108, %110, %112 in 1 : vector<16x8xf32>, vector<16x8xf32>, vector<16x8xf32>, vector<16x8xf32> -> vector<16x32xf32>
    %114 = arith.truncf %113 : vector<16x32xf32> to vector<16x32xbf16>
    %c0_46 = arith.constant 0 : index
    %c0_47 = arith.constant 0 : index
    %c0_48 = arith.constant 0 : index
    %115 = vector.load %arg14[%c0_46, %c0_47, %c0_48] : memref<2x32x32xbf16, #tpu.memory_space<vmem>>, vector<1x32x32xbf16>
    %116 = vector.shape_cast %115 : vector<1x32x32xbf16> to vector<32x32xbf16>
    %cst_49 = arith.constant dense<0.000000e+00> : vector<16x32xf32>
    %117 = tpu.matmul %114, %116, %cst_49 {dimension_numbers = #tpu.dot_dimension_numbers<[1], [0], [0], [1], [0, 0, 1, 1], [], []>} : vector<16x32xbf16>, vector<32x32xbf16>, vector<16x32xf32> -> vector<16x32xf32>
    %c0_50 = arith.constant 0 : index
    %c0_51 = arith.constant 0 : index
    %c0_52 = arith.constant 0 : index
    %118 = vector.load %arg15[%c0_50, %c0_51, %c0_52] : memref<2x1x32xf32, #tpu.memory_space<vmem>>, vector<1x1x32xf32>
    %119 = vector.shape_cast %118 : vector<1x1x32xf32> to vector<1x32xf32>
    %120 = vector.broadcast %119 : vector<1x32xf32> to vector<16x32xf32>
    %121 = arith.addf %117, %120 : vector<16x32xf32>
    %122 = arith.addf %9, %121 : vector<16x32xf32>
    %c0_53 = arith.constant 0 : index
    %c0_54 = arith.constant 0 : index
    %c0_55 = arith.constant 0 : index
    %123 = vector.load %arg16[%c0_53, %c0_54, %c0_55] : memref<2x1x32xf32, #tpu.memory_space<vmem>>, vector<1x1x32xf32>
    %124 = vector.shape_cast %123 : vector<1x1x32xf32> to vector<1x32xf32>
    %c0_56 = arith.constant 0 : index
    %c0_57 = arith.constant 0 : index
    %c0_58 = arith.constant 0 : index
    %125 = vector.load %arg17[%c0_56, %c0_57, %c0_58] : memref<2x1x32xf32, #tpu.memory_space<vmem>>, vector<1x1x32xf32>
    %126 = vector.shape_cast %125 : vector<1x1x32xf32> to vector<1x32xf32>
    %cst_59 = arith.constant dense<0.000000e+00> : vector<16xf32>
    %127 = vector.multi_reduction <add>, %122, %cst_59 [1] : vector<16x32xf32> to vector<16xf32>
    %128 = vector.shape_cast %127 : vector<16xf32> to vector<16x1xf32>
    %cst_60 = arith.constant 3.200000e+01 : f32
    %129 = vector.broadcast %cst_60 : f32 to vector<16x1xf32>
    %130 = arith.divf %128, %129 : vector<16x1xf32>
    %131 = vector.broadcast %130 : vector<16x1xf32> to vector<16x32xf32>
    %132 = arith.subf %122, %131 : vector<16x32xf32>
    %133 = arith.mulf %132, %132 : vector<16x32xf32>
    %cst_61 = arith.constant dense<0.000000e+00> : vector<16xf32>
    %134 = vector.multi_reduction <add>, %133, %cst_61 [1] : vector<16x32xf32> to vector<16xf32>
    %135 = vector.shape_cast %134 : vector<16xf32> to vector<16x1xf32>
    %cst_62 = arith.constant 3.200000e+01 : f32
    %136 = vector.broadcast %cst_62 : f32 to vector<16x1xf32>
    %137 = arith.divf %135, %136 : vector<16x1xf32>
    %cst_63 = arith.constant 9.99999974E-6 : f32
    %138 = vector.broadcast %cst_63 : f32 to vector<16x1xf32>
    %139 = arith.addf %137, %138 : vector<16x1xf32>
    %140 = math.rsqrt %139 : vector<16x1xf32>
    %141 = vector.broadcast %140 : vector<16x1xf32> to vector<16x32xf32>
    %142 = arith.mulf %132, %141 : vector<16x32xf32>
    %143 = vector.broadcast %124 : vector<1x32xf32> to vector<16x32xf32>
    %144 = arith.mulf %142, %143 : vector<16x32xf32>
    %145 = vector.broadcast %126 : vector<1x32xf32> to vector<16x32xf32>
    %146 = arith.addf %144, %145 : vector<16x32xf32>
    %147 = arith.truncf %146 : vector<16x32xf32> to vector<16x32xbf16>
    %c0_64 = arith.constant 0 : index
    %c0_65 = arith.constant 0 : index
    %c0_66 = arith.constant 0 : index
    %148 = vector.load %arg18[%c0_64, %c0_65, %c0_66] : memref<2x32x64xbf16, #tpu.memory_space<vmem>>, vector<1x32x64xbf16>
    %149 = vector.shape_cast %148 : vector<1x32x64xbf16> to vector<32x64xbf16>
    %cst_67 = arith.constant dense<0.000000e+00> : vector<16x64xf32>
    %150 = tpu.matmul %147, %149, %cst_67 {dimension_numbers = #tpu.dot_dimension_numbers<[1], [0], [0], [1], [0, 0, 1, 1], [], []>} : vector<16x32xbf16>, vector<32x64xbf16>, vector<16x64xf32> -> vector<16x64xf32>
    %c0_68 = arith.constant 0 : index
    %c0_69 = arith.constant 0 : index
    %c0_70 = arith.constant 0 : index
    %151 = vector.load %arg19[%c0_68, %c0_69, %c0_70] : memref<2x1x64xf32, #tpu.memory_space<vmem>>, vector<1x1x64xf32>
    %152 = vector.shape_cast %151 : vector<1x1x64xf32> to vector<1x64xf32>
    %153 = vector.broadcast %152 : vector<1x64xf32> to vector<16x64xf32>
    %154 = arith.addf %150, %153 : vector<16x64xf32>
    %cst_71 = arith.constant 5.000000e-01 : f32
    %155 = vector.broadcast %cst_71 : f32 to vector<16x64xf32>
    %156 = arith.mulf %155, %154 : vector<16x64xf32>
    %cst_72 = arith.constant 0.707106769 : f32
    %157 = vector.broadcast %cst_72 : f32 to vector<16x64xf32>
    %158 = arith.mulf %154, %157 : vector<16x64xf32>
    %159 = math.absf %158 : vector<16x64xf32>
    %cst_73 = arith.constant 0.327591091 : f32
    %160 = vector.broadcast %cst_73 : f32 to vector<16x64xf32>
    %161 = arith.mulf %160, %159 : vector<16x64xf32>
    %cst_74 = arith.constant 1.000000e+00 : f32
    %162 = vector.broadcast %cst_74 : f32 to vector<16x64xf32>
    %163 = arith.addf %162, %161 : vector<16x64xf32>
    %cst_75 = arith.constant 1.000000e+00 : f32
    %164 = vector.broadcast %cst_75 : f32 to vector<16x64xf32>
    %165 = arith.divf %164, %163 : vector<16x64xf32>
    %cst_76 = arith.constant 1.06140542 : f32
    %166 = vector.broadcast %cst_76 : f32 to vector<16x64xf32>
    %167 = arith.mulf %166, %165 : vector<16x64xf32>
    %cst_77 = arith.constant -1.45315206 : f32
    %168 = vector.broadcast %cst_77 : f32 to vector<16x64xf32>
    %169 = arith.addf %167, %168 : vector<16x64xf32>
    %170 = arith.mulf %169, %165 : vector<16x64xf32>
    %cst_78 = arith.constant 1.42141378 : f32
    %171 = vector.broadcast %cst_78 : f32 to vector<16x64xf32>
    %172 = arith.addf %170, %171 : vector<16x64xf32>
    %173 = arith.mulf %172, %165 : vector<16x64xf32>
    %cst_79 = arith.constant -0.284496725 : f32
    %174 = vector.broadcast %cst_79 : f32 to vector<16x64xf32>
    %175 = arith.addf %173, %174 : vector<16x64xf32>
    %176 = arith.mulf %175, %165 : vector<16x64xf32>
    %cst_80 = arith.constant 0.254829586 : f32
    %177 = vector.broadcast %cst_80 : f32 to vector<16x64xf32>
    %178 = arith.addf %176, %177 : vector<16x64xf32>
    %179 = arith.mulf %178, %165 : vector<16x64xf32>
    %cst_81 = arith.constant 0.000000e+00 : f32
    %180 = vector.broadcast %cst_81 : f32 to vector<16x64xf32>
    %181 = arith.subf %180, %159 : vector<16x64xf32>
    %182 = arith.mulf %181, %159 : vector<16x64xf32>
    %183 = math.exp %182 : vector<16x64xf32>
    %184 = arith.mulf %179, %183 : vector<16x64xf32>
    %cst_82 = arith.constant 1.000000e+00 : f32
    %185 = vector.broadcast %cst_82 : f32 to vector<16x64xf32>
    %186 = arith.subf %185, %184 : vector<16x64xf32>
    %cst_83 = arith.constant 0.000000e+00 : f32
    %187 = vector.broadcast %cst_83 : f32 to vector<16x64xf32>
    %188 = arith.cmpf olt, %158, %187 : vector<16x64xf32>
    %cst_84 = arith.constant 0.000000e+00 : f32
    %189 = vector.broadcast %cst_84 : f32 to vector<16x64xf32>
    %190 = arith.subf %189, %186 : vector<16x64xf32>
    %191 = arith.select %188, %190, %186 : vector<16x64xi1>, vector<16x64xf32>
    %cst_85 = arith.constant 1.000000e+00 : f32
    %192 = vector.broadcast %cst_85 : f32 to vector<16x64xf32>
    %193 = arith.addf %192, %191 : vector<16x64xf32>
    %194 = arith.mulf %156, %193 : vector<16x64xf32>
    %195 = arith.truncf %194 : vector<16x64xf32> to vector<16x64xbf16>
    %c0_86 = arith.constant 0 : index
    %c0_87 = arith.constant 0 : index
    %c0_88 = arith.constant 0 : index
    %196 = vector.load %arg20[%c0_86, %c0_87, %c0_88] : memref<2x64x32xbf16, #tpu.memory_space<vmem>>, vector<1x64x32xbf16>
    %197 = vector.shape_cast %196 : vector<1x64x32xbf16> to vector<64x32xbf16>
    %cst_89 = arith.constant dense<0.000000e+00> : vector<16x32xf32>
    %198 = tpu.matmul %195, %197, %cst_89 {dimension_numbers = #tpu.dot_dimension_numbers<[1], [0], [0], [1], [0, 0, 1, 1], [], []>} : vector<16x64xbf16>, vector<64x32xbf16>, vector<16x32xf32> -> vector<16x32xf32>
    %c0_90 = arith.constant 0 : index
    %c0_91 = arith.constant 0 : index
    %c0_92 = arith.constant 0 : index
    %199 = vector.load %arg21[%c0_90, %c0_91, %c0_92] : memref<2x1x32xf32, #tpu.memory_space<vmem>>, vector<1x1x32xf32>
    %200 = vector.shape_cast %199 : vector<1x1x32xf32> to vector<1x32xf32>
    %201 = vector.broadcast %200 : vector<1x32xf32> to vector<16x32xf32>
    %202 = arith.addf %198, %201 : vector<16x32xf32>
    %203 = arith.addf %122, %202 : vector<16x32xf32>
    %c0_93 = arith.constant 0 : index
    %c0_94 = arith.constant 0 : index
    %204 = vector.load %arg27[%c0_93, %c0_94] : memref<16x32xf32, #tpu.memory_space<vmem>>, vector<16x32xf32>
    tpu.vector_store %arg27[%c0_93, %c0_94], %203 {strides = array<i32>} : memref<16x32xf32, #tpu.memory_space<vmem>>, vector<16x32xf32>,
    %c1 = arith.constant 1 : index
    %c0_95 = arith.constant 0 : index
    %c0_96 = arith.constant 0 : index
    %205 = vector.load %arg6[%c1, %c0_95, %c0_96] : memref<2x1x32xf32, #tpu.memory_space<vmem>>, vector<1x1x32xf32>
    %206 = vector.shape_cast %205 : vector<1x1x32xf32> to vector<1x32xf32>
    %c1_97 = arith.constant 1 : index
    %c0_98 = arith.constant 0 : index
    %c0_99 = arith.constant 0 : index
    %207 = vector.load %arg7[%c1_97, %c0_98, %c0_99] : memref<2x1x32xf32, #tpu.memory_space<vmem>>, vector<1x1x32xf32>
    %208 = vector.shape_cast %207 : vector<1x1x32xf32> to vector<1x32xf32>
    %cst_100 = arith.constant dense<0.000000e+00> : vector<16xf32>
    %209 = vector.multi_reduction <add>, %203, %cst_100 [1] : vector<16x32xf32> to vector<16xf32>
    %210 = vector.shape_cast %209 : vector<16xf32> to vector<16x1xf32>
    %cst_101 = arith.constant 3.200000e+01 : f32
    %211 = vector.broadcast %cst_101 : f32 to vector<16x1xf32>
    %212 = arith.divf %210, %211 : vector<16x1xf32>
    %213 = vector.broadcast %212 : vector<16x1xf32> to vector<16x32xf32>
    %214 = arith.subf %203, %213 : vector<16x32xf32>
    %215 = arith.mulf %214, %214 : vector<16x32xf32>
    %cst_102 = arith.constant dense<0.000000e+00> : vector<16xf32>
    %216 = vector.multi_reduction <add>, %215, %cst_102 [1] : vector<16x32xf32> to vector<16xf32>
    %217 = vector.shape_cast %216 : vector<16xf32> to vector<16x1xf32>
    %cst_103 = arith.constant 3.200000e+01 : f32
    %218 = vector.broadcast %cst_103 : f32 to vector<16x1xf32>
    %219 = arith.divf %217, %218 : vector<16x1xf32>
    %cst_104 = arith.constant 9.99999974E-6 : f32
    %220 = vector.broadcast %cst_104 : f32 to vector<16x1xf32>
    %221 = arith.addf %219, %220 : vector<16x1xf32>
    %222 = math.rsqrt %221 : vector<16x1xf32>
    %223 = vector.broadcast %222 : vector<16x1xf32> to vector<16x32xf32>
    %224 = arith.mulf %214, %223 : vector<16x32xf32>
    %225 = vector.broadcast %206 : vector<1x32xf32> to vector<16x32xf32>
    %226 = arith.mulf %224, %225 : vector<16x32xf32>
    %227 = vector.broadcast %208 : vector<1x32xf32> to vector<16x32xf32>
    %228 = arith.addf %226, %227 : vector<16x32xf32>
    %229 = arith.truncf %228 : vector<16x32xf32> to vector<16x32xbf16>
    %c1_105 = arith.constant 1 : index
    %c0_106 = arith.constant 0 : index
    %c0_107 = arith.constant 0 : index
    %230 = vector.load %arg8[%c1_105, %c0_106, %c0_107] : memref<2x32x32xbf16, #tpu.memory_space<vmem>>, vector<1x32x32xbf16>
    %231 = vector.shape_cast %230 : vector<1x32x32xbf16> to vector<32x32xbf16>
    %cst_108 = arith.constant dense<0.000000e+00> : vector<16x32xf32>
    %232 = tpu.matmul %229, %231, %cst_108 {dimension_numbers = #tpu.dot_dimension_numbers<[1], [0], [0], [1], [0, 0, 1, 1], [], []>} : vector<16x32xbf16>, vector<32x32xbf16>, vector<16x32xf32> -> vector<16x32xf32>
    %c1_109 = arith.constant 1 : index
    %c0_110 = arith.constant 0 : index
    %c0_111 = arith.constant 0 : index
    %233 = vector.load %arg9[%c1_109, %c0_110, %c0_111] : memref<2x1x32xf32, #tpu.memory_space<vmem>>, vector<1x1x32xf32>
    %234 = vector.shape_cast %233 : vector<1x1x32xf32> to vector<1x32xf32>
    %235 = vector.broadcast %234 : vector<1x32xf32> to vector<16x32xf32>
    %236 = arith.addf %232, %235 : vector<16x32xf32>
    %c1_112 = arith.constant 1 : index
    %c0_113 = arith.constant 0 : index
    %c0_114 = arith.constant 0 : index
    %237 = vector.load %arg10[%c1_112, %c0_113, %c0_114] : memref<2x32x32xbf16, #tpu.memory_space<vmem>>, vector<1x32x32xbf16>
    %238 = vector.shape_cast %237 : vector<1x32x32xbf16> to vector<32x32xbf16>
    %cst_115 = arith.constant dense<0.000000e+00> : vector<16x32xf32>
    %239 = tpu.matmul %229, %238, %cst_115 {dimension_numbers = #tpu.dot_dimension_numbers<[1], [0], [0], [1], [0, 0, 1, 1], [], []>} : vector<16x32xbf16>, vector<32x32xbf16>, vector<16x32xf32> -> vector<16x32xf32>
    %c1_116 = arith.constant 1 : index
    %c0_117 = arith.constant 0 : index
    %c0_118 = arith.constant 0 : index
    %240 = vector.load %arg11[%c1_116, %c0_117, %c0_118] : memref<2x1x32xf32, #tpu.memory_space<vmem>>, vector<1x1x32xf32>
    %241 = vector.shape_cast %240 : vector<1x1x32xf32> to vector<1x32xf32>
    %242 = vector.broadcast %241 : vector<1x32xf32> to vector<16x32xf32>
    %243 = arith.addf %239, %242 : vector<16x32xf32>
    %c1_119 = arith.constant 1 : index
    %c0_120 = arith.constant 0 : index
    %c0_121 = arith.constant 0 : index
    %244 = vector.load %arg12[%c1_119, %c0_120, %c0_121] : memref<2x32x32xbf16, #tpu.memory_space<vmem>>, vector<1x32x32xbf16>
    %245 = vector.shape_cast %244 : vector<1x32x32xbf16> to vector<32x32xbf16>
    %cst_122 = arith.constant dense<0.000000e+00> : vector<16x32xf32>
    %246 = tpu.matmul %229, %245, %cst_122 {dimension_numbers = #tpu.dot_dimension_numbers<[1], [0], [0], [1], [0, 0, 1, 1], [], []>} : vector<16x32xbf16>, vector<32x32xbf16>, vector<16x32xf32> -> vector<16x32xf32>
    %c1_123 = arith.constant 1 : index
    %c0_124 = arith.constant 0 : index
    %c0_125 = arith.constant 0 : index
    %247 = vector.load %arg13[%c1_123, %c0_124, %c0_125] : memref<2x1x32xf32, #tpu.memory_space<vmem>>, vector<1x1x32xf32>
    %248 = vector.shape_cast %247 : vector<1x1x32xf32> to vector<1x32xf32>
    %249 = vector.broadcast %248 : vector<1x32xf32> to vector<16x32xf32>
    %250 = arith.addf %246, %249 : vector<16x32xf32>
    %cst_126 = arith.constant 0.353553385 : f32
    %251 = vector.broadcast %cst_126 : f32 to vector<16x32xf32>
    %252 = arith.mulf %236, %251 : vector<16x32xf32>
    %253 = arith.truncf %252 : vector<16x32xf32> to vector<16x32xbf16>
    %254 = vector.extract_strided_slice %253 {offsets = [0, 0], sizes = [16, 8], strides = [1, 1]} : vector<16x32xbf16> to vector<16x8xbf16>
    %255 = vector.shape_cast %254 : vector<16x8xbf16> to vector<1x16x8xbf16>
    %256 = vector.extract_strided_slice %253 {offsets = [0, 8], sizes = [16, 8], strides = [1, 1]} : vector<16x32xbf16> to vector<16x8xbf16>
    %257 = vector.shape_cast %256 : vector<16x8xbf16> to vector<1x16x8xbf16>
    %258 = vector.extract_strided_slice %253 {offsets = [0, 16], sizes = [16, 8], strides = [1, 1]} : vector<16x32xbf16> to vector<16x8xbf16>
    %259 = vector.shape_cast %258 : vector<16x8xbf16> to vector<1x16x8xbf16>
    %260 = vector.extract_strided_slice %253 {offsets = [0, 24], sizes = [16, 8], strides = [1, 1]} : vector<16x32xbf16> to vector<16x8xbf16>
    %261 = vector.shape_cast %260 : vector<16x8xbf16> to vector<1x16x8xbf16>
    %262 = tpu.concatenate %255, %257, %259, %261 in 0 : vector<1x16x8xbf16>, vector<1x16x8xbf16>, vector<1x16x8xbf16>, vector<1x16x8xbf16> -> vector<4x16x8xbf16>
    %263 = arith.truncf %243 : vector<16x32xf32> to vector<16x32xbf16>
    %264 = vector.extract_strided_slice %263 {offsets = [0, 0], sizes = [16, 8], strides = [1, 1]} : vector<16x32xbf16> to vector<16x8xbf16>
    %265 = vector.shape_cast %264 : vector<16x8xbf16> to vector<1x16x8xbf16>
    %266 = vector.extract_strided_slice %263 {offsets = [0, 8], sizes = [16, 8], strides = [1, 1]} : vector<16x32xbf16> to vector<16x8xbf16>
    %267 = vector.shape_cast %266 : vector<16x8xbf16> to vector<1x16x8xbf16>
    %268 = vector.extract_strided_slice %263 {offsets = [0, 16], sizes = [16, 8], strides = [1, 1]} : vector<16x32xbf16> to vector<16x8xbf16>
    %269 = vector.shape_cast %268 : vector<16x8xbf16> to vector<1x16x8xbf16>
    %270 = vector.extract_strided_slice %263 {offsets = [0, 24], sizes = [16, 8], strides = [1, 1]} : vector<16x32xbf16> to vector<16x8xbf16>
    %271 = vector.shape_cast %270 : vector<16x8xbf16> to vector<1x16x8xbf16>
    %272 = tpu.concatenate %265, %267, %269, %271 in 0 : vector<1x16x8xbf16>, vector<1x16x8xbf16>, vector<1x16x8xbf16>, vector<1x16x8xbf16> -> vector<4x16x8xbf16>
    %273 = arith.truncf %250 : vector<16x32xf32> to vector<16x32xbf16>
    %274 = vector.extract_strided_slice %273 {offsets = [0, 0], sizes = [16, 8], strides = [1, 1]} : vector<16x32xbf16> to vector<16x8xbf16>
    %275 = vector.shape_cast %274 : vector<16x8xbf16> to vector<1x16x8xbf16>
    %276 = vector.extract_strided_slice %273 {offsets = [0, 8], sizes = [16, 8], strides = [1, 1]} : vector<16x32xbf16> to vector<16x8xbf16>
    %277 = vector.shape_cast %276 : vector<16x8xbf16> to vector<1x16x8xbf16>
    %278 = vector.extract_strided_slice %273 {offsets = [0, 16], sizes = [16, 8], strides = [1, 1]} : vector<16x32xbf16> to vector<16x8xbf16>
    %279 = vector.shape_cast %278 : vector<16x8xbf16> to vector<1x16x8xbf16>
    %280 = vector.extract_strided_slice %273 {offsets = [0, 24], sizes = [16, 8], strides = [1, 1]} : vector<16x32xbf16> to vector<16x8xbf16>
    %281 = vector.shape_cast %280 : vector<16x8xbf16> to vector<1x16x8xbf16>
    %282 = tpu.concatenate %275, %277, %279, %281 in 0 : vector<1x16x8xbf16>, vector<1x16x8xbf16>, vector<1x16x8xbf16>, vector<1x16x8xbf16> -> vector<4x16x8xbf16>
    "tpu.trace_start"() <{level = 10 : i32, message = "nqd,nkd->nqk"}> : () -> ()
    %cst_127 = arith.constant dense<0.000000e+00> : vector<4x16x16xf32>
    %283 = tpu.matmul %262, %272, %cst_127 {dimension_numbers = #tpu.dot_dimension_numbers<[2], [2], [1], [1], [0, 0, 0, 1, 1, 1], [0], [0]>} : vector<4x16x8xbf16>, vector<4x16x8xbf16>, vector<4x16x16xf32> -> vector<4x16x16xf32>
    "tpu.trace_stop"() : () -> ()
    %284 = vector.broadcast %12 : vector<1x16x16xf32> to vector<4x16x16xf32>
    %285 = arith.addf %283, %284 : vector<4x16x16xf32>
    %cst_128 = arith.constant dense<0xFF800000> : vector<4x16xf32>
    %286 = vector.multi_reduction <maximumf>, %285, %cst_128 [2] : vector<4x16x16xf32> to vector<4x16xf32>
    %287 = vector.shape_cast %286 : vector<4x16xf32> to vector<4x16x1xf32>
    %288 = vector.broadcast %287 : vector<4x16x1xf32> to vector<4x16x16xf32>
    %289 = arith.subf %285, %288 : vector<4x16x16xf32>
    %290 = math.exp %289 : vector<4x16x16xf32>
    %cst_129 = arith.constant dense<0.000000e+00> : vector<4x16xf32>
    %291 = vector.multi_reduction <add>, %290, %cst_129 [2] : vector<4x16x16xf32> to vector<4x16xf32>
    %292 = vector.shape_cast %291 : vector<4x16xf32> to vector<4x16x1xf32>
    %293 = vector.broadcast %292 : vector<4x16x1xf32> to vector<4x16x16xf32>
    %294 = arith.divf %290, %293 : vector<4x16x16xf32>
    %295 = arith.truncf %294 : vector<4x16x16xf32> to vector<4x16x16xbf16>
    "tpu.trace_start"() <{level = 10 : i32, message = "nqk,nkd->nqd"}> : () -> ()
    %cst_130 = arith.constant dense<0.000000e+00> : vector<4x16x8xf32>
    %296 = tpu.matmul %295, %282, %cst_130 {dimension_numbers = #tpu.dot_dimension_numbers<[2], [1], [1], [2], [0, 0, 0, 1, 1, 2], [0], [0]>} : vector<4x16x16xbf16>, vector<4x16x8xbf16>, vector<4x16x8xf32> -> vector<4x16x8xf32>
    "tpu.trace_stop"() : () -> ()
    %297 = vector.extract_strided_slice %296 {offsets = [0, 0, 0], sizes = [1, 16, 8], strides = [1, 1, 1]} : vector<4x16x8xf32> to vector<1x16x8xf32>
    %298 = vector.shape_cast %297 : vector<1x16x8xf32> to vector<16x8xf32>
    %299 = vector.extract_strided_slice %296 {offsets = [1, 0, 0], sizes = [1, 16, 8], strides = [1, 1, 1]} : vector<4x16x8xf32> to vector<1x16x8xf32>
    %300 = vector.shape_cast %299 : vector<1x16x8xf32> to vector<16x8xf32>
    %301 = vector.extract_strided_slice %296 {offsets = [2, 0, 0], sizes = [1, 16, 8], strides = [1, 1, 1]} : vector<4x16x8xf32> to vector<1x16x8xf32>
    %302 = vector.shape_cast %301 : vector<1x16x8xf32> to vector<16x8xf32>
    %303 = vector.extract_strided_slice %296 {offsets = [3, 0, 0], sizes = [1, 16, 8], strides = [1, 1, 1]} : vector<4x16x8xf32> to vector<1x16x8xf32>
    %304 = vector.shape_cast %303 : vector<1x16x8xf32> to vector<16x8xf32>
    %305 = tpu.concatenate %298, %300, %302, %304 in 1 : vector<16x8xf32>, vector<16x8xf32>, vector<16x8xf32>, vector<16x8xf32> -> vector<16x32xf32>
    %306 = arith.truncf %305 : vector<16x32xf32> to vector<16x32xbf16>
    %c1_131 = arith.constant 1 : index
    %c0_132 = arith.constant 0 : index
    %c0_133 = arith.constant 0 : index
    %307 = vector.load %arg14[%c1_131, %c0_132, %c0_133] : memref<2x32x32xbf16, #tpu.memory_space<vmem>>, vector<1x32x32xbf16>
    %308 = vector.shape_cast %307 : vector<1x32x32xbf16> to vector<32x32xbf16>
    %cst_134 = arith.constant dense<0.000000e+00> : vector<16x32xf32>
    %309 = tpu.matmul %306, %308, %cst_134 {dimension_numbers = #tpu.dot_dimension_numbers<[1], [0], [0], [1], [0, 0, 1, 1], [], []>} : vector<16x32xbf16>, vector<32x32xbf16>, vector<16x32xf32> -> vector<16x32xf32>
    %c1_135 = arith.constant 1 : index
    %c0_136 = arith.constant 0 : index
    %c0_137 = arith.constant 0 : index
    %310 = vector.load %arg15[%c1_135, %c0_136, %c0_137] : memref<2x1x32xf32, #tpu.memory_space<vmem>>, vector<1x1x32xf32>
    %311 = vector.shape_cast %310 : vector<1x1x32xf32> to vector<1x32xf32>
    %312 = vector.broadcast %311 : vector<1x32xf32> to vector<16x32xf32>
    %313 = arith.addf %309, %312 : vector<16x32xf32>
    %314 = arith.addf %203, %313 : vector<16x32xf32>
    %c1_138 = arith.constant 1 : index
    %c0_139 = arith.constant 0 : index
    %c0_140 = arith.constant 0 : index
    %315 = vector.load %arg16[%c1_138, %c0_139, %c0_140] : memref<2x1x32xf32, #tpu.memory_space<vmem>>, vector<1x1x32xf32>
    %316 = vector.shape_cast %315 : vector<1x1x32xf32> to vector<1x32xf32>
    %c1_141 = arith.constant 1 : index
    %c0_142 = arith.constant 0 : index
    %c0_143 = arith.constant 0 : index
    %317 = vector.load %arg17[%c1_141, %c0_142, %c0_143] : memref<2x1x32xf32, #tpu.memory_space<vmem>>, vector<1x1x32xf32>
    %318 = vector.shape_cast %317 : vector<1x1x32xf32> to vector<1x32xf32>
    %cst_144 = arith.constant dense<0.000000e+00> : vector<16xf32>
    %319 = vector.multi_reduction <add>, %314, %cst_144 [1] : vector<16x32xf32> to vector<16xf32>
    %320 = vector.shape_cast %319 : vector<16xf32> to vector<16x1xf32>
    %cst_145 = arith.constant 3.200000e+01 : f32
    %321 = vector.broadcast %cst_145 : f32 to vector<16x1xf32>
    %322 = arith.divf %320, %321 : vector<16x1xf32>
    %323 = vector.broadcast %322 : vector<16x1xf32> to vector<16x32xf32>
    %324 = arith.subf %314, %323 : vector<16x32xf32>
    %325 = arith.mulf %324, %324 : vector<16x32xf32>
    %cst_146 = arith.constant dense<0.000000e+00> : vector<16xf32>
    %326 = vector.multi_reduction <add>, %325, %cst_146 [1] : vector<16x32xf32> to vector<16xf32>
    %327 = vector.shape_cast %326 : vector<16xf32> to vector<16x1xf32>
    %cst_147 = arith.constant 3.200000e+01 : f32
    %328 = vector.broadcast %cst_147 : f32 to vector<16x1xf32>
    %329 = arith.divf %327, %328 : vector<16x1xf32>
    %cst_148 = arith.constant 9.99999974E-6 : f32
    %330 = vector.broadcast %cst_148 : f32 to vector<16x1xf32>
    %331 = arith.addf %329, %330 : vector<16x1xf32>
    %332 = math.rsqrt %331 : vector<16x1xf32>
    %333 = vector.broadcast %332 : vector<16x1xf32> to vector<16x32xf32>
    %334 = arith.mulf %324, %333 : vector<16x32xf32>
    %335 = vector.broadcast %316 : vector<1x32xf32> to vector<16x32xf32>
    %336 = arith.mulf %334, %335 : vector<16x32xf32>
    %337 = vector.broadcast %318 : vector<1x32xf32> to vector<16x32xf32>
    %338 = arith.addf %336, %337 : vector<16x32xf32>
    %339 = arith.truncf %338 : vector<16x32xf32> to vector<16x32xbf16>
    %c1_149 = arith.constant 1 : index
    %c0_150 = arith.constant 0 : index
    %c0_151 = arith.constant 0 : index
    %340 = vector.load %arg18[%c1_149, %c0_150, %c0_151] : memref<2x32x64xbf16, #tpu.memory_space<vmem>>, vector<1x32x64xbf16>
    %341 = vector.shape_cast %340 : vector<1x32x64xbf16> to vector<32x64xbf16>
    %cst_152 = arith.constant dense<0.000000e+00> : vector<16x64xf32>
    %342 = tpu.matmul %339, %341, %cst_152 {dimension_numbers = #tpu.dot_dimension_numbers<[1], [0], [0], [1], [0, 0, 1, 1], [], []>} : vector<16x32xbf16>, vector<32x64xbf16>, vector<16x64xf32> -> vector<16x64xf32>
    %c1_153 = arith.constant 1 : index
    %c0_154 = arith.constant 0 : index
    %c0_155 = arith.constant 0 : index
    %343 = vector.load %arg19[%c1_153, %c0_154, %c0_155] : memref<2x1x64xf32, #tpu.memory_space<vmem>>, vector<1x1x64xf32>
    %344 = vector.shape_cast %343 : vector<1x1x64xf32> to vector<1x64xf32>
    %345 = vector.broadcast %344 : vector<1x64xf32> to vector<16x64xf32>
    %346 = arith.addf %342, %345 : vector<16x64xf32>
    %cst_156 = arith.constant 5.000000e-01 : f32
    %347 = vector.broadcast %cst_156 : f32 to vector<16x64xf32>
    %348 = arith.mulf %347, %346 : vector<16x64xf32>
    %cst_157 = arith.constant 0.707106769 : f32
    %349 = vector.broadcast %cst_157 : f32 to vector<16x64xf32>
    %350 = arith.mulf %346, %349 : vector<16x64xf32>
    %351 = math.absf %350 : vector<16x64xf32>
    %cst_158 = arith.constant 0.327591091 : f32
    %352 = vector.broadcast %cst_158 : f32 to vector<16x64xf32>
    %353 = arith.mulf %352, %351 : vector<16x64xf32>
    %cst_159 = arith.constant 1.000000e+00 : f32
    %354 = vector.broadcast %cst_159 : f32 to vector<16x64xf32>
    %355 = arith.addf %354, %353 : vector<16x64xf32>
    %cst_160 = arith.constant 1.000000e+00 : f32
    %356 = vector.broadcast %cst_160 : f32 to vector<16x64xf32>
    %357 = arith.divf %356, %355 : vector<16x64xf32>
    %cst_161 = arith.constant 1.06140542 : f32
    %358 = vector.broadcast %cst_161 : f32 to vector<16x64xf32>
    %359 = arith.mulf %358, %357 : vector<16x64xf32>
    %cst_162 = arith.constant -1.45315206 : f32
    %360 = vector.broadcast %cst_162 : f32 to vector<16x64xf32>
    %361 = arith.addf %359, %360 : vector<16x64xf32>
    %362 = arith.mulf %361, %357 : vector<16x64xf32>
    %cst_163 = arith.constant 1.42141378 : f32
    %363 = vector.broadcast %cst_163 : f32 to vector<16x64xf32>
    %364 = arith.addf %362, %363 : vector<16x64xf32>
    %365 = arith.mulf %364, %357 : vector<16x64xf32>
    %cst_164 = arith.constant -0.284496725 : f32
    %366 = vector.broadcast %cst_164 : f32 to vector<16x64xf32>
    %367 = arith.addf %365, %366 : vector<16x64xf32>
    %368 = arith.mulf %367, %357 : vector<16x64xf32>
    %cst_165 = arith.constant 0.254829586 : f32
    %369 = vector.broadcast %cst_165 : f32 to vector<16x64xf32>
    %370 = arith.addf %368, %369 : vector<16x64xf32>
    %371 = arith.mulf %370, %357 : vector<16x64xf32>
    %cst_166 = arith.constant 0.000000e+00 : f32
    %372 = vector.broadcast %cst_166 : f32 to vector<16x64xf32>
    %373 = arith.subf %372, %351 : vector<16x64xf32>
    %374 = arith.mulf %373, %351 : vector<16x64xf32>
    %375 = math.exp %374 : vector<16x64xf32>
    %376 = arith.mulf %371, %375 : vector<16x64xf32>
    %cst_167 = arith.constant 1.000000e+00 : f32
    %377 = vector.broadcast %cst_167 : f32 to vector<16x64xf32>
    %378 = arith.subf %377, %376 : vector<16x64xf32>
    %cst_168 = arith.constant 0.000000e+00 : f32
    %379 = vector.broadcast %cst_168 : f32 to vector<16x64xf32>
    %380 = arith.cmpf olt, %350, %379 : vector<16x64xf32>
    %cst_169 = arith.constant 0.000000e+00 : f32
    %381 = vector.broadcast %cst_169 : f32 to vector<16x64xf32>
    %382 = arith.subf %381, %378 : vector<16x64xf32>
    %383 = arith.select %380, %382, %378 : vector<16x64xi1>, vector<16x64xf32>
    %cst_170 = arith.constant 1.000000e+00 : f32
    %384 = vector.broadcast %cst_170 : f32 to vector<16x64xf32>
    %385 = arith.addf %384, %383 : vector<16x64xf32>
    %386 = arith.mulf %348, %385 : vector<16x64xf32>
    %387 = arith.truncf %386 : vector<16x64xf32> to vector<16x64xbf16>
    %c1_171 = arith.constant 1 : index
    %c0_172 = arith.constant 0 : index
    %c0_173 = arith.constant 0 : index
    %388 = vector.load %arg20[%c1_171, %c0_172, %c0_173] : memref<2x64x32xbf16, #tpu.memory_space<vmem>>, vector<1x64x32xbf16>
    %389 = vector.shape_cast %388 : vector<1x64x32xbf16> to vector<64x32xbf16>
    %cst_174 = arith.constant dense<0.000000e+00> : vector<16x32xf32>
    %390 = tpu.matmul %387, %389, %cst_174 {dimension_numbers = #tpu.dot_dimension_numbers<[1], [0], [0], [1], [0, 0, 1, 1], [], []>} : vector<16x64xbf16>, vector<64x32xbf16>, vector<16x32xf32> -> vector<16x32xf32>
    %c1_175 = arith.constant 1 : index
    %c0_176 = arith.constant 0 : index
    %c0_177 = arith.constant 0 : index
    %391 = vector.load %arg21[%c1_175, %c0_176, %c0_177] : memref<2x1x32xf32, #tpu.memory_space<vmem>>, vector<1x1x32xf32>
    %392 = vector.shape_cast %391 : vector<1x1x32xf32> to vector<1x32xf32>
    %393 = vector.broadcast %392 : vector<1x32xf32> to vector<16x32xf32>
    %394 = arith.addf %390, %393 : vector<16x32xf32>
    %395 = arith.addf %314, %394 : vector<16x32xf32>
    %c0_178 = arith.constant 0 : index
    %c0_179 = arith.constant 0 : index
    %396 = vector.load %arg22[%c0_178, %c0_179] : memref<1x32xf32, #tpu.memory_space<vmem>>, vector<1x32xf32>
    %c0_180 = arith.constant 0 : index
    %c0_181 = arith.constant 0 : index
    %397 = vector.load %arg23[%c0_180, %c0_181] : memref<1x32xf32, #tpu.memory_space<vmem>>, vector<1x32xf32>
    %cst_182 = arith.constant dense<0.000000e+00> : vector<16xf32>
    %398 = vector.multi_reduction <add>, %395, %cst_182 [1] : vector<16x32xf32> to vector<16xf32>
    %399 = vector.shape_cast %398 : vector<16xf32> to vector<16x1xf32>
    %cst_183 = arith.constant 3.200000e+01 : f32
    %400 = vector.broadcast %cst_183 : f32 to vector<16x1xf32>
    %401 = arith.divf %399, %400 : vector<16x1xf32>
    %402 = vector.broadcast %401 : vector<16x1xf32> to vector<16x32xf32>
    %403 = arith.subf %395, %402 : vector<16x32xf32>
    %404 = arith.mulf %403, %403 : vector<16x32xf32>
    %cst_184 = arith.constant dense<0.000000e+00> : vector<16xf32>
    %405 = vector.multi_reduction <add>, %404, %cst_184 [1] : vector<16x32xf32> to vector<16xf32>
    %406 = vector.shape_cast %405 : vector<16xf32> to vector<16x1xf32>
    %cst_185 = arith.constant 3.200000e+01 : f32
    %407 = vector.broadcast %cst_185 : f32 to vector<16x1xf32>
    %408 = arith.divf %406, %407 : vector<16x1xf32>
    %cst_186 = arith.constant 9.99999974E-6 : f32
    %409 = vector.broadcast %cst_186 : f32 to vector<16x1xf32>
    %410 = arith.addf %408, %409 : vector<16x1xf32>
    %411 = math.rsqrt %410 : vector<16x1xf32>
    %412 = vector.broadcast %411 : vector<16x1xf32> to vector<16x32xf32>
    %413 = arith.mulf %403, %412 : vector<16x32xf32>
    %414 = vector.broadcast %396 : vector<1x32xf32> to vector<16x32xf32>
    %415 = arith.mulf %413, %414 : vector<16x32xf32>
    %416 = vector.broadcast %397 : vector<1x32xf32> to vector<16x32xf32>
    %417 = arith.addf %415, %416 : vector<16x32xf32>
    %c0_187 = arith.constant 0 : index
    %c0_188 = arith.constant 0 : index
    %418 = vector.load %arg28[%c0_187, %c0_188] : memref<16x32xf32, #tpu.memory_space<vmem>>, vector<16x32xf32>
    tpu.vector_store %arg28[%c0_187, %c0_188], %417 {strides = array<i32>} : memref<16x32xf32, #tpu.memory_space<vmem>>, vector<16x32xf32>,
    %419 = arith.truncf %417 : vector<16x32xf32> to vector<16x32xbf16>
    %c0_189 = arith.constant 0 : index
    %c0_190 = arith.constant 0 : index
    %420 = vector.load %arg5[%c0_189, %c0_190] : memref<32x64xbf16, #tpu.memory_space<vmem>>, vector<32x64xbf16>
    %cst_191 = arith.constant dense<0.000000e+00> : vector<16x64xf32>
    %421 = tpu.matmul %419, %420, %cst_191 {dimension_numbers = #tpu.dot_dimension_numbers<[1], [0], [0], [1], [0, 0, 1, 1], [], []>} : vector<16x32xbf16>, vector<32x64xbf16>, vector<16x64xf32> -> vector<16x64xf32>
    %c0_192 = arith.constant 0 : index
    %c0_193 = arith.constant 0 : index
    %422 = vector.load %arg25[%c0_192, %c0_193] : memref<16x64xf32, #tpu.memory_space<vmem>>, vector<16x64xf32>
    tpu.vector_store %arg25[%c0_192, %c0_193], %421 {strides = array<i32>} : memref<16x64xf32, #tpu.memory_space<vmem>>, vector<16x64xf32>,
    %c0_194 = arith.constant 0 : index
    %c0_195 = arith.constant 0 : index
    %423 = vector.load %arg3[%c0_194, %c0_195] : memref<16x1xi32, #tpu.memory_space<vmem>>, vector<16x1xi32>
    %cst_196 = arith.constant dense<0xFF800000> : vector<16xf32>
    %424 = vector.multi_reduction <maximumf>, %421, %cst_196 [1] : vector<16x64xf32> to vector<16xf32>
    %425 = vector.shape_cast %424 : vector<16xf32> to vector<16x1xf32>
    %426 = vector.broadcast %425 : vector<16x1xf32> to vector<16x64xf32>
    %427 = arith.subf %421, %426 : vector<16x64xf32>
    %428 = math.exp %427 : vector<16x64xf32>
    %cst_197 = arith.constant dense<0.000000e+00> : vector<16xf32>
    %429 = vector.multi_reduction <add>, %428, %cst_197 [1] : vector<16x64xf32> to vector<16xf32>
    %430 = vector.shape_cast %429 : vector<16xf32> to vector<16x1xf32>
    %431 = math.log %430 : vector<16x1xf32>
    %432 = arith.addf %431, %425 : vector<16x1xf32>
    %433 = tpu.iota {dimensions = array<i32: 1>} : vector<16x64xi32>
    %434 = vector.broadcast %423 : vector<16x1xi32> to vector<16x64xi32>
    %435 = arith.cmpi eq, %433, %434 : vector<16x64xi32>
    %cst_198 = arith.constant 0.000000e+00 : f32
    %436 = vector.broadcast %cst_198 : f32 to vector<16x64xf32>
    %437 = arith.select %435, %421, %436 : vector<16x64xi1>, vector<16x64xf32>
    %cst_199 = arith.constant dense<0.000000e+00> : vector<16xf32>
    %438 = vector.multi_reduction <add>, %437, %cst_199 [1] : vector<16x64xf32> to vector<16xf32>
    %439 = vector.shape_cast %438 : vector<16xf32> to vector<16x1xf32>
    %c-100_i32 = arith.constant -100 : i32
    %440 = vector.broadcast %c-100_i32 : i32 to vector<16x1xi32>
    %441 = arith.cmpi ne, %423, %440 : vector<16x1xi32>
    %442 = arith.extui %441 : vector<16x1xi1> to vector<16x1xi32>
    %443 = arith.sitofp %442 : vector<16x1xi32> to vector<16x1xf32>
    %444 = arith.subf %432, %439 : vector<16x1xf32>
    %445 = arith.mulf %444, %443 : vector<16x1xf32>
    %cst_200 = arith.constant dense<0.000000e+00> : vector<1xf32>
    %446 = vector.multi_reduction <add>, %445, %cst_200 [0] : vector<16x1xf32> to vector<1xf32>
    %447 = vector.shape_cast %446 : vector<1xf32> to vector<1x1xf32>
    %cst_201 = arith.constant dense<0.000000e+00> : vector<1xf32>
    %448 = vector.multi_reduction <add>, %443, %cst_201 [0] : vector<16x1xf32> to vector<1xf32>
    %449 = vector.shape_cast %448 : vector<1xf32> to vector<1x1xf32>
    %cst_202 = arith.constant 1.000000e+00 : f32
    %450 = vector.broadcast %cst_202 : f32 to vector<1x1xf32>
    %451 = arith.maximumf %449, %450 : vector<1x1xf32>
    %452 = arith.divf %447, %451 : vector<1x1xf32>
    %c0_203 = arith.constant 0 : index
    %c0_204 = arith.constant 0 : index
    %453 = vector.load %arg24[%c0_203, %c0_204] : memref<1x1xf32, #tpu.memory_space<vmem>>, vector<1x1xf32>
    tpu.vector_store %arg24[%c0_203, %c0_204], %452 {strides = array<i32>} : memref<1x1xf32, #tpu.memory_space<vmem>>, vector<1x1xf32>,
    return
  }
}

</mosaic_0001>

<bundles_post_ra>
// kernel: biogpt_forward.1
= control target key start
LH: loop header
LB: loop body
LE: loop exit
PB: predicated region body
PF: predicated region fallthrough
CT: control target
= control target key end

     0   :  { %s3714_s0 = inlined_call_operand.vmem [shape: f32[16,32], index: 0, kind: input, shape index: {}]   ;;  %s3715_s1 = inlined_call_operand.vmem [shape: f32[16,16], index: 1, kind: input, shape index: {}]   ;;  %s3716_s2 = inlined_call_operand.vmem [shape: s32[16,1], index: 2, kind: input, shape index: {}]   ;;  %s3717_s3 = inlined_call_operand.vmem [shape: s32[16,1], index: 3, kind: input, shape index: {}]   ;;  %s3718_s4 = inlined_call_operand.vmem [shape: f32[10,32], index: 4, kind: input, shape index: {}]   ;;  %s3719_s5 = inlined_call_operand.vmem [shape: bf16[32,64], index: 5, kind: input, shape index: {}]   ;;  %s3720_s6 = inlined_call_operand.vmem [shape: f32[2,1,32], index: 6, kind: input, shape index: {}]   ;;  %s3721_s7 = inlined_call_operand.vmem [shape: f32[2,1,32], index: 7, kind: input, shape index: {}]   ;;  %s3722_s8 = inlined_call_operand.vmem [shape: bf16[2,32,32], index: 8, kind: input, shape index: {}]   ;;  %s3723_s9 = inlined_call_operand.vmem [shape: f32[2,1,32], index: 9, kind: input, shape index: {}]   ;;  %s3724_s10 = inlined_call_operand.vmem [shape: bf16[2,32,32], index: 10, kind: input, shape index: {}]   ;;  %s3725_s11 = inlined_call_operand.vmem [shape: f32[2,1,32], index: 11, kind: input, shape index: {}]   ;;  %s3726_s12 = inlined_call_operand.vmem [shape: bf16[2,32,32], index: 12, kind: input, shape index: {}]   ;;  %s3727_s13 = inlined_call_operand.vmem [shape: f32[2,1,32], index: 13, kind: input, shape index: {}]   ;;  %s3728_s14 = inlined_call_operand.vmem [shape: bf16[2,32,32], index: 14, kind: input, shape index: {}]   ;;  %s3729_s15 = inlined_call_operand.vmem [shape: f32[2,1,32], index: 15, kind: input, shape index: {}]   ;;  %s3730_s16 = inlined_call_operand.vmem [shape: f32[2,1,32], index: 16, kind: input, shape index: {}]   ;;  %s3731_s17 = inlined_call_operand.vmem [shape: f32[2,1,32], index: 17, kind: input, shape index: {}]   ;;  %s3732_s18 = inlined_call_operand.vmem [shape: bf16[2,32,64], index: 18, kind: input, shape index: {}]   ;;  %s3733_s19 = inlined_call_operand.vmem [shape: f32[2,1,64], index: 19, kind: input, shape index: {}]   ;;  %s3734_s20 = inlined_call_operand.vmem [shape: bf16[2,64,32], index: 20, kind: input, shape index: {}]   ;;  %s3735_s21 = inlined_call_operand.vmem [shape: f32[2,1,32], index: 21, kind: input, shape index: {}]   ;;  %s3736_s22 = inlined_call_operand.vmem [shape: f32[1,32], index: 22, kind: input, shape index: {}]   ;;  %s3737_s23 = inlined_call_operand.vmem [shape: f32[1,32], index: 23, kind: input, shape index: {}]   ;;  %s3738_s24 = inlined_call_operand.hbm [shape: f32[1,1], index: 24, kind: output, shape index: {0}]   ;;  %s3739_s25 = inlined_call_operand.hbm [shape: f32[16,64], index: 25, kind: output, shape index: {1}]   ;;  %s3740_s26 = inlined_call_operand.hbm [shape: f32[16,32], index: 26, kind: output, shape index: {2}]   ;;  %s3741_s27 = inlined_call_operand.hbm [shape: f32[16,32], index: 27, kind: output, shape index: {3}]   ;;  %s3742_s28 = inlined_call_operand.hbm [shape: f32[16,32], index: 28, kind: output, shape index: {4}]  }
   0x1   :  { %3766 = sst [smem:[#allocation13_spill]] %s3714_s0 }
   0x2   :  { %3767 = sst [smem:[#allocation14_spill]] %s3715_s1 }
   0x3   :  { %3768 = sst [smem:[#allocation15_spill]] %s3716_s2 }
   0x4   :  { %3769 = sst [smem:[#allocation16_spill]] %s3717_s3 }
   0x5   :  { %3770 = sst [smem:[#allocation17_spill]] %s3718_s4 }
   0x6   :  { %3771 = sst [smem:[#allocation18_spill]] %s3719_s5 }
   0x7   :  { %3772 = sst [smem:[#allocation19_spill]] %s3720_s6 }
   0x8   :  { %3773 = sst [smem:[#allocation20_spill]] %s3721_s7 }
   0x9   :  { %3774 = sst [smem:[#allocation21_spill]] %s3722_s8 }
   0xa   :  { %3775 = sst [smem:[#allocation22_spill]] %s3723_s9 }
   0xb   :  { %3776 = sst [smem:[#allocation23_spill]] %s3724_s10 }
   0xc   :  { %3777 = sst [smem:[#allocation24_spill]] %s3725_s11 }
   0xd   :  { %3778 = sst [smem:[#allocation25_spill]] %s3726_s12 }
   0xe   :  { %3779 = sst [smem:[#allocation26_spill]] %s3738_s24 }
   0xf   :  { %34 = vsyncpa [#allocation3], 0 }
  0x10   :  { %35 = vsyncpa [#allocation5], 0  ;;  %s3780_s9 = sld [smem:[#allocation15_spill]]  ;;  %vm111_vm0 = vcmask 1041408   ;;  %v2818_v2 = vmov 0  }
  0x11   :  { %s3781_s6 = sld [smem:[#allocation17_spill]]  ;;  %2524 = vset.pattern.permute.xlu0 %v2818_v2  ;;  %2555 = vset.pattern.permute.xlu1 %v2818_v2 }
  0x16   :  { %v86_v0 = vld [vmem:[%s3780_s9] sm:$0xff]  ;;  %v87_v3 = vld [vmem:[%s3780_s9 + $0x8] sm:$0xff] }
  0x17   :  { %v103_v1 = vld [vmem:[%s3781_s6 + $0x8] sm:$0x3]  ;;  %91 = vperm.xlu0 %2524, %v86_v0  }
  0x18   :  { %2287 = vmatpush.msk.msra.mxu0 %vm111_vm0, %v103_v1 }
  0x19   :  { %36 = vsyncpa [#allocation8], 0  ;;  %v102_v4 = vld [vmem:[%s3781_s6] sm:$0xff]  ;;  %v88_v5 = vlaneseq  ;;  %vm104_vm1 = vcmask 80896   ;;  %v2819_v8 = vmov 0.0   ;;  %s3782_s12 = sld [smem:[#allocation13_spill]] }
  0x1a   :  { %130 = vmatpush.msra.mxu0 %v102_v4  ;;  %vm142_vm4 = vcmask 261120   ;;  %v2820_v20 = vmov 32.0   ;;  %s3783_s9 = sld [smem:[#allocation21_spill]]  ;;  %s3756_s3 = smov 104   ;;  %vm372_vm12 = vcmask 64512   ;;  %vm471_vm13 = vcmask 130048  }
  0x1b   :  { %v2990_v6 = vand.u32 127, %v88_v5  ;;  %2578 = vrcp.f32 %v2820_v20  ;;  %s3784_s6 = sld [smem:[#allocation23_spill]]  ;;  %v2560_v20 = vld [vmem:[%s3727_s13] ss:$0 sm:$0xff]  ;;  %s3760_s10 = smov 112  }
  0x1c   :  { %s3785_s11 = sld [smem:[#allocation25_spill]]  ;;  %s3758_s29 = smov 120  }
  0x1d   :  { %s3786_s30 = sld [smem:[#allocation19_spill]]  ;;  %s3763_s2 = smov 8  }
  0x1e   :  { %s3787_s0 = sld [smem:[#allocation20_spill]]  ;;  %s3762_s8 = smov 24  }
  0x1f   :  { %94 = vperm.xlu0 %2524, %v87_v3   ;;  %v138_v12 = vld [vmem:[%s3782_s12] sm:$0xff]  ;;  %v139_v16 = vld [vmem:[%s3782_s12 + $0x8] sm:$0xff]  ;;  %s3788_s7 = sld [smem:[#allocation24_spill]]  ;;  %s3765_s12 = smov 16  }
  0x20   :  { %v2480_v37 = vld [vmem:[%s3783_s9 + $0x8] sm:$0xff]  ;;  %v2479_v41 = vld [vmem:[%s3783_s9] sm:$0xff]  ;;  %s3789_s4 = sld [smem:[#allocation22_spill]]  ;;  %s3801_s5 = smov 112  }
  0x21   :  { %v2579_v21 = vpop.eup %2578  ;;  %v2482_v38 = vld [vmem:[%s3784_s6 + $0x8] sm:$0xff]  ;;  %240 = vmatpush.bf16.msra.mxu1 %v2480_v37  ;;  %v2481_v42 = vld [vmem:[%s3784_s6] sm:$0xff]  ;;  %s3790_s1 = sld [smem:[#allocation14_spill]]  ;;  %s2828_s24 = smov 128  }
  0x22   :  { %v156_v22 = vmul.f32 32.0, %v2579_v21  ;;  %vm160_vm5 = vweird.f32 %v2579_v21  ;;  %v2484_v39 = vld [vmem:[%s3785_s11 + $0x8] sm:$0xff]  ;;  %274 = vmatpush.bf16.msra.mxu2 %v2482_v38  ;;  %v2483_v44 = vld [vmem:[%s3785_s11] sm:$0xff] }
  0x23   :  { %308 = vmatpush.bf16.msra.mxu3 %v2484_v39  ;;  %v2556_v62 = vld [vmem:[%s3786_s30] ss:$0 sm:$0xff] }
  0x24   :  { %v157_v23 = vsub.f32 1.0, %v156_v22  ;;  %v2557_v3 = vld [vmem:[%s3787_s0] ss:$0 sm:$0xff] }
  0x25   :  { %241 = vmatpush.bf16.msra.mxu1 %v2479_v41 }
  0x26   :  { %v158_v24 = vmul.f32 %v2579_v21, %v157_v23  ;;  %275 = vmatpush.bf16.msra.mxu2 %v2481_v42 }
  0x27   :  { %309 = vmatpush.bf16.msra.mxu3 %v2483_v44 }
  0x28   :  { %v159_v25 = vadd.f32 %v2579_v21, %v158_v24 }
  0x2a   :  { %v3014_v26 = vsel %vm160_vm5, %v2579_v21, %v159_v25 }
  0x89   :  { %v92_v7 = vpop.permute.xlu0 %91 }
  0x8a   :  { %vm96_vm2 = vcmp.eq.s32.totalorder %v2990_v6, %v92_v7 }
  0x8b   :  { %v2285_v9 = vsel %vm96_vm2, 1.0, %v2819_v8 }
  0x8c   :  { %2288 = vmatmul.msk.f32.vlgmr.msra.gmra.mxu0 %vm104_vm1, %v2285_v9 }
  0x91   :  { %v95_v10 = vpop.permute.xlu0 %94 }
  0x92   :  { %vm97_vm3 = vcmp.eq.s32.totalorder %v2990_v6, %v95_v10 }
  0x93   :  { %v2286_v11 = vsel %vm97_vm3, 1.0, %v2819_v8 }
  0x94   :  { %2289 = vmatmul.msk.f32.gmra.mxu0 %vm104_vm1, %v2286_v11  ;;  %v2559_v11 = vld [vmem:[%s3788_s7] ss:$0 sm:$0xff] }
 0x109   :  { %v132_v13 = vpop.f32.mrf.mxu0 }
 0x10a   :  { %v2999_v14 = vadd.f32 %v138_v12, %v132_v13  ;;  %v2558_v12 = vld [vmem:[%s3789_s4] ss:$0 sm:$0xff] }
 0x10c   :  { %143 = vst.msk [vmem:[#allocation6] sm:$0xff] %vm142_vm4, %v2999_v14  ;;  %v149_v15 = vsel %vm142_vm4, %v2999_v14, 0.0 }
 0x10d   :  { %150 = vadd.xlane.f32.xlu1 %v149_v15 }
 0x111   :  { %v135_v17 = vpop.f32.mrf.mxu0 }
 0x112   :  { %v3008_v18 = vadd.f32 %v139_v16, %v135_v17 }
 0x114   :  { %144 = vst.msk [vmem:[#allocation6 + $0x8] sm:$0xff] %vm142_vm4, %v3008_v18  ;;  %v152_v19 = vsel %vm142_vm4, %v3008_v18, 0.0 }
 0x115   :  { %153 = vadd.xlane.f32.xlu1 %v152_v19 }
 0x180   :  { %v151_v27 = vpop.xlane.xlu1 %150 }
 0x181   :  { %v162_v28 = vmul.f32 %v3014_v26, %v151_v27 }
 0x183   :  { %v164_v29 = vsub.f32 %v2999_v14, %v162_v28 }
 0x185   :  { %v166_v30 = vmul.f32 %v164_v29, %v164_v29 }
 0x187   :  { %v168_v31 = vsel %vm142_vm4, %v166_v30, 0.0 }
 0x188   :  { %169 = vadd.xlane.f32.xlu2 %v168_v31  ;;  %v154_v32 = vpop.xlane.xlu1 %153 }
 0x189   :  { %v163_v33 = vmul.f32 %v3014_v26, %v154_v32 }
 0x18b   :  { %v165_v34 = vsub.f32 %v3008_v18, %v163_v33 }
 0x18d   :  { %v167_v35 = vmul.f32 %v165_v34, %v165_v34 }
 0x18f   :  { %v171_v36 = vsel %vm142_vm4, %v167_v35, 0.0 }
 0x190   :  { %172 = vadd.xlane.f32.xlu2 %v171_v36 }
 0x1fb   :  { %v170_v40 = vpop.xlane.xlu2 %169 }
 0x1fc   :  { %v174_v43 = vmul.f32 %v170_v40, %v3014_v26 }
 0x1fe   :  { %v176_v45 = vadd.f32 1e-05, %v174_v43 }
 0x200   :  { %2580 = vrsqrt.f32 %v176_v45  ;;  %vm184_vm7 = vweird.f32 %v176_v45 }
 0x203   :  { %v173_v46 = vpop.xlane.xlu2 %172 }
 0x204   :  { %v175_v47 = vmul.f32 %v173_v46, %v3014_v26 }
 0x206   :  { %v2581_v48 = vpop.eup %2580  ;;  %v177_v49 = vadd.f32 1e-05, %v175_v47 }
 0x207   :  { %v179_v50 = vmul.f32 %v2581_v48, %v176_v45  ;;  %vm185_vm6 = vweird.f32 %v2581_v48 }
 0x208   :  { %2582 = vrsqrt.f32 %v177_v49  ;;  %vm186_vm8 = vmor %vm184_vm7, %vm185_vm6  ;;  %vm194_vm10 = vweird.f32 %v177_v49 }
 0x209   :  { %v180_v51 = vmul.f32 %v2581_v48, %v179_v50 }
 0x20b   :  { %v181_v52 = vmul.f32 0.5, %v180_v51 }
 0x20d   :  { %v182_v53 = vsub.f32 1.5, %v181_v52 }
 0x20e   :  { %v2583_v54 = vpop.eup %2582 }
 0x20f   :  { %v183_v55 = vmul.f32 %v2581_v48, %v182_v53  ;;  %v189_v56 = vmul.f32 %v2583_v54, %v177_v49  ;;  %vm195_vm9 = vweird.f32 %v2583_v54 }
 0x210   :  { %vm196_vm11 = vmor %vm194_vm10, %vm195_vm9 }
 0x211   :  { %v190_v57 = vmul.f32 %v2583_v54, %v189_v56  ;;  %v187_v58 = vsel %vm186_vm8, %v2581_v48, %v183_v55 }
 0x212   :  { %v198_v61 = vmul.f32 %v187_v58, %v164_v29 }
 0x213   :  { %v191_v59 = vmul.f32 0.5, %v190_v57 }
 0x214   :  { %v203_v2 = vmul.f32 %v2556_v62, %v198_v61 }
 0x215   :  { %v192_v60 = vsub.f32 1.5, %v191_v59 }
 0x216   :  { %v208_v5 = vadd.f32 %v2557_v3, %v203_v2 }
 0x217   :  { %v193_v63 = vmul.f32 %v2583_v54, %v192_v60 }
 0x219   :  { %v197_v0 = vsel %vm196_vm11, %v2583_v54, %v193_v63 }
 0x21a   :  { %v199_v1 = vmul.f32 %v197_v0, %v165_v34 }
 0x21c   :  { %v204_v4 = vmul.f32 %v2556_v62, %v199_v1 }
 0x21e   :  { %v209_v7 = vadd.f32 %v2557_v3, %v204_v4  ;;  %v145_v4 = vld [vmem:[%s3790_s1] sm:$0xff] }
 0x220   :  { %v210_v9 = vpack.c.bf16 %v209_v7, %v208_v5 }
 0x222   :  { %2298 = vmatmul.msk.bf16.vlgmr.msra.gmra.mxu1 %vm142_vm4, %v210_v9  ;;  %2307 = vmatmul.msk.bf16.vlgmr.msra.gmra.mxu2 %vm142_vm4, %v210_v9 }
 0x223   :  { %2316 = vmatmul.msk.bf16.vlgmr.msra.gmra.mxu3 %vm142_vm4, %v210_v9 }
 0x29f   :  { %v243_v10 = vpop.f32.mrf.mxu1 }
 0x2a0   :  { %v244_v17 = vadd.f32 %v2558_v12, %v243_v10 }
 0x2a2   :  { %v316_v22 = vmul.f32 0.35355338, %v244_v17 }
 0x2a4   :  { %v318_v30 = vpack.c.bf16 %v316_v22, %v316_v22 }
 0x2a5   :  { %v277_v13 = vpop.f32.mrf.mxu2 }
 0x2a6   :  { %v278_v15 = vadd.f32 %v2559_v11, %v277_v13  ;;  %v311_v16 = vpop.f32.mrf.mxu3  ;;  %v366_v44 = vunpack.c.l.b16 %v318_v30 }
 0x2a7   :  { %v245_v21 = vpop.f32.mrf.mxu1  ;;  %v312_v23 = vadd.f32 %v2560_v20, %v311_v16  ;;  %v146_v16 = vld [vmem:[%s3790_s1 + $0x8] sm:$0xff] }
 0x2a8   :  { %v334_v19 = vpack.c.bf16 %v278_v15, %v278_v15  ;;  %v246_v24 = vadd.f32 %v2558_v12, %v245_v21 }
 0x2a9   :  { %v3062_v31 = vpack.c.bf16 %v312_v23, %v312_v23 }
 0x2aa   :  { %346 = vrot.lane.b32.xlu2 %v334_v19, %s3756_s3  ;;  %342 = vrot.lane.b32.xlu0 %v334_v19, %s3760_s10  ;;  %v317_v32 = vmul.f32 0.35355338, %v246_v24  ;;  %v369_v35 = vunpack.c.l.b16 %v334_v19 }
 0x2ab   :  { %v677_v38 = vunpack.c.l.b16 %v3062_v31 }
 0x2ac   :  { %v319_v39 = vpack.c.bf16 %v317_v32, %v317_v32 }
 0x2ad   :  { %v279_v25 = vpop.f32.mrf.mxu2 }
 0x2ae   :  { %v280_v27 = vadd.f32 %v2559_v11, %v279_v25  ;;  %v313_v28 = vpop.f32.mrf.mxu3  ;;  %v367_v43 = vunpack.c.l.b16 %v319_v39 }
 0x2af   :  { %v314_v29 = vadd.f32 %v2560_v20, %v313_v28 }
 0x2b0   :  { %v335_v33 = vpack.c.bf16 %v280_v27, %v280_v27  ;;  %v368_v45 = vpack.c.b16 %v367_v43, %v366_v44 }
 0x2b1   :  { %v3064_v34 = vpack.c.bf16 %v314_v29, %v314_v29 }
 0x2b2   :  { %344 = vrot.lane.b32.xlu1 %v335_v33, %s3760_s10  ;;  %330 = vrot.lane.b32.xlu2 %v318_v30, %s3756_s3  ;;  %v370_v36 = vunpack.c.l.b16 %v335_v33 }
 0x2b3   :  { %v678_v37 = vunpack.c.l.b16 %v3064_v34  ;;  %326 = vrot.lane.b32.xlu0 %v318_v30, %s3760_s10 }
 0x2b4   :  { %v371_v40 = vpack.c.b16 %v370_v36, %v369_v35 }
 0x2b5   :  { %v679_v42 = vpack.c.b16 %v678_v37, %v677_v38 }
 0x2b6   :  { %v377_v41 = vsel %vm372_vm12, %v371_v40, 0 }
 0x2b7   :  { %386 = vmatpush.bf16.xpose.msrb.mxu0 %v377_v41 }
 0x2ba   :  { %332 = vrot.lane.b32.xlu1 %v319_v39, %s3756_s3  ;;  %340 = vrot.lane.b32.xlu2 %v335_v33, %s3758_s29 }
 0x2bb   :  { %348 = vrot.lane.b32.xlu0 %v335_v33, %s3756_s3 }
 0x2be   :  { %2317 = vmatmul.msk.bf16.vlgmr.msrb.gmra.mxu0 %vm372_vm12, %v368_v45 }
 0x2bf   :  { %691 = vmatpush.bf16.msra.mxu0 %v679_v42 }
 0x2c2   :  { %322 = vrot.lane.b32.xlu1 %v318_v30, %s3758_s29 }
 0x2c3   :  { %328 = vrot.lane.b32.xlu0 %v319_v39, %s3760_s10 }
 0x2cb   :  { %338 = vrot.lane.b32.xlu0 %v334_v19, %s3758_s29 }
 0x2d3   :  { %324 = vrot.lane.b32.xlu0 %v319_v39, %s3758_s29 }
 0x304   :  { %v347_v51 = vpop.permute.xlu2 %346 }
 0x305   :  { %v448_v55 = vunpack.c.l.b16 %v347_v51 }
 0x30c   :  { %v331_v58 = vpop.permute.xlu2 %330 }
 0x30d   :  { %v445_v63 = vunpack.c.l.b16 %v331_v58 }
 0x314   :  { %v341_v5 = vpop.permute.xlu2 %340 }
 0x315   :  { %v397_v11 = vunpack.c.l.b16 %v341_v5 }
 0x31c   :  { %v343_v46 = vpop.permute.xlu0 %342 }
 0x31d   :  { %v422_v48 = vunpack.c.l.b16 %v343_v46 }
 0x324   :  { %v345_v47 = vpop.permute.xlu1 %344 }
 0x325   :  { %v423_v49 = vunpack.c.l.b16 %v345_v47  ;;  %v327_v50 = vpop.permute.xlu0 %326 }
 0x326   :  { %v419_v0 = vunpack.c.l.b16 %v327_v50 }
 0x327   :  { %v424_v52 = vpack.c.b16 %v423_v49, %v422_v48 }
 0x329   :  { %v429_v53 = vsel %vm372_vm12, %v424_v52, 0 }
 0x32a   :  { %438 = vmatpush.bf16.xpose.msrb.mxu2 %v429_v53 }
 0x32c   :  { %v333_v59 = vpop.permute.xlu1 %332 }
 0x32d   :  { %v349_v54 = vpop.permute.xlu0 %348  ;;  %v446_v61 = vunpack.c.l.b16 %v333_v59 }
 0x32e   :  { %v449_v56 = vunpack.c.l.b16 %v349_v54 }
 0x32f   :  { %v447_v2 = vpack.c.b16 %v446_v61, %v445_v63 }
 0x330   :  { %v450_v57 = vpack.c.b16 %v449_v56, %v448_v55 }
 0x332   :  { %v455_v60 = vsel %vm372_vm12, %v450_v57, 0 }
 0x333   :  { %464 = vmatpush.bf16.xpose.msrb.mxu3 %v455_v60 }
 0x334   :  { %v323_v19 = vpop.permute.xlu1 %322 }
 0x335   :  { %v329_v62 = vpop.permute.xlu0 %328  ;;  %v393_v23 = vunpack.c.l.b16 %v323_v19 }
 0x336   :  { %v420_v1 = vunpack.c.l.b16 %v329_v62 }
 0x338   :  { %v421_v3 = vpack.c.b16 %v420_v1, %v419_v0 }
 0x33a   :  { %2319 = vmatmul.msk.bf16.vlgmr.msrb.gmra.mxu2 %vm372_vm12, %v421_v3  ;;  %2320 = vmatmul.msk.bf16.vlgmr.msrb.gmra.mxu3 %vm372_vm12, %v447_v2 }
 0x33b   :  { %v388_v7 = vpop.f32.mrf.mxu0 }
 0x33c   :  { %v3087_v9 = vadd.f32 %v388_v7, %v145_v4 }
 0x33d   :  { %v339_v10 = vpop.permute.xlu0 %338 }
 0x33e   :  { %v396_v12 = vunpack.c.l.b16 %v339_v10  ;;  %v472_v13 = vsel %vm471_vm13, %v3087_v9, -inf }
 0x33f   :  { %473 = vmax.xlane.f32.xlu0 %v472_v13 }
 0x340   :  { %v398_v15 = vpack.c.b16 %v397_v11, %v396_v12 }
 0x342   :  { %v403_v17 = vsel %vm372_vm12, %v398_v15, 0 }
 0x343   :  { %412 = vmatpush.bf16.xpose.msrb.mxu1 %v403_v17  ;;  %v390_v20 = vpop.f32.mrf.mxu0 }
 0x344   :  { %v3095_v21 = vadd.f32 %v390_v20, %v146_v16 }
 0x345   :  { %v325_v22 = vpop.permute.xlu0 %324 }
 0x346   :  { %v394_v24 = vunpack.c.l.b16 %v325_v22  ;;  %v475_v25 = vsel %vm471_vm13, %v3095_v21, -inf }
 0x347   :  { %476 = vmax.xlane.f32.xlu1 %v475_v25 }
 0x348   :  { %v395_v27 = vpack.c.b16 %v394_v24, %v393_v23 }
 0x34a   :  { %2318 = vmatmul.msk.bf16.vlgmr.msrb.gmra.mxu1 %vm372_vm12, %v395_v27 }
 0x3b2   :  { %v474_v48 = vpop.xlane.xlu0 %473 }
 0x3ba   :  { %v477_v53 = vpop.xlane.xlu1 %476 }
 0x3bd   :  { %v440_v28 = vpop.f32.mrf.mxu2  ;;  %v466_v29 = vpop.f32.mrf.mxu3 }
 0x3be   :  { %v441_v30 = vadd.f32 %v440_v28, %v145_v4  ;;  %v467_v32 = vadd.f32 %v466_v29, %v145_v4  ;;  %v496_v28 = vsub.f32 %v3087_v9, %v474_v48 }
 0x3c0   :  { %v484_v33 = vsel %vm471_vm13, %v441_v30, -inf  ;;  %v490_v35 = vsel %vm471_vm13, %v467_v32, -inf  ;;  %v504_v29 = vmul.f32 1.442695, %v496_v28 }
 0x3c1   :  { %485 = vmax.xlane.f32.xlu2 %v484_v33  ;;  %491 = vmax.xlane.f32.xlu0 %v490_v35 }
 0x3c5   :  { %v442_v39 = vpop.f32.mrf.mxu2  ;;  %v468_v45 = vpop.f32.mrf.mxu3 }
 0x3c6   :  { %v443_v40 = vadd.f32 %v442_v39, %v146_v16  ;;  %v469_v46 = vadd.f32 %v468_v45, %v146_v16 }
 0x3c7   :  { %v414_v36 = vpop.f32.mrf.mxu1 }
 0x3c8   :  { %v415_v37 = vadd.f32 %v414_v36, %v145_v4  ;;  %v487_v44 = vsel %vm471_vm13, %v443_v40, -inf  ;;  %v493_v47 = vsel %vm471_vm13, %v469_v46, -inf }
 0x3ca   :  { %v478_v38 = vsel %vm471_vm13, %v415_v37, -inf }
 0x3cb   :  { %479 = vmax.xlane.f32.xlu1 %v478_v38 }
 0x3cf   :  { %v416_v41 = vpop.f32.mrf.mxu1 }
 0x3d0   :  { %v417_v42 = vadd.f32 %v416_v41, %v146_v16 }
 0x3d2   :  { %v481_v43 = vsel %vm471_vm13, %v417_v42, -inf }
 0x3d3   :  { %482 = vmax.xlane.f32.xlu2 %v481_v43  ;;  %488 = vmax.xlane.f32.xlu1 %v487_v44 }
 0x3d5   :  { %360 = vrot.lane.b32.xlu0 %v3064_v34, %s3760_s10 }
 0x3db   :  { %494 = vmax.xlane.f32.xlu2 %v493_v47 }
 0x3ec   :  { %362 = vrot.lane.b32.xlu1 %v3062_v31, %s3756_s3 }
 0x3f3   :  { %358 = vrot.lane.b32.xlu2 %v3062_v31, %s3760_s10 }
 0x434   :  { %v486_v49 = vpop.xlane.xlu2 %485  ;;  %v492_v50 = vpop.xlane.xlu0 %491 }
 0x435   :  { %v500_v51 = vsub.f32 %v441_v30, %v486_v49  ;;  %v502_v52 = vsub.f32 %v467_v32, %v492_v50  ;;  %v497_v30 = vsub.f32 %v3095_v21, %v477_v53 }
 0x437   :  { %v512_v54 = vmul.f32 1.442695, %v500_v51  ;;  %v516_v55 = vmul.f32 1.442695, %v502_v52  ;;  %v506_v33 = vmul.f32 1.442695, %v497_v30 }
 0x439   :  { %2584 = vpow2.f32 %v512_v54 }
 0x43a   :  { %2586 = vpow2.f32 %v516_v55 }
 0x43e   :  { %v480_v56 = vpop.xlane.xlu1 %479 }
 0x43f   :  { %v3112_v57 = vpop.eup %2584  ;;  %v498_v58 = vsub.f32 %v415_v37, %v480_v56 }
 0x440   :  { %v3114_v59 = vpop.eup %2586  ;;  %v532_v60 = vsel %vm471_vm13, %v3112_v57, 0.0 }
 0x441   :  { %v508_v61 = vmul.f32 1.442695, %v498_v58  ;;  %533 = vadd.xlane.f32.xlu2 %v532_v60  ;;  %v538_v62 = vsel %vm471_vm13, %v3114_v59, 0.0 }
 0x442   :  { %539 = vadd.xlane.f32.xlu1 %v538_v62 }
 0x443   :  { %2588 = vpow2.f32 %v508_v61 }
 0x446   :  { %v483_v63 = vpop.xlane.xlu2 %482  ;;  %v489_v0 = vpop.xlane.xlu1 %488 }
 0x447   :  { %v499_v1 = vsub.f32 %v417_v42, %v483_v63  ;;  %v501_v2 = vsub.f32 %v443_v40, %v489_v0  ;;  %v361_v19 = vpop.permute.xlu0 %360 }
 0x448   :  { %v730_v22 = vunpack.c.l.b16 %v361_v19 }
 0x449   :  { %v3120_v3 = vpop.eup %2588  ;;  %v510_v4 = vmul.f32 1.442695, %v499_v1  ;;  %v514_v5 = vmul.f32 1.442695, %v501_v2 }
 0x44a   :  { %v526_v7 = vsel %vm471_vm13, %v3120_v3, 0.0 }
 0x44b   :  { %2590 = vpow2.f32 %v510_v4  ;;  %527 = vadd.xlane.f32.xlu0 %v526_v7 }
 0x44c   :  { %2592 = vpow2.f32 %v514_v5 }
 0x44e   :  { %v495_v10 = vpop.xlane.xlu2 %494 }
 0x44f   :  { %v503_v11 = vsub.f32 %v469_v46, %v495_v10 }
 0x451   :  { %v3124_v12 = vpop.eup %2590  ;;  %v518_v13 = vmul.f32 1.442695, %v503_v11 }
 0x452   :  { %v3126_v15 = vpop.eup %2592  ;;  %v529_v16 = vsel %vm471_vm13, %v3124_v12, 0.0 }
 0x453   :  { %2594 = vpow2.f32 %v518_v13  ;;  %v535_v17 = vsel %vm471_vm13, %v3126_v15, 0.0  ;;  %530 = vadd.xlane.f32.xlu1 %v529_v16 }
 0x454   :  { %536 = vadd.xlane.f32.xlu0 %v535_v17  ;;  %2596 = vpow2.f32 %v504_v29 }
 0x455   :  { %2598 = vpow2.f32 %v506_v33 }
 0x456   :  { %v359_v20 = vpop.permute.xlu2 %358 }
 0x457   :  { %v729_v23 = vunpack.c.l.b16 %v359_v20 }
 0x459   :  { %v3132_v24 = vpop.eup %2594  ;;  %v731_v25 = vpack.c.b16 %v730_v22, %v729_v23 }
 0x45a   :  { %v541_v27 = vsel %vm471_vm13, %v3132_v24, 0.0  ;;  %v3144_v32 = vpop.eup %2596 }
 0x45b   :  { %542 = vadd.xlane.f32.xlu2 %v541_v27  ;;  %743 = vmatpush.bf16.msra.mxu2 %v731_v25  ;;  %v520_v35 = vsel %vm471_vm13, %v3144_v32, 0.0  ;;  %v3148_v36 = vpop.eup %2598 }
 0x468   :  { %364 = vrot.lane.b32.xlu0 %v3064_v34, %s3756_s3  ;;  %s3802_s3 = smov 120  }
 0x46c   :  { %356 = vrot.lane.b32.xlu1 %v3064_v34, %s3758_s29  ;;  %v523_v34 = vsel %vm471_vm13, %v3148_v36, 0.0 }
 0x473   :  { %354 = vrot.lane.b32.xlu2 %v3062_v31, %s3758_s29  ;;  %v3152_v31 = vpop.permute.xlu1 %362  ;;  %s3818_s29 = sld [smem:[#allocation18_spill]] }
 0x474   :  { %v755_v58 = vunpack.c.l.b16 %v3152_v31 }
 0x492   :  { %521 = vadd.xlane.f32.xlu0 %v520_v35 }
 0x49c   :  { %524 = vadd.xlane.f32.xlu2 %v523_v34 }
 0x4b4   :  { %v534_v9 = vpop.xlane.xlu2 %533 }
 0x4b5   :  { %2600 = vrcp.f32 %v534_v9  ;;  %v3154_v37 = vpop.xlane.xlu1 %539  ;;  %v613_v50 = vand.u32 2147483647, %v534_v9  ;;  %v615_v51 = vand.u32 2147483648, %v534_v9  ;;  %vm609_vm15 = vweird.f32 %v534_v9 }
 0x4b6   :  { %2602 = vrcp.f32 %v3154_v37  ;;  %v645_v53 = vand.u32 2147483648, %v3154_v37  ;;  %vm639_vm0 = vweird.f32 %v3154_v37  ;;  %v643_v62 = vand.u32 2147483647, %v3154_v37 }
 0x4b7   :  { %vm3175_vm2 = vcmp.eq.f32.partialorder %v613_v50, 8.507059e+37  ;;  %v616_v61 = vor.u32 1.1754944e-38, %v615_v51 }
 0x4b8   :  { %v646_v2 = vor.u32 1.1754944e-38, %v645_v53 }
 0x4bb   :  { %v2601_v21 = vpop.eup %2600 }
 0x4bc   :  { %v605_v38 = vmul.f32 %v2601_v21, %v534_v9  ;;  %v3157_v40 = vpop.eup %2602  ;;  %vm610_vm14 = vweird.f32 %v2601_v21 }
 0x4bd   :  { %v635_v42 = vmul.f32 %v3157_v40, %v3154_v37  ;;  %vm3171_vm1 = vmor %vm609_vm15, %vm610_vm14  ;;  %vm640_vm3 = vweird.f32 %v3157_v40 }
 0x4be   :  { %v528_v39 = vpop.xlane.xlu0 %527  ;;  %v606_v41 = vsub.f32 1.0, %v605_v38  ;;  %vm3200_vm8 = vmor %vm639_vm0, %vm640_vm3 }
 0x4bf   :  { %2604 = vrcp.f32 %v528_v39  ;;  %v636_v48 = vsub.f32 1.0, %v635_v42  ;;  %v583_v63 = vand.u32 2147483647, %v528_v39  ;;  %vm579_vm5 = vweird.f32 %v528_v39 }
 0x4c0   :  { %v607_v44 = vmul.f32 %v2601_v21, %v606_v41  ;;  %v585_v7 = vand.u32 2147483648, %v528_v39 }
 0x4c1   :  { %v637_v54 = vmul.f32 %v3157_v40, %v636_v48  ;;  %vm3192_vm7 = vcmp.eq.f32.partialorder %v583_v63, 8.507059e+37 }
 0x4c2   :  { %v608_v52 = vadd.f32 %v2601_v21, %v607_v44  ;;  %v586_v30 = vor.u32 1.1754944e-38, %v585_v7 }
 0x4c3   :  { %v638_v11 = vadd.f32 %v3157_v40, %v637_v54 }
 0x4c4   :  { %v612_v1 = vsel %vm3171_vm1, %v2601_v21, %v608_v52 }
 0x4c5   :  { %v3161_v43 = vpop.eup %2604  ;;  %v617_v17 = vsel %vm3175_vm2, %v616_v61, %v612_v1  ;;  %v642_v34 = vsel %vm3200_vm8, %v3157_v40, %v638_v11 }
 0x4c6   :  { %v575_v45 = vmul.f32 %v3161_v43, %v528_v39  ;;  %v531_v46 = vpop.xlane.xlu1 %530  ;;  %vm580_vm6 = vweird.f32 %v3161_v43  ;;  %v618_v38 = vmul.f32 %v3112_v57, %v617_v17 }
 0x4c7   :  { %2606 = vrcp.f32 %v531_v46  ;;  %v3164_v47 = vpop.xlane.xlu0 %536  ;;  %v600_v20 = vand.u32 2147483648, %v531_v46  ;;  %v598_v27 = vand.u32 2147483647, %v531_v46  ;;  %vm3206_vm10 = vmor %vm579_vm5, %vm580_vm6  ;;  %vm594_vm14 = vweird.f32 %v531_v46 }
 0x4c8   :  { %v576_v49 = vsub.f32 1.0, %v575_v45  ;;  %2608 = vrcp.f32 %v3164_v47  ;;  %v630_v28 = vand.u32 2147483648, %v3164_v47  ;;  %v628_v35 = vand.u32 2147483647, %v3164_v47 }
 0x4c9   :  { %v601_v39 = vor.u32 1.1754944e-38, %v600_v20  ;;  %vm624_vm0 = vweird.f32 %v3164_v47  ;;  %vm599_vm1 = vcmp.eq.f32.partialorder %v598_v27, 8.507059e+37  ;;  %vm644_vm5 = vcmp.eq.f32.partialorder %v643_v62, 8.507059e+37 }
 0x4ca   :  { %v577_v55 = vmul.f32 %v3161_v43, %v576_v49  ;;  %v631_v44 = vor.u32 1.1754944e-38, %v630_v28  ;;  %vm629_vm3 = vcmp.eq.f32.partialorder %v628_v35, 8.507059e+37  ;;  %v668_v50 = vpack.c.bf16 %v618_v38, %v618_v38 }
 0x4cb   :  { %v647_v51 = vsel %vm644_vm5, %v646_v2, %v642_v34  ;;  %vm804_vm5 = vcmask 195584  }
 0x4cc   :  { %v578_v13 = vadd.f32 %v3161_v43, %v577_v55 }
 0x4cd   :  { %v2607_v56 = vpop.eup %2606 }
 0x4ce   :  { %v2609_v0 = vpop.eup %2608  ;;  %v590_v4 = vmul.f32 %v2607_v56, %v531_v46  ;;  %v3183_v5 = vpop.xlane.xlu2 %542  ;;  %vm595_vm9 = vweird.f32 %v2607_v56  ;;  %v582_v9 = vsel %vm3206_vm10, %v3161_v43, %v578_v13 }
 0x4cf   :  { %v620_v10 = vmul.f32 %v2609_v0, %v3164_v47  ;;  %2610 = vrcp.f32 %v3183_v5  ;;  %vm625_vm11 = vweird.f32 %v2609_v0  ;;  %vm596_vm15 = vmor %vm594_vm14, %vm595_vm9  ;;  %v587_v45 = vsel %vm3192_vm7, %v586_v30, %v582_v9 }
 0x4d0   :  { %v591_v16 = vsub.f32 1.0, %v590_v4  ;;  %vm626_vm2 = vmor %vm624_vm0, %vm625_vm11  ;;  %v660_v52 = vand.u32 2147483648, %v3183_v5  ;;  %v588_v53 = vmul.f32 %v3120_v3, %v587_v45  ;;  %v658_v55 = vand.u32 2147483647, %v3183_v5 }
 0x4d1   :  { %v621_v22 = vsub.f32 1.0, %v620_v10  ;;  %vm654_vm7 = vweird.f32 %v3183_v5 }
 0x4d2   :  { %v592_v25 = vmul.f32 %v2607_v56, %v591_v16  ;;  %v661_v3 = vor.u32 1.1754944e-38, %v660_v52  ;;  %v666_v4 = vpack.c.bf16 %v588_v53, %v588_v53  ;;  %vm659_vm9 = vcmp.eq.f32.partialorder %v658_v55, 8.507059e+37 }
 0x4d3   :  { %v622_v33 = vmul.f32 %v2609_v0, %v621_v22 }
 0x4d4   :  { %v593_v37 = vadd.f32 %v2607_v56, %v592_v25  ;;  %v700_v20 = vunpack.c.l.b16 %v666_v4 }
 0x4d5   :  { %v2611_v21 = vpop.eup %2610  ;;  %v623_v41 = vadd.f32 %v2609_v0, %v622_v33 }
 0x4d6   :  { %v597_v42 = vsel %vm596_vm15, %v2607_v56, %v593_v37  ;;  %v650_v40 = vmul.f32 %v2611_v21, %v3183_v5  ;;  %vm655_vm6 = vweird.f32 %v2611_v21 }
 0x4d7   :  { %v602_v43 = vsel %vm599_vm1, %v601_v39, %v597_v42  ;;  %v627_v48 = vsel %vm626_vm2, %v2609_v0, %v623_v41  ;;  %v726_v0 = vunpack.c.l.b16 %v668_v50  ;;  %vm656_vm8 = vmor %vm654_vm7, %vm655_vm6 }
 0x4d8   :  { %v603_v57 = vmul.f32 %v3124_v12, %v602_v43  ;;  %v632_v46 = vsel %vm629_vm3, %v631_v44, %v627_v48  ;;  %v651_v49 = vsub.f32 1.0, %v650_v40  ;;  %v648_v12 = vmul.f32 %v3114_v59, %v647_v51 }
 0x4d9   :  { %v633_v47 = vmul.f32 %v3126_v15, %v632_v46  ;;  %v355_v15 = vpop.permute.xlu2 %354 }
 0x4da   :  { %v652_v54 = vmul.f32 %v2611_v21, %v651_v49  ;;  %v365_v56 = vpop.permute.xlu0 %364  ;;  %v667_v62 = vpack.c.bf16 %v603_v57, %v603_v57  ;;  %v703_v31 = vunpack.c.l.b16 %v355_v15  ;;  %v670_v59 = vpack.c.bf16 %v648_v12, %v648_v12 }
 0x4db   :  { %v669_v60 = vpack.c.bf16 %v633_v47, %v633_v47  ;;  %v756_v61 = vunpack.c.l.b16 %v365_v56 }
 0x4dc   :  { %v653_v63 = vadd.f32 %v2611_v21, %v652_v54  ;;  %v701_v17 = vunpack.c.l.b16 %v667_v62  ;;  %v752_v23 = vunpack.c.l.b16 %v670_v59 }
 0x4dd   :  { %v727_v1 = vunpack.c.l.b16 %v669_v60  ;;  %v757_v2 = vpack.c.b16 %v756_v61, %v755_v58 }
 0x4de   :  { %v657_v7 = vsel %vm656_vm8, %v2611_v21, %v653_v63  ;;  %v357_v10 = vpop.permute.xlu1 %356  ;;  %v702_v27 = vpack.c.b16 %v701_v17, %v700_v20 }
 0x4df   :  { %v662_v11 = vsel %vm659_vm9, %v661_v3, %v657_v7  ;;  %v704_v13 = vunpack.c.l.b16 %v357_v10  ;;  %769 = vmatpush.bf16.msra.mxu3 %v757_v2  ;;  %v728_v16 = vpack.c.b16 %v727_v1, %v726_v0  ;;  %v2486_v0 = vld [vmem:[%s3728_s14 + $0x8] sm:$0xff]  ;;  %v2485_v1 = vld [vmem:[%s3728_s14] sm:$0xff] }
 0x4e0   :  { %v663_v19 = vmul.f32 %v3132_v24, %v662_v11  ;;  %837 = vmatpush.bf16.msrb.mxu0 %v2486_v0 }
 0x4e1   :  { %v705_v5 = vpack.c.b16 %v704_v13, %v703_v31  ;;  %2323 = vmatmul.msk.bf16.vlgmr.msra.gmra.mxu2 %vm471_vm13, %v728_v16 }
 0x4e2   :  { %v671_v22 = vpack.c.bf16 %v663_v19, %v663_v19 }
 0x4e3   :  { %717 = vmatpush.bf16.msra.mxu1 %v705_v5 }
 0x4e4   :  { %v753_v25 = vunpack.c.l.b16 %v671_v22  ;;  %838 = vmatpush.bf16.msrb.mxu0 %v2485_v1 }
 0x4e6   :  { %2322 = vmatmul.msk.bf16.vlgmr.msra.gmra.mxu1 %vm471_vm13, %v702_v27  ;;  %v754_v28 = vpack.c.b16 %v753_v25, %v752_v23 }
 0x4e8   :  { %2324 = vmatmul.msk.bf16.vlgmr.msra.gmra.mxu3 %vm471_vm13, %v754_v28  ;;  %v2561_v28 = vld [vmem:[%s3729_s15] ss:$0 sm:$0xff] }
 0x505   :  { %v522_v29 = vpop.xlane.xlu0 %521 }
 0x506   :  { %2612 = vrcp.f32 %v522_v29  ;;  %v555_v37 = vand.u32 2147483648, %v522_v29  ;;  %vm549_vm11 = vweird.f32 %v522_v29  ;;  %v553_v21 = vand.u32 2147483647, %v522_v29 }
 0x508   :  { %v556_v42 = vor.u32 1.1754944e-38, %v555_v37  ;;  %vm554_vm15 = vcmp.eq.f32.partialorder %v553_v21, 8.507059e+37 }
 0x50c   :  { %v2613_v30 = vpop.eup %2612 }
 0x50d   :  { %v545_v33 = vmul.f32 %v2613_v30, %v522_v29  ;;  %vm550_vm10 = vweird.f32 %v2613_v30 }
 0x50e   :  { %vm551_vm14 = vmor %vm549_vm11, %vm550_vm10 }
 0x50f   :  { %v546_v35 = vsub.f32 1.0, %v545_v33  ;;  %v525_v24 = vpop.xlane.xlu2 %524 }
 0x510   :  { %2614 = vrcp.f32 %v525_v24  ;;  %v570_v45 = vand.u32 2147483648, %v525_v24  ;;  %v568_v48 = vand.u32 2147483647, %v525_v24  ;;  %vm564_vm1 = vweird.f32 %v525_v24 }
 0x511   :  { %v547_v34 = vmul.f32 %v2613_v30, %v546_v35 }
 0x512   :  { %v571_v49 = vor.u32 1.1754944e-38, %v570_v45  ;;  %vm569_vm3 = vcmp.eq.f32.partialorder %v568_v48, 8.507059e+37 }
 0x513   :  { %v548_v9 = vadd.f32 %v2613_v30, %v547_v34 }
 0x515   :  { %v552_v39 = vsel %vm551_vm14, %v2613_v30, %v548_v9 }
 0x516   :  { %v2615_v38 = vpop.eup %2614  ;;  %v557_v40 = vsel %vm554_vm15, %v556_v42, %v552_v39 }
 0x517   :  { %v560_v41 = vmul.f32 %v2615_v38, %v525_v24  ;;  %vm565_vm0 = vweird.f32 %v2615_v38  ;;  %v558_v57 = vmul.f32 %v3144_v32, %v557_v40 }
 0x518   :  { %vm566_vm2 = vmor %vm564_vm1, %vm565_vm0 }
 0x519   :  { %v561_v44 = vsub.f32 1.0, %v560_v41  ;;  %v664_v47 = vpack.c.bf16 %v558_v57, %v558_v57  ;;  %v2488_v57 = vld [vmem:[%s3732_s18 + $0x8] sm:$0xff] }
 0x51a   :  { %933 = vmatpush.bf16.msrb.mxu1 %v2488_v57  ;;  %v2490_v57 = vld [vmem:[%s3734_s20 + $0x8] sm:$0xff] }
 0x51b   :  { %v562_v43 = vmul.f32 %v2615_v38, %v561_v44  ;;  %v674_v54 = vunpack.c.l.b16 %v664_v47 }
 0x51d   :  { %v563_v46 = vadd.f32 %v2615_v38, %v562_v43 }
 0x51f   :  { %v567_v50 = vsel %vm566_vm2, %v2615_v38, %v563_v46 }
 0x520   :  { %v572_v51 = vsel %vm569_vm3, %v571_v49, %v567_v50  ;;  %v2487_v49 = vld [vmem:[%s3732_s18] sm:$0xff] }
 0x521   :  { %v573_v52 = vmul.f32 %v3148_v36, %v572_v51  ;;  %934 = vmatpush.bf16.msrb.mxu1 %v2487_v49 }
 0x523   :  { %v665_v53 = vpack.c.bf16 %v573_v52, %v573_v52 }
 0x525   :  { %v675_v55 = vunpack.c.l.b16 %v665_v53 }
 0x527   :  { %v676_v56 = vpack.c.b16 %v675_v55, %v674_v54 }
 0x529   :  { %2321 = vmatmul.msk.bf16.vlgmr.msra.gmra.mxu0 %vm471_vm13, %v676_v56 }
 0x563   :  { %v719_v58 = vpop.f32.mrf.mxu1 }
 0x564   :  { %v745_v60 = vpop.f32.mrf.mxu2 }
 0x56b   :  { %v721_v61 = vpop.f32.mrf.mxu1  ;;  %v771_v12 = vpop.f32.mrf.mxu3 }
 0x56c   :  { %v2525_v32 = vpack.i.bf16 %v721_v61, %v719_v58  ;;  %v747_v62 = vpop.f32.mrf.mxu2 }
 0x56d   :  { %v2530_v63 = vpack.i.bf16 %v747_v62, %v745_v60 }
 0x56e   :  { %2526 = vrot.lane.b32.xlu1 %v2525_v32, %s3763_s2  ;;  %s2830_s2 = smov [#allocation6]  }
 0x573   :  { %v773_v36 = vpop.f32.mrf.mxu3 }
 0x574   :  { %v2535_v15 = vpack.i.bf16 %v773_v36, %v771_v12  ;;  %v2562_v36 = vld [vmem:[%s3730_s16] ss:$0 sm:$0xff] }
 0x576   :  { %2531 = vrot.lane.b32.xlu1 %v2530_v63, %s3765_s12 }
 0x57e   :  { %2536 = vrot.lane.b32.xlu1 %v2535_v15, %s3762_s8 }
 0x5a6   :  { %v693_v2 = vpop.f32.mrf.mxu0 }
 0x5ae   :  { %v695_v13 = vpop.f32.mrf.mxu0 }
 0x5e0   :  { %v2527_v3 = vpop.permute.xlu1 %2526 }
 0x5e1   :  { %v2529_v7 = vunpack.i.h.bf16 %v2527_v3  ;;  %v2528_v10 = vunpack.i.l.bf16 %v2527_v3  ;;  %v2563_v3 = vld [vmem:[%s3731_s17] ss:$0 sm:$0xff] }
 0x5e3   :  { %v800_v59 = vsel %vm372_vm12, %v693_v2, %v2528_v10  ;;  %v801_v17 = vsel %vm372_vm12, %v695_v13, %v2529_v7  ;;  %v2564_v13 = vld [vmem:[%s3733_s19] ss:$0 sm:$0xff] }
 0x5e8   :  { %v2532_v4 = vpop.permute.xlu1 %2531 }
 0x5e9   :  { %v2534_v11 = vunpack.i.h.bf16 %v2532_v4  ;;  %v2533_v31 = vunpack.i.l.bf16 %v2532_v4 }
 0x5eb   :  { %v802_v20 = vsel %vm471_vm13, %v800_v59, %v2533_v31  ;;  %v803_v22 = vsel %vm471_vm13, %v801_v17, %v2534_v11 }
 0x5f0   :  { %v2537_v16 = vpop.permute.xlu1 %2536 }
 0x5f1   :  { %v2539_v19 = vunpack.i.h.bf16 %v2537_v16  ;;  %v2538_v5 = vunpack.i.l.bf16 %v2537_v16 }
 0x5f3   :  { %v805_v23 = vsel %vm804_vm5, %v802_v20, %v2538_v5  ;;  %v806_v25 = vsel %vm804_vm5, %v803_v22, %v2539_v19 }
 0x5f4   :  { %v807_v27 = vpack.c.bf16 %v806_v25, %v805_v23 }
 0x5f6   :  { %2333 = vmatmul.msk.bf16.vlgmr.msrb.gmra.mxu0 %vm142_vm4, %v807_v27 }
 0x673   :  { %v840_v29 = vpop.f32.mrf.mxu0 }
 0x674   :  { %v841_v30 = vadd.f32 %v2561_v28, %v840_v29 }
 0x676   :  { %v3257_v33 = vadd.f32 %v841_v30, %v2999_v14 }
 0x678   :  { %v849_v35 = vsel %vm142_vm4, %v3257_v33, 0.0 }
 0x679   :  { %850 = vadd.xlane.f32.xlu1 %v849_v35 }
 0x67b   :  { %v842_v24 = vpop.f32.mrf.mxu0 }
 0x67c   :  { %v843_v34 = vadd.f32 %v2561_v28, %v842_v24 }
 0x67e   :  { %v3262_v9 = vadd.f32 %v843_v34, %v3008_v18 }
 0x680   :  { %v852_v37 = vsel %vm142_vm4, %v3262_v9, 0.0 }
 0x681   :  { %853 = vadd.xlane.f32.xlu0 %v852_v37  ;;  %v2492_v37 = vld [vmem:[%s3734_s20 + $0x18] sm:$0xff] }
 0x682   :  { %1066 = vmatpush.bf16.msrb.mxu2 %v2492_v37 }
 0x6ec   :  { %v851_v21 = vpop.xlane.xlu1 %850 }
 0x6ed   :  { %v855_v38 = vmul.f32 %v851_v21, %v3014_v26 }
 0x6ef   :  { %v857_v39 = vsub.f32 %v3257_v33, %v855_v38 }
 0x6f1   :  { %v859_v14 = vmul.f32 %v857_v39, %v857_v39 }
 0x6f3   :  { %v861_v41 = vsel %vm142_vm4, %v859_v14, 0.0 }
 0x6f4   :  { %v854_v42 = vpop.xlane.xlu0 %853  ;;  %862 = vadd.xlane.f32.xlu2 %v861_v41  ;;  %v2491_v41 = vld [vmem:[%s3734_s20 + $0x10] sm:$0xff] }
 0x6f5   :  { %v856_v44 = vmul.f32 %v854_v42, %v3014_v26  ;;  %1067 = vmatpush.bf16.msrb.mxu2 %v2491_v41 }
 0x6f7   :  { %v858_v40 = vsub.f32 %v3262_v9, %v856_v44 }
 0x6f9   :  { %v860_v18 = vmul.f32 %v858_v40, %v858_v40  ;;  %1068 = vmatpush.bf16.msrb.mxu2 %v2490_v57 }
 0x6fb   :  { %v864_v45 = vsel %vm142_vm4, %v860_v18, 0.0 }
 0x6fc   :  { %865 = vadd.xlane.f32.xlu0 %v864_v45 }
 0x767   :  { %v863_v43 = vpop.xlane.xlu2 %862 }
 0x768   :  { %v867_v48 = vmul.f32 %v863_v43, %v3014_v26 }
 0x76a   :  { %v869_v46 = vadd.f32 1e-05, %v867_v48 }
 0x76c   :  { %2616 = vrsqrt.f32 %v869_v46  ;;  %vm877_vm7 = vweird.f32 %v869_v46 }
 0x76f   :  { %v866_v50 = vpop.xlane.xlu0 %865 }
 0x770   :  { %v868_v51 = vmul.f32 %v866_v50, %v3014_v26 }
 0x772   :  { %v2617_v47 = vpop.eup %2616  ;;  %v870_v52 = vadd.f32 1e-05, %v868_v51 }
 0x773   :  { %v872_v53 = vmul.f32 %v2617_v47, %v869_v46  ;;  %vm878_vm6 = vweird.f32 %v2617_v47 }
 0x774   :  { %2618 = vrsqrt.f32 %v870_v52  ;;  %vm879_vm8 = vmor %vm877_vm7, %vm878_vm6  ;;  %vm887_vm10 = vweird.f32 %v870_v52 }
 0x775   :  { %v873_v54 = vmul.f32 %v2617_v47, %v872_v53 }
 0x777   :  { %v874_v55 = vmul.f32 0.5, %v873_v54  ;;  %v2489_v54 = vld [vmem:[%s3734_s20] sm:$0xff] }
 0x778   :  { %1069 = vmatpush.bf16.msrb.mxu2 %v2489_v54  ;;  %v2496_v54 = vld [vmem:[%s3784_s6 + $0x18] sm:$0xff] }
 0x779   :  { %v875_v56 = vsub.f32 1.5, %v874_v55  ;;  %1206 = vmatpush.bf16.msra.mxu0 %v2496_v54 }
 0x77a   :  { %v2619_v58 = vpop.eup %2618 }
 0x77b   :  { %v876_v60 = vmul.f32 %v2617_v47, %v875_v56  ;;  %v882_v61 = vmul.f32 %v2619_v58, %v870_v52  ;;  %vm888_vm9 = vweird.f32 %v2619_v58 }
 0x77c   :  { %vm889_vm11 = vmor %vm887_vm10, %vm888_vm9  ;;  %vm1058_vm10 = vcmask 523264  }
 0x77d   :  { %v883_v32 = vmul.f32 %v2619_v58, %v882_v61  ;;  %v880_v12 = vsel %vm879_vm8, %v2617_v47, %v876_v60 }
 0x77e   :  { %v891_v15 = vmul.f32 %v880_v12, %v857_v39 }
 0x77f   :  { %v884_v62 = vmul.f32 0.5, %v883_v32 }
 0x780   :  { %v896_v2 = vmul.f32 %v2562_v36, %v891_v15 }
 0x781   :  { %v885_v63 = vsub.f32 1.5, %v884_v62 }
 0x782   :  { %v901_v10 = vadd.f32 %v2563_v3, %v896_v2 }
 0x783   :  { %v886_v0 = vmul.f32 %v2619_v58, %v885_v63 }
 0x785   :  { %v890_v1 = vsel %vm889_vm11, %v2619_v58, %v886_v0 }
 0x786   :  { %v892_v4 = vmul.f32 %v890_v1, %v858_v40 }
 0x788   :  { %v897_v7 = vmul.f32 %v2562_v36, %v892_v4 }
 0x78a   :  { %v902_v11 = vadd.f32 %v2563_v3, %v897_v7 }
 0x78c   :  { %v903_v31 = vpack.c.bf16 %v902_v11, %v901_v10 }
 0x78e   :  { %2342 = vmatmul.msk.bf16.vlgmr.msrb.gmra.mxu1 %vm142_vm4, %v903_v31 }
 0x80b   :  { %v936_v16 = vpop.f32.mrf.mxu1 }
 0x80c   :  { %v3290_v59 = vadd.f32 %v2564_v13, %v936_v16 }
 0x80e   :  { %v3293_v17 = vmul.f32 0.70710677, %v3290_v59  ;;  %v941_v37 = vmul.f32 0.5, %v3290_v59 }
 0x810   :  { %v945_v19 = vand.u32 2147483647, %v3293_v17  ;;  %vm1011_vm8 = vcmp.lt.f32.partialorder %v3293_v17, 0.0  ;;  %v2565_v17 = vld [vmem:[%s3735_s21] ss:$0 sm:$0xff] }
 0x812   :  { %v947_v5 = vmul.f32 0.3275911, %v945_v19  ;;  %v999_v18 = vsub.f32 0.0, %v945_v19 }
 0x813   :  { %v938_v20 = vpop.f32.mrf.mxu1 }
 0x814   :  { %v949_v22 = vadd.f32 1.0, %v947_v5  ;;  %v3296_v23 = vadd.f32 %v2564_v13, %v938_v20  ;;  %v1001_v50 = vmul.f32 %v999_v18, %v945_v19 }
 0x816   :  { %2620 = vrcp.f32 %v949_v22  ;;  %v3299_v25 = vmul.f32 0.70710677, %v3296_v23  ;;  %v962_v34 = vand.u32 2147483648, %v949_v22  ;;  %v960_v38 = vand.u32 2147483647, %v949_v22 }
 0x817   :  { %vm956_vm15 = vweird.f32 %v949_v22  ;;  %v1003_v58 = vmul.f32 1.442695, %v1001_v50 }
 0x818   :  { %v946_v27 = vand.u32 2147483647, %v3299_v25  ;;  %v963_v14 = vor.u32 1.1754944e-38, %v962_v34  ;;  %vm961_vm1 = vcmp.eq.f32.partialorder %v960_v38, 8.507059e+37  ;;  %vm1012_vm9 = vcmp.lt.f32.partialorder %v3299_v25, 0.0 }
 0x81a   :  { %v948_v28 = vmul.f32 0.3275911, %v946_v27  ;;  %v1000_v12 = vsub.f32 0.0, %v946_v27 }
 0x81c   :  { %v2621_v29 = vpop.eup %2620  ;;  %v950_v35 = vadd.f32 1.0, %v948_v28  ;;  %v1002_v0 = vmul.f32 %v1000_v12, %v946_v27 }
 0x81d   :  { %v952_v30 = vmul.f32 %v2621_v29, %v949_v22  ;;  %vm957_vm14 = vweird.f32 %v2621_v29 }
 0x81e   :  { %2622 = vrcp.f32 %v950_v35  ;;  %vm958_vm0 = vmor %vm956_vm15, %vm957_vm14  ;;  %v977_v49 = vand.u32 2147483648, %v950_v35  ;;  %v975_v47 = vand.u32 2147483647, %v950_v35  ;;  %vm971_vm3 = vweird.f32 %v950_v35 }
 0x81f   :  { %v953_v24 = vsub.f32 1.0, %v952_v30  ;;  %2624 = vpow2.f32 %v1003_v58  ;;  %v1005_v7 = vmul.f32 1.442695, %v1002_v0 }
 0x820   :  { %v978_v56 = vor.u32 1.1754944e-38, %v977_v49  ;;  %vm976_vm7 = vcmp.eq.f32.partialorder %v975_v47, 8.507059e+37 }
 0x821   :  { %v954_v21 = vmul.f32 %v2621_v29, %v953_v24  ;;  %2626 = vpow2.f32 %v1005_v7 }
 0x823   :  { %v955_v39 = vadd.f32 %v2621_v29, %v954_v21  ;;  %v942_v21 = vmul.f32 0.5, %v3296_v23 }
 0x824   :  { %v2623_v42 = vpop.eup %2622 }
 0x825   :  { %v959_v44 = vsel %vm958_vm0, %v2621_v29, %v955_v39  ;;  %v967_v45 = vmul.f32 %v2623_v42, %v950_v35  ;;  %vm972_vm2 = vweird.f32 %v2623_v42  ;;  %v2625_v10 = vpop.eup %2624 }
 0x826   :  { %v964_v40 = vsel %vm961_vm1, %v963_v14, %v959_v44  ;;  %vm973_vm6 = vmor %vm971_vm3, %vm972_vm2 }
 0x827   :  { %v981_v43 = vmul.f32 1.0614054, %v964_v40  ;;  %v968_v48 = vsub.f32 1.0, %v967_v45  ;;  %v2627_v28 = vpop.eup %2626 }
 0x829   :  { %v983_v46 = vadd.f32 -1.4531521, %v981_v43  ;;  %v969_v51 = vmul.f32 %v2623_v42, %v968_v48 }
 0x82b   :  { %v985_v52 = vmul.f32 %v983_v46, %v964_v40  ;;  %v970_v53 = vadd.f32 %v2623_v42, %v969_v51 }
 0x82d   :  { %v987_v55 = vadd.f32 1.4214138, %v985_v52  ;;  %v974_v60 = vsel %vm973_vm6, %v2623_v42, %v970_v53  ;;  %v2494_v53 = vld [vmem:[%s3783_s9 + $0x18] sm:$0xff] }
 0x82e   :  { %v979_v32 = vsel %vm976_vm7, %v978_v56, %v974_v60  ;;  %1170 = vmatpush.bf16.msrb.mxu3 %v2494_v53  ;;  %v2493_v60 = vld [vmem:[%s3783_s9 + $0x10] sm:$0xff]  ;;  %s3815_s9 = smov 8  }
 0x82f   :  { %v989_v61 = vmul.f32 %v987_v55, %v964_v40  ;;  %v982_v62 = vmul.f32 1.0614054, %v979_v32  ;;  %v2498_v55 = vld [vmem:[%s3785_s11 + $0x18] sm:$0xff] }
 0x830   :  { %1242 = vmatpush.bf16.msra.mxu1 %v2498_v55 }
 0x831   :  { %v991_v63 = vadd.f32 -0.28449672, %v989_v61  ;;  %v984_v36 = vadd.f32 -1.4531521, %v982_v62  ;;  %v2495_v61 = vld [vmem:[%s3784_s6 + $0x10] sm:$0xff]  ;;  %s3816_s6 = smov 24  }
 0x832   :  { %1171 = vmatpush.bf16.msrb.mxu3 %v2493_v60  ;;  %1207 = vmatpush.bf16.msra.mxu0 %v2495_v61 }
 0x833   :  { %v993_v15 = vmul.f32 %v991_v63, %v964_v40  ;;  %v986_v1 = vmul.f32 %v984_v36, %v979_v32 }
 0x835   :  { %v995_v3 = vadd.f32 0.2548296, %v993_v15  ;;  %v988_v2 = vadd.f32 1.4214138, %v986_v1 }
 0x837   :  { %v997_v4 = vmul.f32 %v995_v3, %v964_v40  ;;  %v990_v11 = vmul.f32 %v988_v2, %v979_v32 }
 0x839   :  { %v1007_v31 = vmul.f32 %v2625_v10, %v997_v4  ;;  %v992_v13 = vadd.f32 -0.28449672, %v990_v11 }
 0x83b   :  { %v1009_v16 = vsub.f32 1.0, %v1007_v31  ;;  %v994_v19 = vmul.f32 %v992_v13, %v979_v32 }
 0x83d   :  { %v996_v5 = vadd.f32 0.2548296, %v994_v19  ;;  %v1013_v20 = vsub.f32 0.0, %v1009_v16 }
 0x83f   :  { %v998_v22 = vmul.f32 %v996_v5, %v979_v32  ;;  %v1015_v27 = vsel %vm1011_vm8, %v1013_v20, %v1009_v16  ;;  %v2497_v32 = vld [vmem:[%s3785_s11 + $0x10] sm:$0xff]  ;;  %v2566_v16 = vld [vmem:[%s3786_s30 + $0x1] ss:$0 sm:$0xff]  ;;  %s2242_s11 = sshll.u32 %s3741_s27, 4  ;;  %s2829_s30 = smov [#allocation7]   ;;  %s2243_s11 = int_to_ptr.hbm [resolvable:$true] %s2242_s11 }
 0x840   :  { %v1017_v24 = vadd.f32 1.0, %v1015_v27  ;;  %1243 = vmatpush.bf16.msra.mxu1 %v2497_v32  ;;  %s2255_s27 = sshll.u32 %s3742_s28, 4  ;;  %s2256_s27 = int_to_ptr.hbm [resolvable:$true] %s2255_s27 }
 0x841   :  { %v1008_v29 = vmul.f32 %v2627_v28, %v998_v22  ;;  %v2567_v22 = vld [vmem:[%s3787_s0 + $0x1] ss:$0 sm:$0xff] }
 0x842   :  { %v1019_v39 = vmul.f32 %v1017_v24, %v941_v37 }
 0x843   :  { %v1010_v30 = vsub.f32 1.0, %v1008_v29 }
 0x845   :  { %v1014_v35 = vsub.f32 0.0, %v1010_v30 }
 0x847   :  { %v1016_v34 = vsel %vm1012_vm9, %v1014_v35, %v1010_v30 }
 0x848   :  { %v1018_v38 = vadd.f32 1.0, %v1016_v34  ;;  %v2568_v34 = vld [vmem:[%s3788_s7 + $0x1] ss:$0 sm:$0xff] }
 0x84a   :  { %v1020_v14 = vmul.f32 %v1018_v38, %v942_v21 }
 0x84c   :  { %v1021_v41 = vpack.c.bf16 %v1020_v14, %v1019_v39  ;;  %v2569_v14 = vld [vmem:[%s3727_s13 + $0x1] ss:$0 sm:$0xff]  ;;  %s3803_s13 = smov 104  }
 0x84e   :  { %2359 = vmatmul.msk.bf16.vlgmr.msrb.gmra.mxu2 %vm1058_vm10, %v1021_v41  ;;  %v2570_v41 = vld [vmem:[%s3789_s4 + $0x1] ss:$0 sm:$0xff] }
 0x8d1   :  { %v1071_v42 = vpop.f32.mrf.mxu2 }
 0x8d2   :  { %v1072_v44 = vadd.f32 %v2565_v17, %v1071_v42 }
 0x8d4   :  { %v3323_v25 = vadd.f32 %v1072_v44, %v3257_v33 }
 0x8d6   :  { %1078 = vst.msk [vmem:[#allocation7] sm:$0xff] %vm142_vm4, %v3323_v25  ;;  %v1084_v59 = vsel %vm142_vm4, %v3323_v25, 0.0 }
 0x8d7   :  { %1085 = vadd.xlane.f32.xlu2 %v1084_v59 }
 0x8d9   :  { %v1073_v23 = vpop.f32.mrf.mxu2 }
 0x8da   :  { %v1074_v40 = vadd.f32 %v2565_v17, %v1073_v23 }
 0x8dc   :  { %v3330_v18 = vadd.f32 %v1074_v40, %v3262_v9 }
 0x8de   :  { %1079 = vst.msk [vmem:[#allocation7 + $0x8] sm:$0xff] %vm142_vm4, %v3330_v18  ;;  %v1087_v45 = vsel %vm142_vm4, %v3330_v18, 0.0 }
 0x8df   :  { %1088 = vadd.xlane.f32.xlu0 %v1087_v45 }
 0x94a   :  { %v1086_v33 = vpop.xlane.xlu2 %1085 }
 0x94b   :  { %v1090_v43 = vmul.f32 %v1086_v33, %v3014_v26 }
 0x94d   :  { %v1092_v48 = vsub.f32 %v3323_v25, %v1090_v43 }
 0x94f   :  { %v1094_v57 = vmul.f32 %v1092_v48, %v1092_v48 }
 0x951   :  { %v1096_v46 = vsel %vm142_vm4, %v1094_v57, 0.0 }
 0x952   :  { %v1089_v49 = vpop.xlane.xlu0 %1088  ;;  %1097 = vadd.xlane.f32.xlu2 %v1096_v46 }
 0x953   :  { %v1091_v9 = vmul.f32 %v1089_v49, %v3014_v26 }
 0x955   :  { %v1093_v50 = vsub.f32 %v3330_v18, %v1091_v9 }
 0x957   :  { %v1095_v51 = vmul.f32 %v1093_v50, %v1093_v50 }
 0x959   :  { %v1099_v47 = vsel %vm142_vm4, %v1095_v51, 0.0 }
 0x95a   :  { %1100 = vadd.xlane.f32.xlu0 %v1099_v47 }
 0x9c5   :  { %v1098_v52 = vpop.xlane.xlu2 %1097 }
 0x9c6   :  { %v1102_v56 = vmul.f32 %v1098_v52, %v3014_v26 }
 0x9c8   :  { %v1104_v58 = vadd.f32 1e-05, %v1102_v56 }
 0x9ca   :  { %2628 = vrsqrt.f32 %v1104_v58  ;;  %vm1112_vm14 = vweird.f32 %v1104_v58 }
 0x9cd   :  { %v1101_v12 = vpop.xlane.xlu0 %1100 }
 0x9ce   :  { %v1103_v62 = vmul.f32 %v1101_v12, %v3014_v26 }
 0x9d0   :  { %v2629_v63 = vpop.eup %2628  ;;  %v1105_v36 = vadd.f32 1e-05, %v1103_v62 }
 0x9d1   :  { %v1107_v15 = vmul.f32 %v2629_v63, %v1104_v58  ;;  %vm1113_vm11 = vweird.f32 %v2629_v63 }
 0x9d2   :  { %2630 = vrsqrt.f32 %v1105_v36  ;;  %vm1114_vm15 = vmor %vm1112_vm14, %vm1113_vm11  ;;  %vm1122_vm1 = vweird.f32 %v1105_v36 }
 0x9d3   :  { %v1108_v0 = vmul.f32 %v2629_v63, %v1107_v15 }
 0x9d5   :  { %v1109_v1 = vmul.f32 0.5, %v1108_v0 }
 0x9d7   :  { %v1110_v3 = vsub.f32 1.5, %v1109_v1 }
 0x9d8   :  { %v2631_v2 = vpop.eup %2630 }
 0x9d9   :  { %v1111_v4 = vmul.f32 %v2629_v63, %v1110_v3  ;;  %v1117_v7 = vmul.f32 %v2631_v2, %v1105_v36  ;;  %vm1123_vm0 = vweird.f32 %v2631_v2 }
 0x9da   :  { %vm1124_vm2 = vmor %vm1122_vm1, %vm1123_vm0 }
 0x9db   :  { %v1118_v10 = vmul.f32 %v2631_v2, %v1117_v7  ;;  %v1115_v11 = vsel %vm1114_vm15, %v2629_v63, %v1111_v4 }
 0x9dc   :  { %v1126_v19 = vmul.f32 %v1115_v11, %v1092_v48 }
 0x9dd   :  { %v1119_v31 = vmul.f32 0.5, %v1118_v10 }
 0x9de   :  { %v1131_v28 = vmul.f32 %v2566_v16, %v1126_v19 }
 0x9df   :  { %v1120_v13 = vsub.f32 1.5, %v1119_v31 }
 0x9e0   :  { %v1136_v30 = vadd.f32 %v2567_v22, %v1131_v28 }
 0x9e1   :  { %v1121_v5 = vmul.f32 %v2631_v2, %v1120_v13 }
 0x9e3   :  { %v1125_v20 = vsel %vm1124_vm2, %v2631_v2, %v1121_v5 }
 0x9e4   :  { %v1127_v29 = vmul.f32 %v1125_v20, %v1093_v50 }
 0x9e6   :  { %v1132_v27 = vmul.f32 %v2566_v16, %v1127_v29 }
 0x9e8   :  { %v1137_v35 = vadd.f32 %v2567_v22, %v1132_v27 }
 0x9ea   :  { %v1138_v24 = vpack.c.bf16 %v1137_v35, %v1136_v30 }
 0x9ec   :  { %2375 = vmatmul.msk.bf16.vlgmr.msrb.gmra.mxu3 %vm142_vm4, %v1138_v24  ;;  %2389 = vmatmul.msk.bf16.vlgmr.msra.gmra.mxu0 %vm142_vm4, %v1138_v24 }
 0x9ed   :  { %2403 = vmatmul.msk.bf16.vlgmr.msra.gmra.mxu1 %vm142_vm4, %v1138_v24 }
 0xa69   :  { %v1209_v37 = vpop.f32.mrf.mxu0 }
 0xa6a   :  { %v1210_v21 = vadd.f32 %v2568_v34, %v1209_v37  ;;  %v1245_v38 = vpop.f32.mrf.mxu1 }
 0xa6b   :  { %v1246_v42 = vadd.f32 %v2569_v14, %v1245_v38 }
 0xa6c   :  { %v1268_v39 = vpack.c.bf16 %v1210_v21, %v1210_v21 }
 0xa6d   :  { %v3382_v43 = vpack.c.bf16 %v1246_v42, %v1246_v42  ;;  %v2690_v42 = vld [vmem:[%s3790_s1] sm:$0xff] }
 0xa6e   :  { %1276 = vrot.lane.b32.xlu0 %v1268_v39, %s3801_s5  ;;  %1272 = vrot.lane.b32.xlu2 %v1268_v39, %s3802_s3  ;;  %v1303_v49 = vunpack.c.l.b16 %v1268_v39 }
 0xa6f   :  { %v1173_v17 = vpop.f32.mrf.mxu3  ;;  %v1609_v47 = vunpack.c.l.b16 %v3382_v43 }
 0xa70   :  { %v1174_v44 = vadd.f32 %v2570_v41, %v1173_v17 }
 0xa71   :  { %v1211_v59 = vpop.f32.mrf.mxu0 }
 0xa72   :  { %v1250_v23 = vmul.f32 0.35355338, %v1174_v44  ;;  %v1212_v40 = vadd.f32 %v2568_v34, %v1211_v59  ;;  %v1247_v45 = vpop.f32.mrf.mxu1 }
 0xa73   :  { %v1248_v33 = vadd.f32 %v2569_v14, %v1247_v45 }
 0xa74   :  { %v1252_v48 = vpack.c.bf16 %v1250_v23, %v1250_v23  ;;  %v1269_v57 = vpack.c.bf16 %v1212_v40, %v1212_v40  ;;  %v2691_v40 = vld [vmem:[%s3790_s1 + $0x8] sm:$0xff]  ;;  %s3814_s1 = smov 16  }
 0xa75   :  { %v3384_v46 = vpack.c.bf16 %v1248_v33, %v1248_v33 }
 0xa76   :  { %1274 = vrot.lane.b32.xlu1 %v1269_v57, %s3802_s3  ;;  %1256 = vrot.lane.b32.xlu0 %v1252_v48, %s3802_s3  ;;  %v1304_v9 = vunpack.c.l.b16 %v1269_v57  ;;  %v1300_v60 = vunpack.c.l.b16 %v1252_v48 }
 0xa77   :  { %v1610_v50 = vunpack.c.l.b16 %v3384_v46  ;;  %v1175_v51 = vpop.f32.mrf.mxu3 }
 0xa78   :  { %v1176_v52 = vadd.f32 %v2570_v41, %v1175_v51  ;;  %v1305_v53 = vpack.c.b16 %v1304_v9, %v1303_v49 }
 0xa79   :  { %v1611_v56 = vpack.c.b16 %v1610_v50, %v1609_v47 }
 0xa7a   :  { %v1251_v54 = vmul.f32 0.35355338, %v1176_v52  ;;  %v1310_v55 = vsel %vm372_vm12, %v1305_v53, 0 }
 0xa7b   :  { %1319 = vmatpush.bf16.xpose.msra.mxu2 %v1310_v55 }
 0xa7c   :  { %v1253_v58 = vpack.c.bf16 %v1251_v54, %v1251_v54 }
 0xa7e   :  { %v1301_v61 = vunpack.c.l.b16 %v1253_v58  ;;  %1278 = vrot.lane.b32.xlu1 %v1269_v57, %s3801_s5  ;;  %1258 = vrot.lane.b32.xlu2 %v1253_v58, %s3802_s3 }
 0xa7f   :  { %1282 = vrot.lane.b32.xlu0 %v1269_v57, %s3803_s13 }
 0xa80   :  { %v1302_v32 = vpack.c.b16 %v1301_v61, %v1300_v60 }
 0xa82   :  { %2404 = vmatmul.msk.bf16.vlgmr.msra.gmra.mxu2 %vm372_vm12, %v1302_v32 }
 0xa83   :  { %1623 = vmatpush.bf16.msrb.mxu2 %v1611_v56 }
 0xa86   :  { %1280 = vrot.lane.b32.xlu2 %v1268_v39, %s3803_s13  ;;  %1260 = vrot.lane.b32.xlu1 %v1252_v48, %s3801_s5 }
 0xa87   :  { %1264 = vrot.lane.b32.xlu0 %v1252_v48, %s3803_s13 }
 0xa8e   :  { %1262 = vrot.lane.b32.xlu2 %v1253_v58, %s3801_s5  ;;  %1266 = vrot.lane.b32.xlu1 %v1253_v58, %s3803_s13 }
 0xa96   :  { %1288 = vrot.lane.b32.xlu1 %v3382_v43, %s3802_s3 }
 0xac8   :  { %v1273_v12 = vpop.permute.xlu2 %1272 }
 0xac9   :  { %v1329_v15 = vunpack.c.l.b16 %v1273_v12 }
 0xad8   :  { %v1259_v63 = vpop.permute.xlu2 %1258 }
 0xad9   :  { %v1327_v11 = vunpack.c.l.b16 %v1259_v63 }
 0xae0   :  { %v1277_v62 = vpop.permute.xlu0 %1276  ;;  %v1281_v2 = vpop.permute.xlu2 %1280 }
 0xae1   :  { %v1355_v31 = vunpack.c.l.b16 %v1277_v62  ;;  %v1381_v19 = vunpack.c.l.b16 %v1281_v2 }
 0xae8   :  { %v1275_v36 = vpop.permute.xlu1 %1274  ;;  %v1257_v1 = vpop.permute.xlu0 %1256 }
 0xae9   :  { %v1330_v0 = vunpack.c.l.b16 %v1275_v36  ;;  %v1326_v7 = vunpack.c.l.b16 %v1257_v1  ;;  %v1263_v27 = vpop.permute.xlu2 %1262 }
 0xaea   :  { %v1353_v24 = vunpack.c.l.b16 %v1263_v27 }
 0xaeb   :  { %v1331_v3 = vpack.c.b16 %v1330_v0, %v1329_v15  ;;  %v1328_v20 = vpack.c.b16 %v1327_v11, %v1326_v7 }
 0xaed   :  { %v1336_v4 = vsel %vm372_vm12, %v1331_v3, 0 }
 0xaee   :  { %1345 = vmatpush.bf16.xpose.msra.mxu3 %v1336_v4 }
 0xaf0   :  { %v1279_v10 = vpop.permute.xlu1 %1278 }
 0xaf1   :  { %v1356_v13 = vunpack.c.l.b16 %v1279_v10  ;;  %v1283_v16 = vpop.permute.xlu0 %1282 }
 0xaf2   :  { %v1382_v5 = vunpack.c.l.b16 %v1283_v16 }
 0xaf3   :  { %v1357_v22 = vpack.c.b16 %v1356_v13, %v1355_v31 }
 0xaf4   :  { %v1383_v28 = vpack.c.b16 %v1382_v5, %v1381_v19 }
 0xaf5   :  { %2405 = vmatmul.msk.bf16.vlgmr.msra.gmra.mxu3 %vm372_vm12, %v1328_v20  ;;  %v1362_v29 = vsel %vm372_vm12, %v1357_v22, 0 }
 0xaf6   :  { %1371 = vmatpush.bf16.xpose.msrb.mxu0 %v1362_v29  ;;  %v1388_v30 = vsel %vm372_vm12, %v1383_v28, 0 }
 0xaf7   :  { %1397 = vmatpush.bf16.xpose.msrb.mxu1 %v1388_v30 }
 0xaf8   :  { %v1261_v35 = vpop.permute.xlu1 %1260 }
 0xaf9   :  { %v1352_v34 = vunpack.c.l.b16 %v1261_v35  ;;  %v1265_v21 = vpop.permute.xlu0 %1264 }
 0xafa   :  { %v1378_v39 = vunpack.c.l.b16 %v1265_v21 }
 0xafb   :  { %v1354_v37 = vpack.c.b16 %v1353_v24, %v1352_v34 }
 0xafd   :  { %2406 = vmatmul.msk.bf16.vlgmr.msrb.gmra.mxu0 %vm372_vm12, %v1354_v37 }
 0xb00   :  { %v1267_v38 = vpop.permute.xlu1 %1266 }
 0xb01   :  { %v1379_v14 = vunpack.c.l.b16 %v1267_v38 }
 0xb03   :  { %v1380_v41 = vpack.c.b16 %v1379_v14, %v1378_v39 }
 0xb05   :  { %v1321_v17 = vpop.f32.mrf.mxu2  ;;  %2407 = vmatmul.msk.bf16.vlgmr.msrb.gmra.mxu1 %vm372_vm12, %v1380_v41 }
 0xb06   :  { %v3411_v44 = vadd.f32 %v2690_v42, %v1321_v17 }
 0xb08   :  { %v1404_v59 = vsel %vm471_vm13, %v3411_v44, -inf  ;;  %v1289_v36 = vpop.permute.xlu1 %1288 }
 0xb09   :  { %1405 = vmax.xlane.f32.xlu2 %v1404_v59  ;;  %v1635_v34 = vunpack.c.l.b16 %v1289_v36 }
 0xb0d   :  { %v1323_v23 = vpop.f32.mrf.mxu2 }
 0xb0e   :  { %v3418_v45 = vadd.f32 %v2691_v40, %v1323_v23 }
 0xb10   :  { %v1407_v33 = vsel %vm471_vm13, %v3418_v45, -inf }
 0xb11   :  { %1408 = vmax.xlane.f32.xlu0 %v1407_v33 }
 0xb78   :  { %v1347_v48 = vpop.f32.mrf.mxu3 }
 0xb79   :  { %v1348_v57 = vadd.f32 %v2690_v42, %v1347_v48 }
 0xb7a   :  { %v1373_v49 = vpop.f32.mrf.mxu0 }
 0xb7b   :  { %v1374_v9 = vadd.f32 %v2690_v42, %v1373_v49  ;;  %v1410_v50 = vsel %vm471_vm13, %v1348_v57, -inf }
 0xb7c   :  { %1411 = vmax.xlane.f32.xlu2 %v1410_v50  ;;  %v1406_v63 = vpop.xlane.xlu2 %1405 }
 0xb7d   :  { %v1416_v51 = vsel %vm471_vm13, %v1374_v9, -inf }
 0xb7e   :  { %1417 = vmax.xlane.f32.xlu1 %v1416_v51 }
 0xb80   :  { %v1349_v58 = vpop.f32.mrf.mxu3 }
 0xb81   :  { %v1350_v60 = vadd.f32 %v2691_v40, %v1349_v58 }
 0xb82   :  { %v1375_v47 = vpop.f32.mrf.mxu0  ;;  %v1399_v52 = vpop.f32.mrf.mxu1 }
 0xb83   :  { %v1376_v53 = vadd.f32 %v2691_v40, %v1375_v47  ;;  %v1400_v54 = vadd.f32 %v2690_v42, %v1399_v52  ;;  %v1413_v62 = vsel %vm471_vm13, %v1350_v60, -inf }
 0xb84   :  { %v1409_v1 = vpop.xlane.xlu0 %1408 }
 0xb85   :  { %v1422_v55 = vsel %vm471_vm13, %v1400_v54, -inf  ;;  %v1419_v56 = vsel %vm471_vm13, %v1376_v53, -inf  ;;  %v1429_v48 = vsub.f32 %v3418_v45, %v1409_v1 }
 0xb86   :  { %1423 = vmax.xlane.f32.xlu0 %v1422_v55  ;;  %1420 = vmax.xlane.f32.xlu2 %v1419_v56 }
 0xb87   :  { %v1438_v49 = vmul.f32 1.442695, %v1429_v48 }
 0xb8a   :  { %v1401_v61 = vpop.f32.mrf.mxu1 }
 0xb8b   :  { %v1402_v32 = vadd.f32 %v2691_v40, %v1401_v61 }
 0xb8d   :  { %v1425_v12 = vsel %vm471_vm13, %v1402_v32, -inf }
 0xb8e   :  { %1426 = vmax.xlane.f32.xlu1 %v1425_v12  ;;  %1414 = vmax.xlane.f32.xlu0 %v1413_v62 }
 0xb9e   :  { %1290 = vrot.lane.b32.xlu2 %v3384_v46, %s3802_s3 }
 0xba2   :  { %1292 = vrot.lane.b32.xlu0 %v3382_v43, %s3801_s5 }
 0xbef   :  { %v1412_v15 = vpop.xlane.xlu2 %1411 }
 0xbf0   :  { %v1430_v0 = vsub.f32 %v1348_v57, %v1412_v15  ;;  %v1428_v57 = vsub.f32 %v3411_v44, %v1406_v63 }
 0xbf1   :  { %v1418_v3 = vpop.xlane.xlu1 %1417 }
 0xbf2   :  { %v1440_v2 = vmul.f32 1.442695, %v1430_v0  ;;  %v1432_v4 = vsub.f32 %v1374_v9, %v1418_v3  ;;  %v1436_v9 = vmul.f32 1.442695, %v1428_v57 }
 0xbf4   :  { %2632 = vpow2.f32 %v1440_v2  ;;  %v1444_v7 = vmul.f32 1.442695, %v1432_v4 }
 0xbf6   :  { %2634 = vpow2.f32 %v1444_v7 }
 0xbf9   :  { %v1424_v10 = vpop.xlane.xlu0 %1423  ;;  %v1421_v11 = vpop.xlane.xlu2 %1420 }
 0xbfa   :  { %v3432_v31 = vpop.eup %2632  ;;  %v1434_v13 = vsub.f32 %v1400_v54, %v1424_v10  ;;  %v1433_v16 = vsub.f32 %v1376_v53, %v1421_v11 }
 0xbfb   :  { %v1458_v19 = vsel %vm471_vm13, %v3432_v31, 0.0 }
 0xbfc   :  { %v3436_v5 = vpop.eup %2634  ;;  %v1448_v20 = vmul.f32 1.442695, %v1434_v13  ;;  %v1446_v22 = vmul.f32 1.442695, %v1433_v16  ;;  %1459 = vadd.xlane.f32.xlu1 %v1458_v19 }
 0xbfd   :  { %v1464_v28 = vsel %vm471_vm13, %v3436_v5, 0.0 }
 0xbfe   :  { %2636 = vpow2.f32 %v1448_v20  ;;  %1465 = vadd.xlane.f32.xlu0 %v1464_v28 }
 0xbff   :  { %2638 = vpow2.f32 %v1446_v22 }
 0xc01   :  { %v1427_v29 = vpop.xlane.xlu1 %1426  ;;  %v1415_v27 = vpop.xlane.xlu0 %1414 }
 0xc02   :  { %v1435_v30 = vsub.f32 %v1402_v32, %v1427_v29  ;;  %v1431_v35 = vsub.f32 %v1350_v60, %v1415_v27  ;;  %v1291_v24 = vpop.permute.xlu2 %1290 }
 0xc03   :  { %v1636_v37 = vunpack.c.l.b16 %v1291_v24 }
 0xc04   :  { %v3440_v21 = vpop.eup %2636  ;;  %v1450_v38 = vmul.f32 1.442695, %v1435_v30  ;;  %v1442_v39 = vmul.f32 1.442695, %v1431_v35 }
 0xc05   :  { %v3442_v14 = vpop.eup %2638  ;;  %v1637_v41 = vpack.c.b16 %v1636_v37, %v1635_v34  ;;  %v1470_v17 = vsel %vm471_vm13, %v3440_v21, 0.0 }
 0xc06   :  { %2640 = vpow2.f32 %v1450_v38  ;;  %1471 = vadd.xlane.f32.xlu2 %v1470_v17  ;;  %v1467_v42 = vsel %vm471_vm13, %v3442_v14, 0.0 }
 0xc07   :  { %2642 = vpow2.f32 %v1442_v39  ;;  %1468 = vadd.xlane.f32.xlu1 %v1467_v42  ;;  %1649 = vmatpush.bf16.msrb.mxu3 %v1637_v41 }
 0xc08   :  { %2644 = vpow2.f32 %v1438_v49 }
 0xc09   :  { %2646 = vpow2.f32 %v1436_v9 }
 0xc0c   :  { %v3448_v59 = vpop.eup %2640 }
 0xc0d   :  { %v3450_v23 = vpop.eup %2642  ;;  %v1473_v40 = vsel %vm471_vm13, %v3448_v59, 0.0 }
 0xc0e   :  { %1474 = vadd.xlane.f32.xlu0 %v1473_v40  ;;  %v1461_v33 = vsel %vm471_vm13, %v3450_v23, 0.0  ;;  %v3464_v50 = vpop.eup %2644 }
 0xc0f   :  { %1462 = vadd.xlane.f32.xlu2 %v1461_v33  ;;  %v3466_v51 = vpop.eup %2646 }
 0xc10   :  { %v1452_v47 = vsel %vm471_vm13, %v3466_v51, 0.0 }
 0xc20   :  { %1296 = vrot.lane.b32.xlu1 %v3382_v43, %s3803_s13  ;;  %v1455_v43 = vsel %vm471_vm13, %v3464_v50, 0.0 }
 0xc22   :  { %1294 = vrot.lane.b32.xlu0 %v3384_v46, %s3801_s5 }
 0xc27   :  { %1298 = vrot.lane.b32.xlu2 %v3384_v46, %s3803_s13  ;;  %v3472_v46 = vpop.permute.xlu0 %1292 }
 0xc4a   :  { %1456 = vadd.xlane.f32.xlu1 %v1455_v43 }
 0xc4c   :  { %1453 = vadd.xlane.f32.xlu0 %v1452_v47 }
 0xc6f   :  { %v1460_v45 = vpop.xlane.xlu1 %1459 }
 0xc70   :  { %2648 = vrcp.f32 %v1460_v45  ;;  %v1515_v32 = vand.u32 2147483647, %v1460_v45  ;;  %vm1511_vm3 = vweird.f32 %v1460_v45  ;;  %v1517_v36 = vand.u32 2147483648, %v1460_v45 }
 0xc71   :  { %v1466_v44 = vpop.xlane.xlu0 %1465 }
 0xc72   :  { %2650 = vrcp.f32 %v1466_v44  ;;  %vm3484_vm6 = vcmp.eq.f32.partialorder %v1515_v32, 8.507059e+37  ;;  %vm1541_vm7 = vweird.f32 %v1466_v44  ;;  %v1545_v2 = vand.u32 2147483647, %v1466_v44 }
 0xc73   :  { %v1547_v10 = vand.u32 2147483648, %v1466_v44  ;;  %v1518_v24 = vor.u32 1.1754944e-38, %v1517_v36 }
 0xc74   :  { %vm3508_vm1 = vcmp.eq.f32.partialorder %v1545_v2, 8.507059e+37 }
 0xc75   :  { %v1548_v17 = vor.u32 1.1754944e-38, %v1547_v10 }
 0xc76   :  { %v3474_v52 = vpop.eup %2648 }
 0xc77   :  { %v1507_v54 = vmul.f32 %v3474_v52, %v1460_v45  ;;  %vm1512_vm8 = vweird.f32 %v3474_v52 }
 0xc78   :  { %v3476_v53 = vpop.eup %2650  ;;  %vm3497_vm14 = vmor %vm1511_vm3, %vm1512_vm8 }
 0xc79   :  { %v1537_v55 = vmul.f32 %v3476_v53, %v1466_v44  ;;  %v1472_v56 = vpop.xlane.xlu2 %1471  ;;  %v1508_v60 = vsub.f32 1.0, %v1507_v54  ;;  %vm1542_vm9 = vweird.f32 %v3476_v53 }
 0xc7a   :  { %v1469_v58 = vpop.xlane.xlu1 %1468  ;;  %2652 = vrcp.f32 %v1472_v56  ;;  %v1575_v19 = vand.u32 2147483647, %v1472_v56  ;;  %v1577_v35 = vand.u32 2147483648, %v1472_v56  ;;  %vm3504_vm0 = vmor %vm1541_vm7, %vm1542_vm9  ;;  %vm1571_vm2 = vweird.f32 %v1472_v56 }
 0xc7b   :  { %2654 = vrcp.f32 %v1469_v58  ;;  %v1538_v61 = vsub.f32 1.0, %v1537_v55  ;;  %v1509_v62 = vmul.f32 %v3474_v52, %v1508_v60  ;;  %v1562_v22 = vand.u32 2147483648, %v1469_v58 }
 0xc7c   :  { %v1560_v30 = vand.u32 2147483647, %v1469_v58  ;;  %vm1556_vm3 = vweird.f32 %v1469_v58  ;;  %v1578_v47 = vor.u32 1.1754944e-38, %v1577_v35 }
 0xc7d   :  { %v1539_v15 = vmul.f32 %v3476_v53, %v1538_v61  ;;  %v1510_v13 = vadd.f32 %v3474_v52, %v1509_v62  ;;  %v1563_v48 = vor.u32 1.1754944e-38, %v1562_v22 }
 0xc7e   :  { %vm1561_vm9 = vcmp.eq.f32.partialorder %v1560_v30, 8.507059e+37 }
 0xc7f   :  { %v1540_v20 = vadd.f32 %v3476_v53, %v1539_v15  ;;  %v1514_v41 = vsel %vm3497_vm14, %v3474_v52, %v1510_v13  ;;  %vm1576_vm14 = vcmp.eq.f32.partialorder %v1575_v19, 8.507059e+37 }
 0xc80   :  { %v2653_v12 = vpop.eup %2652  ;;  %v1519_v45 = vsel %vm3484_vm6, %v1518_v24, %v1514_v41 }
 0xc81   :  { %v2655_v63 = vpop.eup %2654  ;;  %v1567_v0 = vmul.f32 %v2653_v12, %v1472_v56  ;;  %v3482_v1 = vpop.xlane.xlu0 %1474  ;;  %vm1572_vm11 = vweird.f32 %v2653_v12  ;;  %v1544_v33 = vsel %vm3504_vm0, %v3476_v53, %v1540_v20  ;;  %v1520_v3 = vmul.f32 %v3432_v31, %v1519_v45 }
 0xc82   :  { %v1552_v4 = vmul.f32 %v2655_v63, %v1469_v58  ;;  %2656 = vrcp.f32 %v3482_v1  ;;  %v3489_v7 = vpop.xlane.xlu2 %1462  ;;  %vm1557_vm15 = vweird.f32 %v2655_v63  ;;  %vm3516_vm8 = vmor %vm1571_vm2, %vm1572_vm11  ;;  %v1549_v54 = vsel %vm3508_vm1, %v1548_v17, %v1544_v33 }
 0xc83   :  { %v1568_v11 = vsub.f32 1.0, %v1567_v0  ;;  %2658 = vrcp.f32 %v3489_v7  ;;  %vm1558_vm7 = vmor %vm1556_vm3, %vm1557_vm15  ;;  %v1590_v56 = vand.u32 2147483647, %v3482_v1  ;;  %v1592_v58 = vand.u32 2147483648, %v3482_v1 }
 0xc84   :  { %v1553_v16 = vsub.f32 1.0, %v1552_v4  ;;  %v1530_v32 = vand.u32 2147483647, %v3489_v7  ;;  %vm1586_vm6 = vweird.f32 %v3482_v1  ;;  %v1532_v62 = vand.u32 2147483648, %v3489_v7 }
 0xc85   :  { %v1569_v28 = vmul.f32 %v2653_v12, %v1568_v11  ;;  %v1550_v2 = vmul.f32 %v3436_v5, %v1549_v54  ;;  %v1593_v4 = vor.u32 1.1754944e-38, %v1592_v58  ;;  %vm1526_vm1 = vweird.f32 %v3489_v7 }
 0xc86   :  { %v1554_v27 = vmul.f32 %v2655_v63, %v1553_v16  ;;  %vm1591_vm2 = vcmp.eq.f32.partialorder %v1590_v56, 8.507059e+37  ;;  %vm1531_vm3 = vcmp.eq.f32.partialorder %v1530_v32, 8.507059e+37  ;;  %v1661_v5 = vunpack.c.l.b16 %v3472_v46 }
 0xc87   :  { %v1570_v38 = vadd.f32 %v2653_v12, %v1569_v28  ;;  %v1598_v28 = vpack.c.bf16 %v1520_v3, %v1520_v3  ;;  %v1600_v29 = vpack.c.bf16 %v1550_v2, %v1550_v2 }
 0xc88   :  { %v2657_v39 = vpop.eup %2656  ;;  %v1555_v42 = vadd.f32 %v2655_v63, %v1554_v27 }
 0xc89   :  { %v1574_v57 = vsel %vm3516_vm8, %v2653_v12, %v1570_v38  ;;  %v1582_v49 = vmul.f32 %v2657_v39, %v3482_v1  ;;  %v2659_v9 = vpop.eup %2658  ;;  %vm1587_vm11 = vweird.f32 %v2657_v39 }
 0xc8a   :  { %v1559_v43 = vsel %vm1558_vm7, %v2655_v63, %v1555_v42  ;;  %v1522_v53 = vmul.f32 %v2659_v9, %v3489_v7  ;;  %v1579_v55 = vsel %vm1576_vm14, %v1578_v47, %v1574_v57  ;;  %vm1527_vm15 = vweird.f32 %v2659_v9  ;;  %v1299_v0 = vpop.permute.xlu2 %1298  ;;  %vm1588_vm0 = vmor %vm1586_vm6, %vm1587_vm11 }
 0xc8b   :  { %v1564_v44 = vsel %vm1561_vm9, %v1563_v48, %v1559_v43  ;;  %v1583_v52 = vsub.f32 1.0, %v1582_v49  ;;  %v1580_v63 = vmul.f32 %v3440_v21, %v1579_v55  ;;  %vm1528_vm8 = vmor %vm1526_vm1, %vm1527_vm15  ;;  %v1533_v21 = vor.u32 1.1754944e-38, %v1532_v62 }
 0xc8c   :  { %v1523_v61 = vsub.f32 1.0, %v1522_v53  ;;  %v1565_v12 = vmul.f32 %v3442_v14, %v1564_v44  ;;  %v1688_v13 = vunpack.c.l.b16 %v1299_v0  ;;  %v1632_v42 = vunpack.c.l.b16 %v1598_v28 }
 0xc8d   :  { %v1584_v60 = vmul.f32 %v2657_v39, %v1583_v52  ;;  %v1602_v19 = vpack.c.bf16 %v1580_v63, %v1580_v63 }
 0xc8e   :  { %v1524_v15 = vmul.f32 %v2659_v9, %v1523_v61  ;;  %v1601_v1 = vpack.c.bf16 %v1565_v12, %v1565_v12 }
 0xc8f   :  { %v1585_v36 = vadd.f32 %v2657_v39, %v1584_v60  ;;  %v1684_v38 = vunpack.c.l.b16 %v1602_v19 }
 0xc90   :  { %v1525_v14 = vadd.f32 %v2659_v9, %v1524_v15  ;;  %v1659_v37 = vunpack.c.l.b16 %v1601_v1 }
 0xc91   :  { %v1589_v10 = vsel %vm1588_vm0, %v2657_v39, %v1585_v36 }
 0xc92   :  { %v1594_v11 = vsel %vm1591_vm2, %v1593_v4, %v1589_v10  ;;  %v1297_v16 = vpop.permute.xlu1 %1296  ;;  %v1529_v31 = vsel %vm1528_vm8, %v2659_v9, %v1525_v14 }
 0xc93   :  { %v1595_v20 = vmul.f32 %v3448_v59, %v1594_v11  ;;  %v1687_v22 = vunpack.c.l.b16 %v1297_v16  ;;  %v1534_v7 = vsel %vm1531_vm3, %v1533_v21, %v1529_v31  ;;  %v1658_v59 = vunpack.c.l.b16 %v1600_v29 }
 0xc94   :  { %v1295_v27 = vpop.permute.xlu0 %1294  ;;  %v1535_v35 = vmul.f32 %v3450_v23, %v1534_v7 }
 0xc95   :  { %v1603_v30 = vpack.c.bf16 %v1595_v20, %v1595_v20  ;;  %v1689_v24 = vpack.c.b16 %v1688_v13, %v1687_v22  ;;  %v1662_v34 = vunpack.c.l.b16 %v1295_v27  ;;  %v1660_v33 = vpack.c.b16 %v1659_v37, %v1658_v59 }
 0xc96   :  { %v1599_v41 = vpack.c.bf16 %v1535_v35, %v1535_v35 }
 0xc97   :  { %v1685_v39 = vunpack.c.l.b16 %v1603_v30  ;;  %v1663_v17 = vpack.c.b16 %v1662_v34, %v1661_v5  ;;  %1701 = vmatpush.bf16.msra.mxu1 %v1689_v24  ;;  %v2499_v5 = vld [vmem:[%s3728_s14 + $0x10] sm:$0xff] }
 0xc98   :  { %v1633_v40 = vunpack.c.l.b16 %v1599_v41 }
 0xc99   :  { %1675 = vmatpush.bf16.msra.mxu0 %v1663_v17  ;;  %v1686_v46 = vpack.c.b16 %v1685_v39, %v1684_v38 }
 0xc9a   :  { %v1634_v48 = vpack.c.b16 %v1633_v40, %v1632_v42 }
 0xc9b   :  { %2411 = vmatmul.msk.bf16.vlgmr.msra.gmra.mxu1 %vm471_vm13, %v1686_v46 }
 0xc9c   :  { %2410 = vmatmul.msk.bf16.vlgmr.msra.gmra.mxu0 %vm471_vm13, %v1660_v33  ;;  %2409 = vmatmul.msk.bf16.vlgmr.msrb.gmra.mxu3 %vm471_vm13, %v1634_v48  ;;  %v2571_v48 = vld [vmem:[%s3729_s15 + $0x1] ss:$0 sm:$0xff] }
 0xcbd   :  { %v1457_v23 = vpop.xlane.xlu1 %1456 }
 0xcbe   :  { %2660 = vrcp.f32 %v1457_v23  ;;  %v1502_v44 = vand.u32 2147483648, %v1457_v23  ;;  %v1500_v53 = vand.u32 2147483647, %v1457_v23  ;;  %vm1496_vm9 = vweird.f32 %v1457_v23 }
 0xcbf   :  { %v1454_v57 = vpop.xlane.xlu0 %1453 }
 0xcc0   :  { %2662 = vrcp.f32 %v1454_v57  ;;  %v1487_v55 = vand.u32 2147483648, %v1454_v57  ;;  %v1485_v60 = vand.u32 2147483647, %v1454_v57  ;;  %v1503_v61 = vor.u32 1.1754944e-38, %v1502_v44 }
 0xcc1   :  { %vm1501_vm6 = vcmp.eq.f32.partialorder %v1500_v53, 8.507059e+37  ;;  %vm1481_vm15 = vweird.f32 %v1454_v57 }
 0xcc2   :  { %v1488_v63 = vor.u32 1.1754944e-38, %v1487_v55  ;;  %vm1486_vm1 = vcmp.eq.f32.partialorder %v1485_v60, 8.507059e+37 }
 0xcc4   :  { %v2661_v49 = vpop.eup %2660 }
 0xcc5   :  { %v1492_v9 = vmul.f32 %v2661_v49, %v1457_v23  ;;  %vm1497_vm7 = vweird.f32 %v2661_v49 }
 0xcc6   :  { %v2663_v43 = vpop.eup %2662  ;;  %vm1498_vm11 = vmor %vm1496_vm9, %vm1497_vm7 }
 0xcc7   :  { %v1493_v47 = vsub.f32 1.0, %v1492_v9  ;;  %v1477_v45 = vmul.f32 %v2663_v43, %v1454_v57  ;;  %vm1482_vm14 = vweird.f32 %v2663_v43 }
 0xcc8   :  { %vm1483_vm0 = vmor %vm1481_vm15, %vm1482_vm14 }
 0xcc9   :  { %v1494_v52 = vmul.f32 %v2661_v49, %v1493_v47  ;;  %v1478_v54 = vsub.f32 1.0, %v1477_v45 }
 0xccb   :  { %v1495_v56 = vadd.f32 %v2661_v49, %v1494_v52  ;;  %v1479_v58 = vmul.f32 %v2663_v43, %v1478_v54 }
 0xccd   :  { %v1499_v32 = vsel %vm1498_vm11, %v2661_v49, %v1495_v56  ;;  %v1480_v12 = vadd.f32 %v2663_v43, %v1479_v58 }
 0xcce   :  { %v1504_v62 = vsel %vm1501_vm6, %v1503_v61, %v1499_v32 }
 0xccf   :  { %v1505_v36 = vmul.f32 %v3464_v50, %v1504_v62  ;;  %v1484_v15 = vsel %vm1483_vm0, %v2663_v43, %v1480_v12 }
 0xcd0   :  { %v1489_v0 = vsel %vm1486_vm1, %v1488_v63, %v1484_v15  ;;  %v2502_v63 = vld [vmem:[%s3732_s18 + $0x18] sm:$0xff] }
 0xcd1   :  { %v1597_v3 = vpack.c.bf16 %v1505_v36, %v1505_v36  ;;  %v1490_v2 = vmul.f32 %v3466_v51, %v1489_v0  ;;  %v2500_v51 = vld [vmem:[%s3728_s14 + $0x18] sm:$0xff]  ;;  %1870 = vmatpush.bf16.msra.mxu3 %v2502_v63  ;;  %v2501_v36 = vld [vmem:[%s3732_s18 + $0x10] sm:$0xff]  ;;  %s3817_s14 = sld [smem:[#allocation16_spill]] }
 0xcd2   :  { %1770 = vmatpush.bf16.msra.mxu2 %v2500_v51  ;;  %s3819_s18 = sld [smem:[#allocation26_spill]] }
 0xcd3   :  { %v1596_v4 = vpack.c.bf16 %v1490_v2, %v1490_v2  ;;  %v1607_v10 = vunpack.c.l.b16 %v1597_v3 }
 0xcd5   :  { %v1606_v14 = vunpack.c.l.b16 %v1596_v4  ;;  %1871 = vmatpush.bf16.msra.mxu3 %v2501_v36 }
 0xcd6   :  { %1771 = vmatpush.bf16.msra.mxu2 %v2499_v5 }
 0xcd7   :  { %v1608_v1 = vpack.c.b16 %v1607_v10, %v1606_v14 }
 0xcd8   :  { %s2206_s3 = sshll.u32 %s3819_s18, 4  ;;  %s2207_s3 = int_to_ptr.hbm [resolvable:$true] %s2206_s3 }
 0xcd9   :  { %2408 = vmatmul.msk.bf16.vlgmr.msrb.gmra.mxu2 %vm471_vm13, %v1608_v1 }
 0xd18   :  { %v1703_v19 = vpop.f32.mrf.mxu1 }
 0xd19   :  { %v1677_v11 = vpop.f32.mrf.mxu0 }
 0xd1f   :  { %v1651_v21 = vpop.f32.mrf.mxu3 }
 0xd20   :  { %v1705_v31 = vpop.f32.mrf.mxu1 }
 0xd21   :  { %v1679_v13 = vpop.f32.mrf.mxu0  ;;  %v2550_v22 = vpack.i.bf16 %v1705_v31, %v1703_v19  ;;  %v2572_v31 = vld [vmem:[%s3730_s16 + $0x1] ss:$0 sm:$0xff]  ;;  %s2216_s16 = sshll.u32 %s3739_s25, 4  ;;  %s2217_s16 = int_to_ptr.hbm [resolvable:$true] %s2216_s16 }
 0xd22   :  { %v2540_v16 = vpack.i.bf16 %v1679_v13, %v1677_v11 }
 0xd24   :  { %2541 = vrot.lane.b32.xlu2 %v2540_v16, %s3814_s1 }
 0xd27   :  { %v1653_v50 = vpop.f32.mrf.mxu3 }
 0xd28   :  { %v2545_v20 = vpack.i.bf16 %v1653_v50, %v1651_v21 }
 0xd2c   :  { %2546 = vrot.lane.b32.xlu2 %v2545_v20, %s3815_s9 }
 0xd34   :  { %2551 = vrot.lane.b32.xlu2 %v2550_v22, %s3816_s6 }
 0xd5c   :  { %v1625_v29 = vpop.f32.mrf.mxu2 }
 0xd64   :  { %v1627_v35 = vpop.f32.mrf.mxu2 }
 0xd7e   :  { %v2542_v28 = vpop.permute.xlu2 %2541 }
 0xd7f   :  { %v2544_v37 = vunpack.i.h.bf16 %v2542_v28  ;;  %v2543_v38 = vunpack.i.l.bf16 %v2542_v28  ;;  %v2573_v28 = vld [vmem:[%s3731_s17 + $0x1] ss:$0 sm:$0xff]  ;;  %s2827_s17 = smov [#allocation4]  }
 0xd86   :  { %v2547_v7 = vpop.permute.xlu2 %2546 }
 0xd87   :  { %v2549_v27 = vunpack.i.h.bf16 %v2547_v7  ;;  %v2548_v30 = vunpack.i.l.bf16 %v2547_v7 }
 0xd89   :  { %v1733_v24 = vsel %vm372_vm12, %v1627_v35, %v2549_v27  ;;  %v1732_v34 = vsel %vm372_vm12, %v1625_v29, %v2548_v30 }
 0xd8a   :  { %v1734_v59 = vsel %vm471_vm13, %v1732_v34, %v2543_v38  ;;  %v1735_v42 = vsel %vm471_vm13, %v1733_v24, %v2544_v37  ;;  %v2574_v34 = vld [vmem:[%s3733_s19 + $0x1] ss:$0 sm:$0xff]  ;;  %s2214_s19 = sshll.u32 %s2827_s17, 4  ;;  %s2215_s19 = int_to_ptr.vmem [resolvable:$true] %s2214_s19 }
 0xd8e   :  { %v2552_v39 = vpop.permute.xlu2 %2551 }
 0xd8f   :  { %v2554_v41 = vunpack.i.h.bf16 %v2552_v39  ;;  %v2553_v17 = vunpack.i.l.bf16 %v2552_v39 }
 0xd91   :  { %v1736_v40 = vsel %vm804_vm5, %v1734_v59, %v2553_v17  ;;  %v1737_v46 = vsel %vm804_vm5, %v1735_v42, %v2554_v41 }
 0xd92   :  { %v1738_v33 = vpack.c.bf16 %v1737_v46, %v1736_v40 }
 0xd94   :  { %2425 = vmatmul.msk.bf16.vlgmr.msra.gmra.mxu2 %vm142_vm4, %v1738_v33 }
 0xe17   :  { %v1773_v23 = vpop.f32.mrf.mxu2 }
 0xe18   :  { %v1774_v57 = vadd.f32 %v2571_v48, %v1773_v23 }
 0xe1a   :  { %v3571_v49 = vadd.f32 %v1774_v57, %v3323_v25 }
 0xe1c   :  { %v1784_v9 = vsel %vm142_vm4, %v3571_v49, 0.0 }
 0xe1d   :  { %1785 = vadd.xlane.f32.xlu2 %v1784_v9 }
 0xe1f   :  { %v1775_v43 = vpop.f32.mrf.mxu2 }
 0xe20   :  { %v1776_v47 = vadd.f32 %v2571_v48, %v1775_v43 }
 0xe22   :  { %v3576_v45 = vadd.f32 %v1776_v47, %v3330_v18 }
 0xe24   :  { %v1787_v44 = vsel %vm142_vm4, %v3576_v45, 0.0 }
 0xe25   :  { %1788 = vadd.xlane.f32.xlu0 %v1787_v44 }
 0xe90   :  { %v1786_v52 = vpop.xlane.xlu2 %1785 }
 0xe91   :  { %v1790_v53 = vmul.f32 %v1786_v52, %v3014_v26 }
 0xe93   :  { %v1792_v54 = vsub.f32 %v3571_v49, %v1790_v53  ;;  %v2506_v53 = vld [vmem:[%s3734_s20 + $0x38] sm:$0xff] }
 0xe94   :  { %2004 = vmatpush.bf16.msrb.mxu0 %v2506_v53 }
 0xe95   :  { %v1794_v25 = vmul.f32 %v1792_v54, %v1792_v54 }
 0xe97   :  { %v1796_v55 = vsel %vm142_vm4, %v1794_v25, 0.0 }
 0xe98   :  { %v1789_v56 = vpop.xlane.xlu0 %1788  ;;  %1797 = vadd.xlane.f32.xlu1 %v1796_v55 }
 0xe99   :  { %v1791_v58 = vmul.f32 %v1789_v56, %v3014_v26 }
 0xe9b   :  { %v1793_v60 = vsub.f32 %v3576_v45, %v1791_v58 }
 0xe9d   :  { %v1795_v18 = vmul.f32 %v1793_v60, %v1793_v60 }
 0xe9f   :  { %v1799_v61 = vsel %vm142_vm4, %v1795_v18, 0.0 }
 0xea0   :  { %1800 = vadd.xlane.f32.xlu0 %v1799_v61  ;;  %v2505_v61 = vld [vmem:[%s3734_s20 + $0x30] sm:$0xff] }
 0xea1   :  { %2005 = vmatpush.bf16.msrb.mxu0 %v2505_v61 }
 0xf0b   :  { %v1798_v32 = vpop.xlane.xlu1 %1797 }
 0xf0c   :  { %v1802_v12 = vmul.f32 %v1798_v32, %v3014_v26 }
 0xf0e   :  { %v1804_v62 = vadd.f32 1e-05, %v1802_v12 }
 0xf10   :  { %2664 = vrsqrt.f32 %v1804_v62  ;;  %vm1812_vm13 = vweird.f32 %v1804_v62 }
 0xf13   :  { %v1801_v15 = vpop.xlane.xlu0 %1800 }
 0xf14   :  { %v1803_v0 = vmul.f32 %v1801_v15, %v3014_v26 }
 0xf16   :  { %v2665_v3 = vpop.eup %2664  ;;  %v1805_v2 = vadd.f32 1e-05, %v1803_v0 }
 0xf17   :  { %v1807_v4 = vmul.f32 %v2665_v3, %v1804_v62  ;;  %vm1813_vm12 = vweird.f32 %v2665_v3 }
 0xf18   :  { %2666 = vrsqrt.f32 %v1805_v2  ;;  %vm1814_vm5 = vmor %vm1812_vm13, %vm1813_vm12  ;;  %vm1822_vm3 = vweird.f32 %v1805_v2 }
 0xf19   :  { %v1808_v10 = vmul.f32 %v2665_v3, %v1807_v4 }
 0xf1b   :  { %v1809_v14 = vmul.f32 0.5, %v1808_v10 }
 0xf1d   :  { %v1810_v1 = vsub.f32 1.5, %v1809_v14 }
 0xf1e   :  { %v2667_v11 = vpop.eup %2666 }
 0xf1f   :  { %v1811_v21 = vmul.f32 %v2665_v3, %v1810_v1  ;;  %v1817_v13 = vmul.f32 %v2667_v11, %v1805_v2  ;;  %vm1823_vm2 = vweird.f32 %v2667_v11  ;;  %v2503_v1 = vld [vmem:[%s3734_s20 + $0x20] sm:$0xff] }
 0xf20   :  { %vm1824_vm8 = vmor %vm1822_vm3, %vm1823_vm2 }
 0xf21   :  { %v1818_v16 = vmul.f32 %v2667_v11, %v1817_v13  ;;  %v1815_v19 = vsel %vm1814_vm5, %v2665_v3, %v1811_v21  ;;  %v2504_v3 = vld [vmem:[%s3734_s20 + $0x28] sm:$0xff]  ;;  %s2240_s20 = sshll.u32 %s2829_s30, 4  ;;  %s2241_s20 = int_to_ptr.vmem [resolvable:$true] %s2240_s20 }
 0xf22   :  { %v1826_v22 = vmul.f32 %v1815_v19, %v1792_v54  ;;  %2006 = vmatpush.bf16.msrb.mxu0 %v2504_v3  ;;  %2248 = dma.vmem_to_hbm [thread:$0]  %s2241_s20, 256, %s2243_s11, [#allocation8], %s2828_s24, %s2828_s24, %s3815_s9  }
 0xf23   :  { %v1819_v50 = vmul.f32 0.5, %v1818_v16 }
 0xf24   :  { %v1831_v29 = vmul.f32 %v2572_v31, %v1826_v22 }
 0xf25   :  { %v1820_v20 = vsub.f32 1.5, %v1819_v50 }
 0xf26   :  { %v1836_v30 = vadd.f32 %v2573_v28, %v1831_v29  ;;  %2007 = vmatpush.bf16.msrb.mxu0 %v2503_v1 }
 0xf27   :  { %v1821_v51 = vmul.f32 %v2667_v11, %v1820_v20 }
 0xf29   :  { %v1825_v5 = vsel %vm1824_vm8, %v2667_v11, %v1821_v51 }
 0xf2a   :  { %v1827_v7 = vmul.f32 %v1825_v5, %v1793_v60 }
 0xf2c   :  { %v1832_v27 = vmul.f32 %v2572_v31, %v1827_v7 }
 0xf2e   :  { %v1837_v35 = vadd.f32 %v2573_v28, %v1832_v27 }
 0xf30   :  { %v1838_v24 = vpack.c.bf16 %v1837_v35, %v1836_v30 }
 0xf32   :  { %2441 = vmatmul.msk.bf16.vlgmr.msra.gmra.mxu3 %vm142_vm4, %v1838_v24 }
 0xfb5   :  { %v1873_v37 = vpop.f32.mrf.mxu3 }
 0xfb6   :  { %v3604_v38 = vadd.f32 %v2574_v34, %v1873_v37 }
 0xfb8   :  { %v3607_v39 = vmul.f32 0.70710677, %v3604_v38 }
 0xfba   :  { %v1882_v41 = vand.u32 2147483647, %v3607_v39  ;;  %vm1948_vm12 = vcmp.lt.f32.partialorder %v3607_v39, 0.0  ;;  %v2575_v39 = vld [vmem:[%s3735_s21 + $0x1] ss:$0 sm:$0xff]  ;;  %s2227_s21 = sshll.u32 %s2830_s2, 4  ;;  %s2228_s21 = int_to_ptr.vmem [resolvable:$true] %s2227_s21 }
 0xfbc   :  { %v1884_v17 = vmul.f32 0.3275911, %v1882_v41  ;;  %v1936_v60 = vsub.f32 0.0, %v1882_v41 }
 0xfbd   :  { %v1875_v59 = vpop.f32.mrf.mxu3 }
 0xfbe   :  { %v1886_v42 = vadd.f32 1.0, %v1884_v17  ;;  %v3610_v40 = vadd.f32 %v2574_v34, %v1875_v59  ;;  %v1938_v36 = vmul.f32 %v1936_v60, %v1882_v41 }
 0xfc0   :  { %2668 = vrcp.f32 %v1886_v42  ;;  %v3613_v46 = vmul.f32 0.70710677, %v3610_v40  ;;  %v1899_v47 = vand.u32 2147483648, %v1886_v42  ;;  %v1897_v52 = vand.u32 2147483647, %v1886_v42 }
 0xfc1   :  { %vm1893_vm9 = vweird.f32 %v1886_v42  ;;  %v1940_v11 = vmul.f32 1.442695, %v1938_v36 }
 0xfc2   :  { %v1883_v33 = vand.u32 2147483647, %v3613_v46  ;;  %v1900_v25 = vor.u32 1.1754944e-38, %v1899_v47  ;;  %vm1898_vm11 = vcmp.eq.f32.partialorder %v1897_v52, 8.507059e+37  ;;  %vm1949_vm13 = vcmp.lt.f32.partialorder %v3613_v46, 0.0 }
 0xfc3   :  { %v1879_v52 = vmul.f32 0.5, %v3610_v40 }
 0xfc4   :  { %v1885_v48 = vmul.f32 0.3275911, %v1883_v33  ;;  %v1937_v19 = vsub.f32 0.0, %v1883_v33 }
 0xfc6   :  { %v2669_v23 = vpop.eup %2668  ;;  %v1887_v9 = vadd.f32 1.0, %v1885_v48  ;;  %v1939_v51 = vmul.f32 %v1937_v19, %v1883_v33 }
 0xfc7   :  { %v1889_v57 = vmul.f32 %v2669_v23, %v1886_v42  ;;  %vm1894_vm7 = vweird.f32 %v2669_v23 }
 0xfc8   :  { %2670 = vrcp.f32 %v1887_v9  ;;  %vm1895_vm14 = vmor %vm1893_vm9, %vm1894_vm7  ;;  %v1914_v63 = vand.u32 2147483648, %v1887_v9  ;;  %v1912_v0 = vand.u32 2147483647, %v1887_v9  ;;  %vm1908_vm15 = vweird.f32 %v1887_v9 }
 0xfc9   :  { %v1890_v43 = vsub.f32 1.0, %v1889_v57  ;;  %2672 = vpow2.f32 %v1940_v11  ;;  %v1942_v27 = vmul.f32 1.442695, %v1939_v51  ;;  %v2507_v11 = vld [vmem:[%s3818_s29] sm:$0xff] }
 0xfca   :  { %v1915_v14 = vor.u32 1.1754944e-38, %v1914_v63  ;;  %vm1913_vm1 = vcmp.eq.f32.partialorder %v1912_v0, 8.507059e+37 }
 0xfcb   :  { %v1891_v44 = vmul.f32 %v2669_v23, %v1890_v43  ;;  %2674 = vpow2.f32 %v1942_v27 }
 0xfcd   :  { %v1892_v54 = vadd.f32 %v2669_v23, %v1891_v44  ;;  %v1878_v44 = vmul.f32 0.5, %v3604_v38 }
 0xfce   :  { %v2671_v55 = vpop.eup %2670 }
 0xfcf   :  { %v1896_v56 = vsel %vm1895_vm14, %v2669_v23, %v1892_v54  ;;  %v1904_v18 = vmul.f32 %v2671_v55, %v1887_v9  ;;  %vm1909_vm6 = vweird.f32 %v2671_v55  ;;  %v2673_v30 = vpop.eup %2672 }
 0xfd0   :  { %v1901_v58 = vsel %vm1898_vm11, %v1900_v25, %v1896_v56  ;;  %vm1910_vm0 = vmor %vm1908_vm15, %vm1909_vm6  ;;  %vm2162_vm6 = vcmask 7168  }
 0xfd1   :  { %v1918_v32 = vmul.f32 1.0614054, %v1901_v58  ;;  %v1905_v12 = vsub.f32 1.0, %v1904_v18  ;;  %v2675_v48 = vpop.eup %2674 }
 0xfd3   :  { %v1920_v62 = vadd.f32 -1.4531521, %v1918_v32  ;;  %v1906_v15 = vmul.f32 %v2671_v55, %v1905_v12 }
 0xfd5   :  { %v1922_v2 = vmul.f32 %v1920_v62, %v1901_v58  ;;  %v1907_v4 = vadd.f32 %v2671_v55, %v1906_v15 }
 0xfd7   :  { %v1924_v10 = vadd.f32 1.4214138, %v1922_v2  ;;  %v1911_v21 = vsel %vm1910_vm0, %v2671_v55, %v1907_v4 }
 0xfd8   :  { %v1916_v16 = vsel %vm1913_vm1, %v1915_v14, %v1911_v21  ;;  %v2508_v14 = vld [vmem:[%s3818_s29 + $0x8] sm:$0xff]  ;;  %s2831_s29 = smov [#allocation9]  }
 0xfd9   :  { %v1926_v13 = vmul.f32 %v1924_v10, %v1901_v58  ;;  %v1919_v50 = vmul.f32 1.0614054, %v1916_v16  ;;  %2100 = vmatpush.bf16.msrb.mxu1 %v2508_v14  ;;  %s2253_s8 = sshll.u32 %s2831_s29, 4  ;;  %s2254_s8 = int_to_ptr.vmem [resolvable:$true] %s2253_s8 }
 0xfdb   :  { %v1928_v20 = vadd.f32 -0.28449672, %v1926_v13  ;;  %v1921_v31 = vadd.f32 -1.4531521, %v1919_v50 }
 0xfdd   :  { %v1930_v22 = vmul.f32 %v1928_v20, %v1901_v58  ;;  %v1923_v5 = vmul.f32 %v1921_v31, %v1916_v16  ;;  %2101 = vmatpush.bf16.msrb.mxu1 %v2507_v11 }
 0xfdf   :  { %v1932_v28 = vadd.f32 0.2548296, %v1930_v22  ;;  %v1925_v29 = vadd.f32 1.4214138, %v1923_v5 }
 0xfe1   :  { %v1934_v7 = vmul.f32 %v1932_v28, %v1901_v58  ;;  %v1927_v35 = vmul.f32 %v1925_v29, %v1916_v16  ;;  %v2576_v29 = vld [vmem:[%s3736_s22] ss:$0 sm:$0xff] }
 0xfe3   :  { %v1944_v24 = vmul.f32 %v2673_v30, %v1934_v7  ;;  %v1929_v34 = vadd.f32 -0.28449672, %v1927_v35 }
 0xfe5   :  { %v1946_v37 = vsub.f32 1.0, %v1944_v24  ;;  %v1931_v41 = vmul.f32 %v1929_v34, %v1916_v16 }
 0xfe7   :  { %v1933_v17 = vadd.f32 0.2548296, %v1931_v41  ;;  %v1950_v59 = vsub.f32 0.0, %v1946_v37 }
 0xfe9   :  { %v1935_v42 = vmul.f32 %v1933_v17, %v1916_v16  ;;  %v1952_v33 = vsel %vm1948_vm12, %v1950_v59, %v1946_v37 }
 0xfea   :  { %v1954_v43 = vadd.f32 1.0, %v1952_v33 }
 0xfeb   :  { %v1945_v23 = vmul.f32 %v2675_v48, %v1935_v42 }
 0xfec   :  { %v1956_v54 = vmul.f32 %v1954_v43, %v1878_v44 }
 0xfed   :  { %v1947_v57 = vsub.f32 1.0, %v1945_v23 }
 0xfef   :  { %v1951_v9 = vsub.f32 0.0, %v1947_v57 }
 0xff1   :  { %v1953_v47 = vsel %vm1949_vm13, %v1951_v9, %v1947_v57  ;;  %vm2197_vm13 = vcmask 0  }
 0xff2   :  { %v1955_v53 = vadd.f32 1.0, %v1953_v47  ;;  %v2111_v47 = vld [vmem:[%s3817_s14 + $0x8] sm:$0xff] }
 0xff3   :  { %vm2153_vm11 = vcmp.ne.s32.totalorder %v2111_v47, 4294967196 }
 0xff4   :  { %v1957_v25 = vmul.f32 %v1955_v53, %v1879_v52 }
 0xff6   :  { %v1958_v55 = vpack.c.bf16 %v1957_v25, %v1956_v54 }
 0xff8   :  { %2467 = vmatmul.msk.bf16.vlgmr.msrb.gmra.mxu0 %vm1058_vm10, %v1958_v55 }
0x1075   :  { %v2009_v56 = vpop.f32.mrf.mxu0 }
0x1076   :  { %v2010_v58 = vadd.f32 %v2575_v39, %v2009_v56 }
0x1078   :  { %v2014_v60 = vadd.f32 %v2010_v58, %v3571_v49 }
0x107a   :  { %v2018_v46 = vsel %vm142_vm4, %v2014_v60, 0.0 }
0x107b   :  { %2019 = vadd.xlane.f32.xlu1 %v2018_v46 }
0x107d   :  { %v2011_v38 = vpop.f32.mrf.mxu0 }
0x107e   :  { %v2012_v18 = vadd.f32 %v2575_v39, %v2011_v38 }
0x1080   :  { %v2015_v40 = vadd.f32 %v2012_v18, %v3576_v45  ;;  %v3647_v45 = vld [vmem:[%s3817_s14] sm:$0xff]  ;;  %s2229_s14 = sshll.u32 %s3740_s26, 4  ;;  %s2832_s26 = smov [#allocation2]   ;;  %s2230_s14 = int_to_ptr.hbm [resolvable:$true] %s2229_s14 }
0x1081   :  { %s2204_s28 = sshll.u32 %s2832_s26, 4  ;;  %s2205_s28 = int_to_ptr.vmem [resolvable:$true] %s2204_s28 }
0x1082   :  { %v2021_v61 = vsel %vm142_vm4, %v2015_v40, 0.0 }
0x1083   :  { %2022 = vadd.xlane.f32.xlu0 %v2021_v61 }
0x10ee   :  { %v2020_v32 = vpop.xlane.xlu1 %2019 }
0x10ef   :  { %v2024_v12 = vmul.f32 %v2020_v32, %v3014_v26 }
0x10f1   :  { %v2026_v62 = vsub.f32 %v2014_v60, %v2024_v12 }
0x10f3   :  { %v2028_v63 = vmul.f32 %v2026_v62, %v2026_v62 }
0x10f5   :  { %v2030_v36 = vsel %vm142_vm4, %v2028_v63, 0.0 }
0x10f6   :  { %v2023_v15 = vpop.xlane.xlu0 %2022  ;;  %2031 = vadd.xlane.f32.xlu1 %v2030_v36 }
0x10f7   :  { %v2025_v49 = vmul.f32 %v2023_v15, %v3014_v26 }
0x10f9   :  { %v2027_v0 = vsub.f32 %v2015_v40, %v2025_v49 }
0x10fb   :  { %v2029_v3 = vmul.f32 %v2027_v0, %v2027_v0 }
0x10fd   :  { %v2033_v2 = vsel %vm142_vm4, %v2029_v3, 0.0 }
0x10fe   :  { %2034 = vadd.xlane.f32.xlu0 %v2033_v2 }
0x1112   :  { %2137 = vperm.xlu0 %2524, %v3647_v45  }
0x1169   :  { %v2032_v4 = vpop.xlane.xlu1 %2031 }
0x116a   :  { %v2036_v10 = vmul.f32 %v2032_v4, %v3014_v26 }
0x116c   :  { %v2038_v1 = vadd.f32 1e-05, %v2036_v10 }
0x116e   :  { %2676 = vrsqrt.f32 %v2038_v1  ;;  %vm2046_vm2 = vweird.f32 %v2038_v1 }
0x1171   :  { %v2035_v21 = vpop.xlane.xlu0 %2034 }
0x1172   :  { %v2037_v13 = vmul.f32 %v2035_v21, %v3014_v26  ;;  %v2577_v26 = vld [vmem:[%s3737_s23] ss:$0 sm:$0xff] }
0x1174   :  { %v2677_v16 = vpop.eup %2676  ;;  %v2039_v19 = vadd.f32 1e-05, %v2037_v13 }
0x1175   :  { %v2041_v50 = vmul.f32 %v2677_v16, %v2038_v1  ;;  %vm2047_vm5 = vweird.f32 %v2677_v16 }
0x1176   :  { %2678 = vrsqrt.f32 %v2039_v19  ;;  %vm2048_vm3 = vmor %vm2046_vm2, %vm2047_vm5  ;;  %vm2056_vm7 = vweird.f32 %v2039_v19 }
0x1177   :  { %v2042_v20 = vmul.f32 %v2677_v16, %v2041_v50 }
0x1179   :  { %v2043_v31 = vmul.f32 0.5, %v2042_v20 }
0x117b   :  { %v2044_v22 = vsub.f32 1.5, %v2043_v31 }
0x117c   :  { %v2679_v51 = vpop.eup %2678 }
0x117d   :  { %v2045_v5 = vmul.f32 %v2677_v16, %v2044_v22  ;;  %v2051_v28 = vmul.f32 %v2679_v51, %v2039_v19  ;;  %vm2057_vm8 = vweird.f32 %v2679_v51 }
0x117e   :  { %vm2058_vm9 = vmor %vm2056_vm7, %vm2057_vm8 }
0x117f   :  { %v2049_v7 = vsel %vm2048_vm3, %v2677_v16, %v2045_v5  ;;  %v2052_v27 = vmul.f32 %v2679_v51, %v2051_v28 }
0x1180   :  { %v2060_v30 = vmul.f32 %v2049_v7, %v2026_v62 }
0x1181   :  { %v2053_v35 = vmul.f32 0.5, %v2052_v27 }
0x1182   :  { %v2065_v24 = vmul.f32 %v2576_v29, %v2060_v30 }
0x1183   :  { %v2054_v34 = vsub.f32 1.5, %v2053_v35 }
0x1184   :  { %v2070_v37 = vadd.f32 %v2577_v26, %v2065_v24  ;;  %v2138_v46 = vpop.permute.xlu0 %2137 }
0x1185   :  { %v2055_v41 = vmul.f32 %v2679_v51, %v2054_v34 }
0x1186   :  { %2072 = vst.msk [vmem:[#allocation9] sm:$0xff] %vm142_vm4, %v2070_v37 }
0x1187   :  { %v2059_v17 = vsel %vm2058_vm9, %v2679_v51, %v2055_v41 }
0x1188   :  { %v2061_v59 = vmul.f32 %v2059_v17, %v2027_v0 }
0x118a   :  { %v2066_v42 = vmul.f32 %v2576_v29, %v2061_v59 }
0x118c   :  { %v2071_v48 = vadd.f32 %v2577_v26, %v2066_v42 }
0x118e   :  { %2073 = vst.msk [vmem:[#allocation9 + $0x8] sm:$0xff] %vm142_vm4, %v2071_v48  ;;  %v2074_v23 = vpack.c.bf16 %v2071_v48, %v2070_v37 }
0x118f   :  { %2261 = dma.vmem_to_hbm [thread:$0]  %s2254_s8, 256, %s2256_s27, [#allocation8], %s2828_s24, %s2828_s24, %s3815_s9  }
0x1190   :  { %2476 = vmatmul.msk.bf16.vlgmr.msrb.gmra.mxu1 %vm142_vm4, %v2074_v23  ;;  %vm2142_vm4 = vcmp.eq.s32.totalorder %v2990_v6, %v2138_v46 }
0x120d   :  { %v2103_v33 = vpop.f32.mrf.mxu1 }
0x120e   :  { %2108 = vst.msk [vmem:[#allocation4] sm:$0xff] %vm1058_vm10, %v2103_v33  ;;  %v2112_v57 = vsel %vm1058_vm10, %v2103_v33, -inf  ;;  %v2144_v18 = vsel %vm2142_vm4, %v2103_v33, 0.0 }
0x120f   :  { %2113 = vmax.xlane.f32.xlu1 %v2112_v57  ;;  %v2146_v32 = vsel %vm1058_vm10, %v2144_v18, 0.0 }
0x1215   :  { %v2105_v9 = vpop.f32.mrf.mxu1 }
0x1216   :  { %2109 = vst.msk [vmem:[#allocation4 + $0x8] sm:$0xff] %vm1058_vm10, %v2105_v9  ;;  %v2115_v43 = vsel %vm1058_vm10, %v2105_v9, -inf }
0x1217   :  { %2116 = vmax.xlane.f32.xlu2 %v2115_v43  ;;  %2222 = dma.vmem_to_hbm [thread:$0]  %s2215_s19, 256, %s2217_s16, [#allocation5], %s2828_s24, %s2828_s24, %s3815_s9  }
0x1218   :  { %2235 = dma.vmem_to_hbm [thread:$0]  %s2228_s21, 256, %s2230_s14, [#allocation5], %s2828_s24, %s2828_s24, %s3815_s9  }
0x1228   :  { %2140 = vperm.xlu1 %2555, %v2111_v47  }
0x1282   :  { %v3674_v44 = vpop.xlane.xlu1 %2113 }
0x1283   :  { %v2118_v52 = vsub.f32 %v2103_v33, %v3674_v44 }
0x1285   :  { %v2120_v53 = vmul.f32 1.442695, %v2118_v52 }
0x1287   :  { %2680 = vpow2.f32 %v2120_v53 }
0x128a   :  { %v3677_v54 = vpop.xlane.xlu2 %2116 }
0x128b   :  { %v2119_v25 = vsub.f32 %v2105_v9, %v3677_v54 }
0x128d   :  { %v2681_v55 = vpop.eup %2680  ;;  %v2122_v39 = vmul.f32 1.442695, %v2119_v25 }
0x128e   :  { %v2124_v56 = vsel %vm1058_vm10, %v2681_v55, 0.0 }
0x128f   :  { %2682 = vpow2.f32 %v2122_v39  ;;  %2125 = vadd.xlane.f32.xlu2 %v2124_v56 }
0x1295   :  { %v2683_v58 = vpop.eup %2682 }
0x1296   :  { %v2127_v60 = vsel %vm1058_vm10, %v2683_v58, 0.0 }
0x1297   :  { %2128 = vadd.xlane.f32.xlu2 %v2127_v60 }
0x129a   :  { %v2141_v38 = vpop.permute.xlu1 %2140 }
0x129b   :  { %vm2143_vm14 = vcmp.eq.s32.totalorder %v2990_v6, %v2141_v38  ;;  %v2478_v6 = vsel %vm2153_vm11, 1.0, %v2819_v8 }
0x129c   :  { %v2145_v40 = vsel %vm2143_vm14, %v2105_v9, 0.0  ;;  %v2173_v62 = vsel %vm2162_vm6, %v2478_v6, 0.0 }
0x129d   :  { %v2149_v61 = vsel %vm1058_vm10, %v2145_v40, 0.0  ;;  %vm2152_vm10 = vcmp.ne.s32.totalorder %v3647_v45, 4294967196 }
0x129e   :  { %2150 = vadd.xlane.f32.xlu0 %v2149_v61  ;;  %v2477_v12 = vsel %vm2152_vm10, 1.0, %v2819_v8 }
0x129f   :  { %2147 = vadd.xlane.f32.xlu2 %v2146_v32  ;;  %v2172_v63 = vsel %vm2162_vm6, %v2477_v12, 0.0 }
0x12a0   :  { %v2174_v36 = vadd.f32 %v2173_v62, %v2172_v63 }
0x12a2   :  { %v2175_v15 = vrot.slane %v2174_v36, 4 }
0x12a4   :  { %v2176_v49 = vadd.f32 %v2175_v15, %v2174_v36 }
0x12a6   :  { %v2177_v0 = vrot.slane %v2176_v49, 2 }
0x12a8   :  { %v2178_v3 = vadd.f32 %v2177_v0, %v2176_v49 }
0x12aa   :  { %v2179_v2 = vrot.slane %v2178_v3, 1 }
0x12ac   :  { %v2180_v10 = vadd.f32 %v2179_v2, %v2178_v3 }
0x12ae   :  { %v2181_v45 = vmax.f32 %v2180_v10, 1.0 }
0x12b0   :  { %vm2187_vm15 = vweird.f32 %v2181_v45  ;;  %v2193_v24 = vand.u32 2147483648, %v2181_v45  ;;  %v2191_v41 = vand.u32 2147483647, %v2181_v45 }
0x12b2   :  { %v2194_v59 = vor.u32 1.1754944e-38, %v2193_v24  ;;  %vm2192_vm12 = vcmp.eq.f32.partialorder %v2191_v41, 8.507059e+37 }
0x1302   :  { %v2126_v4 = vpop.xlane.xlu2 %2125 }
0x1303   :  { %2684 = vlog2.f32 %v2126_v4 }
0x1304   :  { %2686 = vrcp.f32 %v2181_v45 }
0x1309   :  { %v2685_v14 = vpop.eup %2684 }
0x130a   :  { %v2129_v1 = vpop.xlane.xlu2 %2128  ;;  %v2131_v11 = vmul.f32 0.6931472, %v2685_v14  ;;  %v2687_v8 = vpop.eup %2686 }
0x130b   :  { %2688 = vlog2.f32 %v2129_v1  ;;  %v2183_v20 = vmul.f32 %v2687_v8, %v2181_v45  ;;  %vm2188_vm0 = vweird.f32 %v2687_v8 }
0x130c   :  { %v2134_v13 = vadd.f32 %v2131_v11, %v3674_v44  ;;  %vm2189_vm1 = vmor %vm2187_vm15, %vm2188_vm0 }
0x130d   :  { %v2184_v28 = vsub.f32 1.0, %v2183_v20 }
0x130f   :  { %v2185_v30 = vmul.f32 %v2687_v8, %v2184_v28 }
0x1311   :  { %v2689_v21 = vpop.eup %2688  ;;  %v2151_v22 = vpop.xlane.xlu0 %2150  ;;  %v2186_v37 = vadd.f32 %v2687_v8, %v2185_v30 }
0x1312   :  { %v2133_v16 = vmul.f32 0.6931472, %v2689_v21  ;;  %v2148_v19 = vpop.xlane.xlu2 %2147 }
0x1313   :  { %v2158_v50 = vsub.f32 %v2134_v13, %v2148_v19  ;;  %v2190_v48 = vsel %vm2189_vm1, %v2687_v8, %v2186_v37 }
0x1314   :  { %v2135_v31 = vadd.f32 %v2133_v16, %v3677_v54  ;;  %v2195_v33 = vsel %vm2192_vm12, %v2194_v59, %v2190_v48 }
0x1315   :  { %v2160_v5 = vmul.f32 %v2477_v12, %v2158_v50 }
0x1316   :  { %v2159_v51 = vsub.f32 %v2135_v31, %v2151_v22 }
0x1317   :  { %v2163_v27 = vsel %vm2162_vm6, %v2160_v5, 0.0 }
0x1318   :  { %v2161_v29 = vmul.f32 %v2478_v6, %v2159_v51 }
0x131a   :  { %v2164_v7 = vsel %vm2162_vm6, %v2161_v29, 0.0 }
0x131b   :  { %v2165_v26 = vadd.f32 %v2164_v7, %v2163_v27 }
0x131d   :  { %v2166_v35 = vrot.slane %v2165_v26, 4 }
0x131f   :  { %v2167_v34 = vadd.f32 %v2166_v35, %v2165_v26 }
0x1321   :  { %v2168_v17 = vrot.slane %v2167_v34, 2 }
0x1323   :  { %v2169_v42 = vadd.f32 %v2168_v17, %v2167_v34 }
0x1325   :  { %v2170_v23 = vrot.slane %v2169_v42, 1 }
0x1327   :  { %v2171_v57 = vadd.f32 %v2170_v23, %v2169_v42 }
0x1329   :  { %v2196_v9 = vmul.f32 %v2195_v33, %v2171_v57 }
0x132b   :  { %2198 = vst.msk [vmem:[#allocation2] sm:$0x1] %vm2197_vm13, %v2196_v9 }
0x132c   :  { %2209 = dma.vmem_to_hbm [thread:$0]  %s2205_s28, 16, %s2207_s3, [#allocation3]  }
0x132d   :  { %2812 = dma.done.wait [#allocation3], 16  }
0x132e   :  { %2813 = vsyncadd [#allocation3], 4294967280 }
0x132f   :  { %2814 = dma.done.wait [#allocation5], 512  }
0x1330   :  { %2815 = vsyncadd [#allocation5], 4294966784 }
0x1331   :  { %2816 = dma.done.wait [#allocation8], 512  }
0x1332   :  { %2817 = vsyncadd [#allocation8], 4294966784 }
0x1333   :  { %2282 = vsyncpa [#allocation3], 1 }
0x1334   :  { %2283 = vsyncpa [#allocation5], 1 }
0x1335   :  { %2284 = vsyncpa [#allocation8], 1 }

</bundles_post_ra>
